<compile_context>
chip_gen: v5e
topology: v5e:2x2
jax: 0.10.0
libtpu: 0.0.40
codegen_flags: <defaults>
</compile_context>

<pallas_src>
import jax
import jax.numpy as jnp
from jax import lax
from jax.experimental import pallas as pl
from jax.experimental.pallas import tpu as pltpu


def _conv3x3_shuffle_prelu_kernel(x_hbm, w_ref, b_ref, p_ref, a_ref, o_ref,
                                  xs_ref, dma_sem):
    # x_hbm : (N, H+2, Cin, W+2) bf16  HBM (pl.ANY)  padded input, (H, C, W) order
    # w_ref : (9, Cout, Cin)     bf16                per-tap weights; Cout rows are
    #                                                permuted to (i, j, c) order
    # b_ref : (Cout, 1)          f32                 conv bias (same permutation)
    # p_ref : (r, W, W*r)        bf16                lane-interleave 0/1 matrices
    # a_ref : (1,)               f32  SMEM           PReLU slope
    # o_ref : (1, Cin, TH*r, W*r)                    fused, final-layout output tile
    # xs_ref: (TH+2, Cin, W+2)   bf16 VMEM scratch   haloed input rows
    n = pl.program_id(0)
    i = pl.program_id(1)

    th2, cin, _ = xs_ref.shape
    tile_h = th2 - 2
    r, w_dim, _ = p_ref.shape
    cout = w_ref.shape[1]

    # Haloed input rows for this tile (small vs. the output; overlaps with the
    # previous grid step's pipelined output writeback, so it is hidden).
    cp = pltpu.make_async_copy(
        x_hbm.at[n, pl.ds(i * tile_h, tile_h + 2)], xs_ref, dma_sem)
    cp.start()
    cp.wait()

    alpha = a_ref[0]

    for th in range(tile_h):
        # --- 3x3 conv for one image row: 9 accumulating MXU dots (K = Cin) ---
        acc = jnp.zeros((cout, w_dim), jnp.float32)
        for kh in range(3):
            for kw in range(3):
                tap = xs_ref[th + kh, :, kw:kw + w_dim]          # (Cin, W) bf16
                acc = acc + jnp.dot(w_ref[kh * 3 + kw], tap,
                                    preferred_element_type=jnp.float32)
        acc = acc + b_ref[...]                                   # bias, f32
        act = jnp.where(acc > 0, acc, alpha * acc)               # PReLU (shared)
        act = act.astype(jnp.bfloat16)                           # (Cout, W)

        # --- fused PixelShuffle: rows of `act` are ordered (i2, j, c) ---
        # output[c, (row)*r + i2, w*r + j] = act[(i2*r + j)*Cin + c, w]
        for i2 in range(r):
            out_row = jnp.zeros((cin, w_dim * r), jnp.float32)
            for j in range(r):
                sub = act[(i2 * r + j) * cin:(i2 * r + j + 1) * cin, :]
                # 0/1 matrix sends input lane w to output lane w*r + j (exact).
                out_row = out_row + jnp.dot(sub, p_ref[j],
                                            preferred_element_type=jnp.float32)
            # TODO(synk): group consecutive output rows into 8-sublane slabs
            # before storing to reduce partial-sublane stores.
            o_ref[0, :, th * r + i2, :] = out_row.astype(o_ref.dtype)


def _tpu_vmem_capacity():
    try:
        return int(pltpu.get_tpu_info().vmem_capacity_bytes)
    except Exception:
        return 64 * 1024 * 1024   # conservative (v7x-sized) default


def _vmem_limit_bytes():
    cap = _tpu_vmem_capacity()
    # ~60% of physical per-core VMEM, capped at 48 MiB (v5e/v6e have 128 MiB;
    # v7x only 64 MiB, so this lands around 38 MiB there).
    return int(min(cap * 0.6, 48 * 1024 * 1024))


def _pick_tile_h(H, W, Cin, r, max_rows=16):
    """Largest divisor of H that fits the VMEM budget; prefers >= 2 grid steps
    along the (parallel) row-tile axis so both v7x TensorCores get work."""
    Cout = Cin * r * r
    budget = int(_tpu_vmem_capacity() * 0.45)
    const_b = (9 * Cout * Cin + r * W * (W * r)) * 2 + Cout * 4

    def fits(th):
        xs_b = (th + 2) * max(Cin, 8) * max(W + 2, 128) * 2          # input scratch
        out_b = 2 * Cin * (th * r) * max(W * r, 128) * 2             # dbl-buffered out
        return const_b + xs_b + out_b <= budget

    cands = [th for th in range(1, min(H, max_rows) + 1)
             if H % th == 0 and fits(th)]
    if not cands:
        return 1
    multi = [th for th in cands if H // th >= 2]
    return max(multi) if multi else max(cands)


def upsample_block(x_nchw, weight_oihw, bias, alpha, up_scale,
                   tile_h=None, out_dtype=jnp.bfloat16):
    """Forward pass equivalent to the PyTorch UpsampleBLock (bf16 compute)."""
    N, Cin, H, W = x_nchw.shape
    r = int(up_scale)
    Cout = Cin * r * r
    assert weight_oihw.shape == (Cout, Cin, 3, 3)

    TH = tile_h if tile_h is not None else _pick_tile_h(H, W, Cin, r)
    assert H % TH == 0, (H, TH)

    # --- wrapper-side prep (all on the small tensors) ---
    # Input: NCHW -> (N, H, Cin, W) so per-row slabs are clean (Cin, W) tiles,
    # zero-pad H/W by 1, cast bf16.
    xt = jnp.transpose(x_nchw, (0, 2, 1, 3)).astype(jnp.bfloat16)
    x_pad = jnp.pad(xt, ((0, 0), (1, 1), (0, 0), (1, 1)))
    # TODO(synk): fold the zero padding into the halo DMA (clamped copy +
    # pl.when memset of edge rows) to remove this XLA pass over the input.

    # Permute conv output channels from PyTorch order (c, i, j) to (i, j, c) so
    # in-kernel row slices for each sub-pixel are contiguous.
    perm = [c * r * r + i2 * r + j
            for i2 in range(r) for j in range(r) for c in range(Cin)]
    perm = jnp.asarray(perm, jnp.int32)
    w_perm = weight_oihw[perm]                                       # (Cout, Cin, 3, 3)
    w_taps = jnp.transpose(w_perm, (2, 3, 0, 1)).reshape(9, Cout, Cin)
    w_taps = w_taps.astype(jnp.bfloat16)
    b_perm = bias[perm].reshape(Cout, 1).astype(jnp.float32)
    a1 = jnp.reshape(alpha, (1,)).astype(jnp.float32)

    # Lane-interleave permutation matrices: P[j][w, w*r + j] = 1.
    rows = (jnp.arange(W) * r)[:, None]
    cols = jnp.arange(W * r)[None, :]
    shuf = jnp.stack([(rows + j == cols).astype(jnp.bfloat16) for j in range(r)],
                     axis=0)                                         # (r, W, W*r)

    out = pl.pallas_call(
        _conv3x3_shuffle_prelu_kernel,
        out_shape=jax.ShapeDtypeStruct((N, Cin, H * r, W * r), out_dtype),
        grid_spec=pltpu.PrefetchScalarGridSpec(
            num_scalar_prefetch=0,
            grid=(N, H // TH),
            in_specs=[
                pl.BlockSpec(memory_space=pl.ANY),                    # x_pad (HBM)
                pl.BlockSpec((9, Cout, Cin), lambda n, i: (0, 0, 0)),  # tap weights
                pl.BlockSpec((Cout, 1), lambda n, i: (0, 0)),          # bias
                pl.BlockSpec((r, W, W * r), lambda n, i: (0, 0, 0)),   # shuffle mats
                pl.BlockSpec(memory_space=pltpu.MemorySpace.SMEM),     # PReLU slope
            ],
            out_specs=pl.BlockSpec((1, Cin, TH * r, W * r),
                                   lambda n, i: (n, 0, i, 0)),
            scratch_shapes=[
                pltpu.VMEM((TH + 2, Cin, W + 2), jnp.bfloat16),
                pltpu.SemaphoreType.DMA,
            ],
        ),
        compiler_params=pltpu.CompilerParams(
            dimension_semantics=("parallel", "parallel"),
            vmem_limit_bytes=_vmem_limit_bytes()),
    )(x_pad, w_taps, b_perm, shuf, a1)
    return out


def _reference(x_nchw, weight_oihw, bias, alpha, up_scale):
    """Plain-JAX reference mirroring the PyTorch module."""
    conv = lax.conv_general_dilated(
        x_nchw, weight_oihw, window_strides=(1, 1), padding=((1, 1), (1, 1)),
        dimension_numbers=("NCHW", "OIHW", "NCHW"),
        precision=lax.Precision.HIGHEST)
    conv = conv + bias[None, :, None, None]
    N, Cin, H, W = x_nchw.shape
    r = up_scale
    y = conv.reshape(N, Cin, r, r, H, W)
    y = jnp.transpose(y, (0, 1, 4, 2, 5, 3))
    y = y.reshape(N, Cin, H * r, W * r)
    return jnp.where(y > 0, y, alpha * y)


if __name__ == "__main__":
    # Small deterministic shapes consistent with the module.
    N, Cin, H, W = 2, 4, 16, 16
    up_scale = 2
    Cout = Cin * up_scale ** 2

    key = jax.random.PRNGKey(0)
    kx, kw, kb = jax.random.split(key, 3)

    x = jax.random.normal(kx, (N, Cin, H, W), jnp.float32)

    # PyTorch-like init: uniform(-bound, bound), bound = 1/sqrt(fan_in).
    fan_in = Cin * 3 * 3
    bound = 1.0 / (fan_in ** 0.5)
    weight = jax.random.uniform(kw, (Cout, Cin, 3, 3), jnp.float32,
                                minval=-bound, maxval=bound)
    bias = jax.random.uniform(kb, (Cout,), jnp.float32,
                              minval=-bound, maxval=bound)
    alpha = jnp.float32(0.25)   # nn.PReLU() default init

    # tile_h=8 -> grid (N=2, H/TH=2): exercises the haloed row-tiling path and
    # keeps >= 2 steps per parallel axis.
    out = upsample_block(x, weight, bias, alpha, up_scale, tile_h=8)
    out = jax.block_until_ready(out)

    # Reference at the kernel's bf16 input precision (accumulation stays f32;
    # the kernel output itself is bf16).
    x_q = x.astype(jnp.bfloat16).astype(jnp.float32)
    w_q = weight.astype(jnp.bfloat16).astype(jnp.float32)
    ref = _reference(x_q, w_q, bias, alpha, up_scale)

    assert out.shape == (N, Cin, H * up_scale, W * up_scale), out.shape
    out_f32 = out.astype(jnp.float32)
    err = float(jnp.max(jnp.abs(out_f32 - ref)))
    assert jnp.allclose(out_f32, ref, atol=5e-2, rtol=5e-2), \
        f"mismatch vs reference (max abs err {err})"

    print("KERNEL_OK")
</pallas_src>

<mosaic_0001>
module attributes {stable_mosaic.version = 11 : i64} {
  func.func @_conv3x3_shuffle_prelu_kernel(%arg0: i32, %arg1: i32, %arg2: memref<2x18x4x18xbf16, #tpu.memory_space<any>>, %arg3: memref<9x16x4xbf16, #tpu.memory_space<vmem>>, %arg4: memref<16x1xf32, #tpu.memory_space<vmem>>, %arg5: memref<2x16x32xbf16, #tpu.memory_space<vmem>>, %arg6: memref<1xf32, #tpu.memory_space<smem>>, %arg7: memref<1x4x16x32xbf16, #tpu.memory_space<vmem>>, %arg8: memref<10x4x18xbf16, #tpu.memory_space<vmem>>, %arg9: memref<!tpu.dma_semaphore, #tpu.memory_space<semaphore_mem>>) attributes {dimension_semantics = [#tpu.dimension_semantics<parallel>, #tpu.dimension_semantics<parallel>], iteration_bounds = array<i64: 2, 2>, scalar_prefetch = 0 : i64, scratch_operands = 2 : i64, tpu.core_type = #tpu.core_type<tc>, window_params = [{}, {pipeline_mode = #tpu.pipeline_mode<synchronous>, transform_indices = @transform_1, window_bounds = array<i64: 9, 16, 4>}, {pipeline_mode = #tpu.pipeline_mode<synchronous>, transform_indices = @transform_2, window_bounds = array<i64: 16, 1>}, {pipeline_mode = #tpu.pipeline_mode<synchronous>, transform_indices = @transform_3, window_bounds = array<i64: 2, 16, 32>}, {transform_indices = @transform_4, window_bounds = array<i64: 1>}, {transform_indices = @transform_5, window_bounds = array<i64: 1, 4, 16, 32>}]} {
    %c8_i32 = arith.constant 8 : i32
    %0 = arith.muli %arg1, %c8_i32 : i32
    %c0_i32 = arith.constant 0 : i32
    %c0_i32_0 = arith.constant 0 : i32
    %1 = tpu.memref_slice %arg2[%arg0, %0, %c0_i32, %c0_i32_0] : memref<2x18x4x18xbf16, #tpu.memory_space<any>> -> memref<1x10x4x18xbf16, #tpu.memory_space<any>>
    %2 = tpu.memref_squeeze %1 : memref<1x10x4x18xbf16, #tpu.memory_space<any>> -> memref<10x4x18xbf16, #tpu.memory_space<any>>
    tpu.enqueue_dma source(%2 : memref<10x4x18xbf16, #tpu.memory_space<any>>) target(%arg8 : memref<10x4x18xbf16, #tpu.memory_space<vmem>>) target_semaphore(%arg9 : memref<!tpu.dma_semaphore, #tpu.memory_space<semaphore_mem>>)
    %c0_i32_1 = arith.constant 0 : i32
    %c0_i32_2 = arith.constant 0 : i32
    %3 = tpu.memref_slice %arg2[%arg0, %0, %c0_i32_1, %c0_i32_2] : memref<2x18x4x18xbf16, #tpu.memory_space<any>> -> memref<1x10x4x18xbf16, #tpu.memory_space<any>>
    %4 = tpu.memref_squeeze %3 : memref<1x10x4x18xbf16, #tpu.memory_space<any>> -> memref<10x4x18xbf16, #tpu.memory_space<any>>
    tpu.wait_dma2 semaphore(%arg9 : memref<!tpu.dma_semaphore, #tpu.memory_space<semaphore_mem>>) src(%4 : memref<10x4x18xbf16, #tpu.memory_space<any>>) dst(%arg8 : memref<10x4x18xbf16, #tpu.memory_space<vmem>>)
    %c0 = arith.constant 0 : index
    %5 = memref.load %arg6[%c0] : memref<1xf32, #tpu.memory_space<smem>>
    %cst = arith.constant 0.000000e+00 : f32
    %6 = vector.broadcast %cst : f32 to vector<16x16xf32>
    %c0_3 = arith.constant 0 : index
    %c0_4 = arith.constant 0 : index
    %c0_5 = arith.constant 0 : index
    %7 = vector.load %arg8[%c0_3, %c0_4, %c0_5] : memref<10x4x18xbf16, #tpu.memory_space<vmem>>, vector<1x4x16xbf16>
    %8 = vector.shape_cast %7 : vector<1x4x16xbf16> to vector<4x16xbf16>
    %c0_6 = arith.constant 0 : index
    %c0_7 = arith.constant 0 : index
    %c0_8 = arith.constant 0 : index
    %9 = vector.load %arg3[%c0_6, %c0_7, %c0_8] : memref<9x16x4xbf16, #tpu.memory_space<vmem>>, vector<1x16x4xbf16>
    %10 = vector.shape_cast %9 : vector<1x16x4xbf16> to vector<16x4xbf16>
    %cst_9 = arith.constant dense<0.000000e+00> : vector<16x16xf32>
    %11 = tpu.matmul %10, %8, %cst_9 {dimension_numbers = #tpu.dot_dimension_numbers<[1], [0], [0], [1], [0, 0, 1, 1], [], []>} : vector<16x4xbf16>, vector<4x16xbf16>, vector<16x16xf32> -> vector<16x16xf32>
    %12 = arith.addf %6, %11 : vector<16x16xf32>
    %c0_10 = arith.constant 0 : index
    %c0_11 = arith.constant 0 : index
    %c1 = arith.constant 1 : index
    %13 = vector.load %arg8[%c0_10, %c0_11, %c1] : memref<10x4x18xbf16, #tpu.memory_space<vmem>>, vector<1x4x16xbf16>
    %14 = vector.shape_cast %13 : vector<1x4x16xbf16> to vector<4x16xbf16>
    %c1_12 = arith.constant 1 : index
    %c0_13 = arith.constant 0 : index
    %c0_14 = arith.constant 0 : index
    %15 = vector.load %arg3[%c1_12, %c0_13, %c0_14] : memref<9x16x4xbf16, #tpu.memory_space<vmem>>, vector<1x16x4xbf16>
    %16 = vector.shape_cast %15 : vector<1x16x4xbf16> to vector<16x4xbf16>
    %cst_15 = arith.constant dense<0.000000e+00> : vector<16x16xf32>
    %17 = tpu.matmul %16, %14, %cst_15 {dimension_numbers = #tpu.dot_dimension_numbers<[1], [0], [0], [1], [0, 0, 1, 1], [], []>} : vector<16x4xbf16>, vector<4x16xbf16>, vector<16x16xf32> -> vector<16x16xf32>
    %18 = arith.addf %12, %17 : vector<16x16xf32>
    %c0_16 = arith.constant 0 : index
    %c0_17 = arith.constant 0 : index
    %c2 = arith.constant 2 : index
    %19 = vector.load %arg8[%c0_16, %c0_17, %c2] : memref<10x4x18xbf16, #tpu.memory_space<vmem>>, vector<1x4x16xbf16>
    %20 = vector.shape_cast %19 : vector<1x4x16xbf16> to vector<4x16xbf16>
    %c2_18 = arith.constant 2 : index
    %c0_19 = arith.constant 0 : index
    %c0_20 = arith.constant 0 : index
    %21 = vector.load %arg3[%c2_18, %c0_19, %c0_20] : memref<9x16x4xbf16, #tpu.memory_space<vmem>>, vector<1x16x4xbf16>
    %22 = vector.shape_cast %21 : vector<1x16x4xbf16> to vector<16x4xbf16>
    %cst_21 = arith.constant dense<0.000000e+00> : vector<16x16xf32>
    %23 = tpu.matmul %22, %20, %cst_21 {dimension_numbers = #tpu.dot_dimension_numbers<[1], [0], [0], [1], [0, 0, 1, 1], [], []>} : vector<16x4xbf16>, vector<4x16xbf16>, vector<16x16xf32> -> vector<16x16xf32>
    %24 = arith.addf %18, %23 : vector<16x16xf32>
    %c1_22 = arith.constant 1 : index
    %c0_23 = arith.constant 0 : index
    %c0_24 = arith.constant 0 : index
    %25 = vector.load %arg8[%c1_22, %c0_23, %c0_24] : memref<10x4x18xbf16, #tpu.memory_space<vmem>>, vector<1x4x16xbf16>
    %26 = vector.shape_cast %25 : vector<1x4x16xbf16> to vector<4x16xbf16>
    %c3 = arith.constant 3 : index
    %c0_25 = arith.constant 0 : index
    %c0_26 = arith.constant 0 : index
    %27 = vector.load %arg3[%c3, %c0_25, %c0_26] : memref<9x16x4xbf16, #tpu.memory_space<vmem>>, vector<1x16x4xbf16>
    %28 = vector.shape_cast %27 : vector<1x16x4xbf16> to vector<16x4xbf16>
    %cst_27 = arith.constant dense<0.000000e+00> : vector<16x16xf32>
    %29 = tpu.matmul %28, %26, %cst_27 {dimension_numbers = #tpu.dot_dimension_numbers<[1], [0], [0], [1], [0, 0, 1, 1], [], []>} : vector<16x4xbf16>, vector<4x16xbf16>, vector<16x16xf32> -> vector<16x16xf32>
    %30 = arith.addf %24, %29 : vector<16x16xf32>
    %c1_28 = arith.constant 1 : index
    %c0_29 = arith.constant 0 : index
    %c1_30 = arith.constant 1 : index
    %31 = vector.load %arg8[%c1_28, %c0_29, %c1_30] : memref<10x4x18xbf16, #tpu.memory_space<vmem>>, vector<1x4x16xbf16>
    %32 = vector.shape_cast %31 : vector<1x4x16xbf16> to vector<4x16xbf16>
    %c4 = arith.constant 4 : index
    %c0_31 = arith.constant 0 : index
    %c0_32 = arith.constant 0 : index
    %33 = vector.load %arg3[%c4, %c0_31, %c0_32] : memref<9x16x4xbf16, #tpu.memory_space<vmem>>, vector<1x16x4xbf16>
    %34 = vector.shape_cast %33 : vector<1x16x4xbf16> to vector<16x4xbf16>
    %cst_33 = arith.constant dense<0.000000e+00> : vector<16x16xf32>
    %35 = tpu.matmul %34, %32, %cst_33 {dimension_numbers = #tpu.dot_dimension_numbers<[1], [0], [0], [1], [0, 0, 1, 1], [], []>} : vector<16x4xbf16>, vector<4x16xbf16>, vector<16x16xf32> -> vector<16x16xf32>
    %36 = arith.addf %30, %35 : vector<16x16xf32>
    %c1_34 = arith.constant 1 : index
    %c0_35 = arith.constant 0 : index
    %c2_36 = arith.constant 2 : index
    %37 = vector.load %arg8[%c1_34, %c0_35, %c2_36] : memref<10x4x18xbf16, #tpu.memory_space<vmem>>, vector<1x4x16xbf16>
    %38 = vector.shape_cast %37 : vector<1x4x16xbf16> to vector<4x16xbf16>
    %c5 = arith.constant 5 : index
    %c0_37 = arith.constant 0 : index
    %c0_38 = arith.constant 0 : index
    %39 = vector.load %arg3[%c5, %c0_37, %c0_38] : memref<9x16x4xbf16, #tpu.memory_space<vmem>>, vector<1x16x4xbf16>
    %40 = vector.shape_cast %39 : vector<1x16x4xbf16> to vector<16x4xbf16>
    %cst_39 = arith.constant dense<0.000000e+00> : vector<16x16xf32>
    %41 = tpu.matmul %40, %38, %cst_39 {dimension_numbers = #tpu.dot_dimension_numbers<[1], [0], [0], [1], [0, 0, 1, 1], [], []>} : vector<16x4xbf16>, vector<4x16xbf16>, vector<16x16xf32> -> vector<16x16xf32>
    %42 = arith.addf %36, %41 : vector<16x16xf32>
    %c2_40 = arith.constant 2 : index
    %c0_41 = arith.constant 0 : index
    %c0_42 = arith.constant 0 : index
    %43 = vector.load %arg8[%c2_40, %c0_41, %c0_42] : memref<10x4x18xbf16, #tpu.memory_space<vmem>>, vector<1x4x16xbf16>
    %44 = vector.shape_cast %43 : vector<1x4x16xbf16> to vector<4x16xbf16>
    %c6 = arith.constant 6 : index
    %c0_43 = arith.constant 0 : index
    %c0_44 = arith.constant 0 : index
    %45 = vector.load %arg3[%c6, %c0_43, %c0_44] : memref<9x16x4xbf16, #tpu.memory_space<vmem>>, vector<1x16x4xbf16>
    %46 = vector.shape_cast %45 : vector<1x16x4xbf16> to vector<16x4xbf16>
    %cst_45 = arith.constant dense<0.000000e+00> : vector<16x16xf32>
    %47 = tpu.matmul %46, %44, %cst_45 {dimension_numbers = #tpu.dot_dimension_numbers<[1], [0], [0], [1], [0, 0, 1, 1], [], []>} : vector<16x4xbf16>, vector<4x16xbf16>, vector<16x16xf32> -> vector<16x16xf32>
    %48 = arith.addf %42, %47 : vector<16x16xf32>
    %c2_46 = arith.constant 2 : index
    %c0_47 = arith.constant 0 : index
    %c1_48 = arith.constant 1 : index
    %49 = vector.load %arg8[%c2_46, %c0_47, %c1_48] : memref<10x4x18xbf16, #tpu.memory_space<vmem>>, vector<1x4x16xbf16>
    %50 = vector.shape_cast %49 : vector<1x4x16xbf16> to vector<4x16xbf16>
    %c7 = arith.constant 7 : index
    %c0_49 = arith.constant 0 : index
    %c0_50 = arith.constant 0 : index
    %51 = vector.load %arg3[%c7, %c0_49, %c0_50] : memref<9x16x4xbf16, #tpu.memory_space<vmem>>, vector<1x16x4xbf16>
    %52 = vector.shape_cast %51 : vector<1x16x4xbf16> to vector<16x4xbf16>
    %cst_51 = arith.constant dense<0.000000e+00> : vector<16x16xf32>
    %53 = tpu.matmul %52, %50, %cst_51 {dimension_numbers = #tpu.dot_dimension_numbers<[1], [0], [0], [1], [0, 0, 1, 1], [], []>} : vector<16x4xbf16>, vector<4x16xbf16>, vector<16x16xf32> -> vector<16x16xf32>
    %54 = arith.addf %48, %53 : vector<16x16xf32>
    %c2_52 = arith.constant 2 : index
    %c0_53 = arith.constant 0 : index
    %c2_54 = arith.constant 2 : index
    %55 = vector.load %arg8[%c2_52, %c0_53, %c2_54] : memref<10x4x18xbf16, #tpu.memory_space<vmem>>, vector<1x4x16xbf16>
    %56 = vector.shape_cast %55 : vector<1x4x16xbf16> to vector<4x16xbf16>
    %c8 = arith.constant 8 : index
    %c0_55 = arith.constant 0 : index
    %c0_56 = arith.constant 0 : index
    %57 = vector.load %arg3[%c8, %c0_55, %c0_56] : memref<9x16x4xbf16, #tpu.memory_space<vmem>>, vector<1x16x4xbf16>
    %58 = vector.shape_cast %57 : vector<1x16x4xbf16> to vector<16x4xbf16>
    %cst_57 = arith.constant dense<0.000000e+00> : vector<16x16xf32>
    %59 = tpu.matmul %58, %56, %cst_57 {dimension_numbers = #tpu.dot_dimension_numbers<[1], [0], [0], [1], [0, 0, 1, 1], [], []>} : vector<16x4xbf16>, vector<4x16xbf16>, vector<16x16xf32> -> vector<16x16xf32>
    %60 = arith.addf %54, %59 : vector<16x16xf32>
    %c0_58 = arith.constant 0 : index
    %c0_59 = arith.constant 0 : index
    %61 = vector.load %arg4[%c0_58, %c0_59] : memref<16x1xf32, #tpu.memory_space<vmem>>, vector<16x1xf32>
    %62 = vector.broadcast %61 : vector<16x1xf32> to vector<16x16xf32>
    %63 = arith.addf %60, %62 : vector<16x16xf32>
    %cst_60 = arith.constant 0.000000e+00 : f32
    %64 = vector.broadcast %cst_60 : f32 to vector<16x16xf32>
    %65 = arith.cmpf ogt, %63, %64 : vector<16x16xf32>
    %66 = vector.broadcast %5 : f32 to vector<16x16xf32>
    %67 = arith.mulf %66, %63 : vector<16x16xf32>
    %68 = arith.select %65, %63, %67 : vector<16x16xi1>, vector<16x16xf32>
    %69 = arith.truncf %68 : vector<16x16xf32> to vector<16x16xbf16>
    %cst_61 = arith.constant 0.000000e+00 : f32
    %70 = vector.broadcast %cst_61 : f32 to vector<4x32xf32>
    %71 = vector.extract_strided_slice %69 {offsets = [0, 0], sizes = [4, 16], strides = [1, 1]} : vector<16x16xbf16> to vector<4x16xbf16>
    %c0_62 = arith.constant 0 : index
    %c0_63 = arith.constant 0 : index
    %c0_64 = arith.constant 0 : index
    %72 = vector.load %arg5[%c0_62, %c0_63, %c0_64] : memref<2x16x32xbf16, #tpu.memory_space<vmem>>, vector<1x16x32xbf16>
    %73 = vector.shape_cast %72 : vector<1x16x32xbf16> to vector<16x32xbf16>
    %cst_65 = arith.constant dense<0.000000e+00> : vector<4x32xf32>
    %74 = tpu.matmul %71, %73, %cst_65 {dimension_numbers = #tpu.dot_dimension_numbers<[1], [0], [0], [1], [0, 0, 1, 1], [], []>} : vector<4x16xbf16>, vector<16x32xbf16>, vector<4x32xf32> -> vector<4x32xf32>
    %75 = arith.addf %70, %74 : vector<4x32xf32>
    %76 = vector.extract_strided_slice %69 {offsets = [4, 0], sizes = [4, 16], strides = [1, 1]} : vector<16x16xbf16> to vector<4x16xbf16>
    %c1_66 = arith.constant 1 : index
    %c0_67 = arith.constant 0 : index
    %c0_68 = arith.constant 0 : index
    %77 = vector.load %arg5[%c1_66, %c0_67, %c0_68] : memref<2x16x32xbf16, #tpu.memory_space<vmem>>, vector<1x16x32xbf16>
    %78 = vector.shape_cast %77 : vector<1x16x32xbf16> to vector<16x32xbf16>
    %cst_69 = arith.constant dense<0.000000e+00> : vector<4x32xf32>
    %79 = tpu.matmul %76, %78, %cst_69 {dimension_numbers = #tpu.dot_dimension_numbers<[1], [0], [0], [1], [0, 0, 1, 1], [], []>} : vector<4x16xbf16>, vector<16x32xbf16>, vector<4x32xf32> -> vector<4x32xf32>
    %80 = arith.addf %75, %79 : vector<4x32xf32>
    %81 = arith.truncf %80 : vector<4x32xf32> to vector<4x32xbf16>
    %c0_70 = arith.constant 0 : index
    %c0_71 = arith.constant 0 : index
    %c0_72 = arith.constant 0 : index
    %c0_73 = arith.constant 0 : index
    %82 = vector.load %arg7[%c0_70, %c0_71, %c0_72, %c0_73] : memref<1x4x16x32xbf16, #tpu.memory_space<vmem>>, vector<1x4x1x32xbf16>
    %83 = vector.shape_cast %82 : vector<1x4x1x32xbf16> to vector<4x32xbf16>
    %84 = vector.shape_cast %81 : vector<4x32xbf16> to vector<1x4x1x32xbf16>
    tpu.vector_store %arg7[%c0_70, %c0_71, %c0_72, %c0_73], %84 {strides = array<i32>} : memref<1x4x16x32xbf16, #tpu.memory_space<vmem>>, vector<1x4x1x32xbf16>,
    %cst_74 = arith.constant 0.000000e+00 : f32
    %85 = vector.broadcast %cst_74 : f32 to vector<4x32xf32>
    %86 = vector.extract_strided_slice %69 {offsets = [8, 0], sizes = [4, 16], strides = [1, 1]} : vector<16x16xbf16> to vector<4x16xbf16>
    %c0_75 = arith.constant 0 : index
    %c0_76 = arith.constant 0 : index
    %c0_77 = arith.constant 0 : index
    %87 = vector.load %arg5[%c0_75, %c0_76, %c0_77] : memref<2x16x32xbf16, #tpu.memory_space<vmem>>, vector<1x16x32xbf16>
    %88 = vector.shape_cast %87 : vector<1x16x32xbf16> to vector<16x32xbf16>
    %cst_78 = arith.constant dense<0.000000e+00> : vector<4x32xf32>
    %89 = tpu.matmul %86, %88, %cst_78 {dimension_numbers = #tpu.dot_dimension_numbers<[1], [0], [0], [1], [0, 0, 1, 1], [], []>} : vector<4x16xbf16>, vector<16x32xbf16>, vector<4x32xf32> -> vector<4x32xf32>
    %90 = arith.addf %85, %89 : vector<4x32xf32>
    %91 = vector.extract_strided_slice %69 {offsets = [12, 0], sizes = [4, 16], strides = [1, 1]} : vector<16x16xbf16> to vector<4x16xbf16>
    %c1_79 = arith.constant 1 : index
    %c0_80 = arith.constant 0 : index
    %c0_81 = arith.constant 0 : index
    %92 = vector.load %arg5[%c1_79, %c0_80, %c0_81] : memref<2x16x32xbf16, #tpu.memory_space<vmem>>, vector<1x16x32xbf16>
    %93 = vector.shape_cast %92 : vector<1x16x32xbf16> to vector<16x32xbf16>
    %cst_82 = arith.constant dense<0.000000e+00> : vector<4x32xf32>
    %94 = tpu.matmul %91, %93, %cst_82 {dimension_numbers = #tpu.dot_dimension_numbers<[1], [0], [0], [1], [0, 0, 1, 1], [], []>} : vector<4x16xbf16>, vector<16x32xbf16>, vector<4x32xf32> -> vector<4x32xf32>
    %95 = arith.addf %90, %94 : vector<4x32xf32>
    %96 = arith.truncf %95 : vector<4x32xf32> to vector<4x32xbf16>
    %c0_83 = arith.constant 0 : index
    %c0_84 = arith.constant 0 : index
    %c1_85 = arith.constant 1 : index
    %c0_86 = arith.constant 0 : index
    %97 = vector.load %arg7[%c0_83, %c0_84, %c1_85, %c0_86] : memref<1x4x16x32xbf16, #tpu.memory_space<vmem>>, vector<1x4x1x32xbf16>
    %98 = vector.shape_cast %97 : vector<1x4x1x32xbf16> to vector<4x32xbf16>
    %99 = vector.shape_cast %96 : vector<4x32xbf16> to vector<1x4x1x32xbf16>
    tpu.vector_store %arg7[%c0_83, %c0_84, %c1_85, %c0_86], %99 {strides = array<i32>} : memref<1x4x16x32xbf16, #tpu.memory_space<vmem>>, vector<1x4x1x32xbf16>,
    %cst_87 = arith.constant 0.000000e+00 : f32
    %100 = vector.broadcast %cst_87 : f32 to vector<16x16xf32>
    %c1_88 = arith.constant 1 : index
    %c0_89 = arith.constant 0 : index
    %c0_90 = arith.constant 0 : index
    %101 = vector.load %arg8[%c1_88, %c0_89, %c0_90] : memref<10x4x18xbf16, #tpu.memory_space<vmem>>, vector<1x4x16xbf16>
    %102 = vector.shape_cast %101 : vector<1x4x16xbf16> to vector<4x16xbf16>
    %c0_91 = arith.constant 0 : index
    %c0_92 = arith.constant 0 : index
    %c0_93 = arith.constant 0 : index
    %103 = vector.load %arg3[%c0_91, %c0_92, %c0_93] : memref<9x16x4xbf16, #tpu.memory_space<vmem>>, vector<1x16x4xbf16>
    %104 = vector.shape_cast %103 : vector<1x16x4xbf16> to vector<16x4xbf16>
    %cst_94 = arith.constant dense<0.000000e+00> : vector<16x16xf32>
    %105 = tpu.matmul %104, %102, %cst_94 {dimension_numbers = #tpu.dot_dimension_numbers<[1], [0], [0], [1], [0, 0, 1, 1], [], []>} : vector<16x4xbf16>, vector<4x16xbf16>, vector<16x16xf32> -> vector<16x16xf32>
    %106 = arith.addf %100, %105 : vector<16x16xf32>
    %c1_95 = arith.constant 1 : index
    %c0_96 = arith.constant 0 : index
    %c1_97 = arith.constant 1 : index
    %107 = vector.load %arg8[%c1_95, %c0_96, %c1_97] : memref<10x4x18xbf16, #tpu.memory_space<vmem>>, vector<1x4x16xbf16>
    %108 = vector.shape_cast %107 : vector<1x4x16xbf16> to vector<4x16xbf16>
    %c1_98 = arith.constant 1 : index
    %c0_99 = arith.constant 0 : index
    %c0_100 = arith.constant 0 : index
    %109 = vector.load %arg3[%c1_98, %c0_99, %c0_100] : memref<9x16x4xbf16, #tpu.memory_space<vmem>>, vector<1x16x4xbf16>
    %110 = vector.shape_cast %109 : vector<1x16x4xbf16> to vector<16x4xbf16>
    %cst_101 = arith.constant dense<0.000000e+00> : vector<16x16xf32>
    %111 = tpu.matmul %110, %108, %cst_101 {dimension_numbers = #tpu.dot_dimension_numbers<[1], [0], [0], [1], [0, 0, 1, 1], [], []>} : vector<16x4xbf16>, vector<4x16xbf16>, vector<16x16xf32> -> vector<16x16xf32>
    %112 = arith.addf %106, %111 : vector<16x16xf32>
    %c1_102 = arith.constant 1 : index
    %c0_103 = arith.constant 0 : index
    %c2_104 = arith.constant 2 : index
    %113 = vector.load %arg8[%c1_102, %c0_103, %c2_104] : memref<10x4x18xbf16, #tpu.memory_space<vmem>>, vector<1x4x16xbf16>
    %114 = vector.shape_cast %113 : vector<1x4x16xbf16> to vector<4x16xbf16>
    %c2_105 = arith.constant 2 : index
    %c0_106 = arith.constant 0 : index
    %c0_107 = arith.constant 0 : index
    %115 = vector.load %arg3[%c2_105, %c0_106, %c0_107] : memref<9x16x4xbf16, #tpu.memory_space<vmem>>, vector<1x16x4xbf16>
    %116 = vector.shape_cast %115 : vector<1x16x4xbf16> to vector<16x4xbf16>
    %cst_108 = arith.constant dense<0.000000e+00> : vector<16x16xf32>
    %117 = tpu.matmul %116, %114, %cst_108 {dimension_numbers = #tpu.dot_dimension_numbers<[1], [0], [0], [1], [0, 0, 1, 1], [], []>} : vector<16x4xbf16>, vector<4x16xbf16>, vector<16x16xf32> -> vector<16x16xf32>
    %118 = arith.addf %112, %117 : vector<16x16xf32>
    %c2_109 = arith.constant 2 : index
    %c0_110 = arith.constant 0 : index
    %c0_111 = arith.constant 0 : index
    %119 = vector.load %arg8[%c2_109, %c0_110, %c0_111] : memref<10x4x18xbf16, #tpu.memory_space<vmem>>, vector<1x4x16xbf16>
    %120 = vector.shape_cast %119 : vector<1x4x16xbf16> to vector<4x16xbf16>
    %c3_112 = arith.constant 3 : index
    %c0_113 = arith.constant 0 : index
    %c0_114 = arith.constant 0 : index
    %121 = vector.load %arg3[%c3_112, %c0_113, %c0_114] : memref<9x16x4xbf16, #tpu.memory_space<vmem>>, vector<1x16x4xbf16>
    %122 = vector.shape_cast %121 : vector<1x16x4xbf16> to vector<16x4xbf16>
    %cst_115 = arith.constant dense<0.000000e+00> : vector<16x16xf32>
    %123 = tpu.matmul %122, %120, %cst_115 {dimension_numbers = #tpu.dot_dimension_numbers<[1], [0], [0], [1], [0, 0, 1, 1], [], []>} : vector<16x4xbf16>, vector<4x16xbf16>, vector<16x16xf32> -> vector<16x16xf32>
    %124 = arith.addf %118, %123 : vector<16x16xf32>
    %c2_116 = arith.constant 2 : index
    %c0_117 = arith.constant 0 : index
    %c1_118 = arith.constant 1 : index
    %125 = vector.load %arg8[%c2_116, %c0_117, %c1_118] : memref<10x4x18xbf16, #tpu.memory_space<vmem>>, vector<1x4x16xbf16>
    %126 = vector.shape_cast %125 : vector<1x4x16xbf16> to vector<4x16xbf16>
    %c4_119 = arith.constant 4 : index
    %c0_120 = arith.constant 0 : index
    %c0_121 = arith.constant 0 : index
    %127 = vector.load %arg3[%c4_119, %c0_120, %c0_121] : memref<9x16x4xbf16, #tpu.memory_space<vmem>>, vector<1x16x4xbf16>
    %128 = vector.shape_cast %127 : vector<1x16x4xbf16> to vector<16x4xbf16>
    %cst_122 = arith.constant dense<0.000000e+00> : vector<16x16xf32>
    %129 = tpu.matmul %128, %126, %cst_122 {dimension_numbers = #tpu.dot_dimension_numbers<[1], [0], [0], [1], [0, 0, 1, 1], [], []>} : vector<16x4xbf16>, vector<4x16xbf16>, vector<16x16xf32> -> vector<16x16xf32>
    %130 = arith.addf %124, %129 : vector<16x16xf32>
    %c2_123 = arith.constant 2 : index
    %c0_124 = arith.constant 0 : index
    %c2_125 = arith.constant 2 : index
    %131 = vector.load %arg8[%c2_123, %c0_124, %c2_125] : memref<10x4x18xbf16, #tpu.memory_space<vmem>>, vector<1x4x16xbf16>
    %132 = vector.shape_cast %131 : vector<1x4x16xbf16> to vector<4x16xbf16>
    %c5_126 = arith.constant 5 : index
    %c0_127 = arith.constant 0 : index
    %c0_128 = arith.constant 0 : index
    %133 = vector.load %arg3[%c5_126, %c0_127, %c0_128] : memref<9x16x4xbf16, #tpu.memory_space<vmem>>, vector<1x16x4xbf16>
    %134 = vector.shape_cast %133 : vector<1x16x4xbf16> to vector<16x4xbf16>
    %cst_129 = arith.constant dense<0.000000e+00> : vector<16x16xf32>
    %135 = tpu.matmul %134, %132, %cst_129 {dimension_numbers = #tpu.dot_dimension_numbers<[1], [0], [0], [1], [0, 0, 1, 1], [], []>} : vector<16x4xbf16>, vector<4x16xbf16>, vector<16x16xf32> -> vector<16x16xf32>
    %136 = arith.addf %130, %135 : vector<16x16xf32>
    %c3_130 = arith.constant 3 : index
    %c0_131 = arith.constant 0 : index
    %c0_132 = arith.constant 0 : index
    %137 = vector.load %arg8[%c3_130, %c0_131, %c0_132] : memref<10x4x18xbf16, #tpu.memory_space<vmem>>, vector<1x4x16xbf16>
    %138 = vector.shape_cast %137 : vector<1x4x16xbf16> to vector<4x16xbf16>
    %c6_133 = arith.constant 6 : index
    %c0_134 = arith.constant 0 : index
    %c0_135 = arith.constant 0 : index
    %139 = vector.load %arg3[%c6_133, %c0_134, %c0_135] : memref<9x16x4xbf16, #tpu.memory_space<vmem>>, vector<1x16x4xbf16>
    %140 = vector.shape_cast %139 : vector<1x16x4xbf16> to vector<16x4xbf16>
    %cst_136 = arith.constant dense<0.000000e+00> : vector<16x16xf32>
    %141 = tpu.matmul %140, %138, %cst_136 {dimension_numbers = #tpu.dot_dimension_numbers<[1], [0], [0], [1], [0, 0, 1, 1], [], []>} : vector<16x4xbf16>, vector<4x16xbf16>, vector<16x16xf32> -> vector<16x16xf32>
    %142 = arith.addf %136, %141 : vector<16x16xf32>
    %c3_137 = arith.constant 3 : index
    %c0_138 = arith.constant 0 : index
    %c1_139 = arith.constant 1 : index
    %143 = vector.load %arg8[%c3_137, %c0_138, %c1_139] : memref<10x4x18xbf16, #tpu.memory_space<vmem>>, vector<1x4x16xbf16>
    %144 = vector.shape_cast %143 : vector<1x4x16xbf16> to vector<4x16xbf16>
    %c7_140 = arith.constant 7 : index
    %c0_141 = arith.constant 0 : index
    %c0_142 = arith.constant 0 : index
    %145 = vector.load %arg3[%c7_140, %c0_141, %c0_142] : memref<9x16x4xbf16, #tpu.memory_space<vmem>>, vector<1x16x4xbf16>
    %146 = vector.shape_cast %145 : vector<1x16x4xbf16> to vector<16x4xbf16>
    %cst_143 = arith.constant dense<0.000000e+00> : vector<16x16xf32>
    %147 = tpu.matmul %146, %144, %cst_143 {dimension_numbers = #tpu.dot_dimension_numbers<[1], [0], [0], [1], [0, 0, 1, 1], [], []>} : vector<16x4xbf16>, vector<4x16xbf16>, vector<16x16xf32> -> vector<16x16xf32>
    %148 = arith.addf %142, %147 : vector<16x16xf32>
    %c3_144 = arith.constant 3 : index
    %c0_145 = arith.constant 0 : index
    %c2_146 = arith.constant 2 : index
    %149 = vector.load %arg8[%c3_144, %c0_145, %c2_146] : memref<10x4x18xbf16, #tpu.memory_space<vmem>>, vector<1x4x16xbf16>
    %150 = vector.shape_cast %149 : vector<1x4x16xbf16> to vector<4x16xbf16>
    %c8_147 = arith.constant 8 : index
    %c0_148 = arith.constant 0 : index
    %c0_149 = arith.constant 0 : index
    %151 = vector.load %arg3[%c8_147, %c0_148, %c0_149] : memref<9x16x4xbf16, #tpu.memory_space<vmem>>, vector<1x16x4xbf16>
    %152 = vector.shape_cast %151 : vector<1x16x4xbf16> to vector<16x4xbf16>
    %cst_150 = arith.constant dense<0.000000e+00> : vector<16x16xf32>
    %153 = tpu.matmul %152, %150, %cst_150 {dimension_numbers = #tpu.dot_dimension_numbers<[1], [0], [0], [1], [0, 0, 1, 1], [], []>} : vector<16x4xbf16>, vector<4x16xbf16>, vector<16x16xf32> -> vector<16x16xf32>
    %154 = arith.addf %148, %153 : vector<16x16xf32>
    %c0_151 = arith.constant 0 : index
    %c0_152 = arith.constant 0 : index
    %155 = vector.load %arg4[%c0_151, %c0_152] : memref<16x1xf32, #tpu.memory_space<vmem>>, vector<16x1xf32>
    %156 = vector.broadcast %155 : vector<16x1xf32> to vector<16x16xf32>
    %157 = arith.addf %154, %156 : vector<16x16xf32>
    %cst_153 = arith.constant 0.000000e+00 : f32
    %158 = vector.broadcast %cst_153 : f32 to vector<16x16xf32>
    %159 = arith.cmpf ogt, %157, %158 : vector<16x16xf32>
    %160 = vector.broadcast %5 : f32 to vector<16x16xf32>
    %161 = arith.mulf %160, %157 : vector<16x16xf32>
    %162 = arith.select %159, %157, %161 : vector<16x16xi1>, vector<16x16xf32>
    %163 = arith.truncf %162 : vector<16x16xf32> to vector<16x16xbf16>
    %cst_154 = arith.constant 0.000000e+00 : f32
    %164 = vector.broadcast %cst_154 : f32 to vector<4x32xf32>
    %165 = vector.extract_strided_slice %163 {offsets = [0, 0], sizes = [4, 16], strides = [1, 1]} : vector<16x16xbf16> to vector<4x16xbf16>
    %c0_155 = arith.constant 0 : index
    %c0_156 = arith.constant 0 : index
    %c0_157 = arith.constant 0 : index
    %166 = vector.load %arg5[%c0_155, %c0_156, %c0_157] : memref<2x16x32xbf16, #tpu.memory_space<vmem>>, vector<1x16x32xbf16>
    %167 = vector.shape_cast %166 : vector<1x16x32xbf16> to vector<16x32xbf16>
    %cst_158 = arith.constant dense<0.000000e+00> : vector<4x32xf32>
    %168 = tpu.matmul %165, %167, %cst_158 {dimension_numbers = #tpu.dot_dimension_numbers<[1], [0], [0], [1], [0, 0, 1, 1], [], []>} : vector<4x16xbf16>, vector<16x32xbf16>, vector<4x32xf32> -> vector<4x32xf32>
    %169 = arith.addf %164, %168 : vector<4x32xf32>
    %170 = vector.extract_strided_slice %163 {offsets = [4, 0], sizes = [4, 16], strides = [1, 1]} : vector<16x16xbf16> to vector<4x16xbf16>
    %c1_159 = arith.constant 1 : index
    %c0_160 = arith.constant 0 : index
    %c0_161 = arith.constant 0 : index
    %171 = vector.load %arg5[%c1_159, %c0_160, %c0_161] : memref<2x16x32xbf16, #tpu.memory_space<vmem>>, vector<1x16x32xbf16>
    %172 = vector.shape_cast %171 : vector<1x16x32xbf16> to vector<16x32xbf16>
    %cst_162 = arith.constant dense<0.000000e+00> : vector<4x32xf32>
    %173 = tpu.matmul %170, %172, %cst_162 {dimension_numbers = #tpu.dot_dimension_numbers<[1], [0], [0], [1], [0, 0, 1, 1], [], []>} : vector<4x16xbf16>, vector<16x32xbf16>, vector<4x32xf32> -> vector<4x32xf32>
    %174 = arith.addf %169, %173 : vector<4x32xf32>
    %175 = arith.truncf %174 : vector<4x32xf32> to vector<4x32xbf16>
    %c0_163 = arith.constant 0 : index
    %c0_164 = arith.constant 0 : index
    %c2_165 = arith.constant 2 : index
    %c0_166 = arith.constant 0 : index
    %176 = vector.load %arg7[%c0_163, %c0_164, %c2_165, %c0_166] : memref<1x4x16x32xbf16, #tpu.memory_space<vmem>>, vector<1x4x1x32xbf16>
    %177 = vector.shape_cast %176 : vector<1x4x1x32xbf16> to vector<4x32xbf16>
    %178 = vector.shape_cast %175 : vector<4x32xbf16> to vector<1x4x1x32xbf16>
    tpu.vector_store %arg7[%c0_163, %c0_164, %c2_165, %c0_166], %178 {strides = array<i32>} : memref<1x4x16x32xbf16, #tpu.memory_space<vmem>>, vector<1x4x1x32xbf16>,
    %cst_167 = arith.constant 0.000000e+00 : f32
    %179 = vector.broadcast %cst_167 : f32 to vector<4x32xf32>
    %180 = vector.extract_strided_slice %163 {offsets = [8, 0], sizes = [4, 16], strides = [1, 1]} : vector<16x16xbf16> to vector<4x16xbf16>
    %c0_168 = arith.constant 0 : index
    %c0_169 = arith.constant 0 : index
    %c0_170 = arith.constant 0 : index
    %181 = vector.load %arg5[%c0_168, %c0_169, %c0_170] : memref<2x16x32xbf16, #tpu.memory_space<vmem>>, vector<1x16x32xbf16>
    %182 = vector.shape_cast %181 : vector<1x16x32xbf16> to vector<16x32xbf16>
    %cst_171 = arith.constant dense<0.000000e+00> : vector<4x32xf32>
    %183 = tpu.matmul %180, %182, %cst_171 {dimension_numbers = #tpu.dot_dimension_numbers<[1], [0], [0], [1], [0, 0, 1, 1], [], []>} : vector<4x16xbf16>, vector<16x32xbf16>, vector<4x32xf32> -> vector<4x32xf32>
    %184 = arith.addf %179, %183 : vector<4x32xf32>
    %185 = vector.extract_strided_slice %163 {offsets = [12, 0], sizes = [4, 16], strides = [1, 1]} : vector<16x16xbf16> to vector<4x16xbf16>
    %c1_172 = arith.constant 1 : index
    %c0_173 = arith.constant 0 : index
    %c0_174 = arith.constant 0 : index
    %186 = vector.load %arg5[%c1_172, %c0_173, %c0_174] : memref<2x16x32xbf16, #tpu.memory_space<vmem>>, vector<1x16x32xbf16>
    %187 = vector.shape_cast %186 : vector<1x16x32xbf16> to vector<16x32xbf16>
    %cst_175 = arith.constant dense<0.000000e+00> : vector<4x32xf32>
    %188 = tpu.matmul %185, %187, %cst_175 {dimension_numbers = #tpu.dot_dimension_numbers<[1], [0], [0], [1], [0, 0, 1, 1], [], []>} : vector<4x16xbf16>, vector<16x32xbf16>, vector<4x32xf32> -> vector<4x32xf32>
    %189 = arith.addf %184, %188 : vector<4x32xf32>
    %190 = arith.truncf %189 : vector<4x32xf32> to vector<4x32xbf16>
    %c0_176 = arith.constant 0 : index
    %c0_177 = arith.constant 0 : index
    %c3_178 = arith.constant 3 : index
    %c0_179 = arith.constant 0 : index
    %191 = vector.load %arg7[%c0_176, %c0_177, %c3_178, %c0_179] : memref<1x4x16x32xbf16, #tpu.memory_space<vmem>>, vector<1x4x1x32xbf16>
    %192 = vector.shape_cast %191 : vector<1x4x1x32xbf16> to vector<4x32xbf16>
    %193 = vector.shape_cast %190 : vector<4x32xbf16> to vector<1x4x1x32xbf16>
    tpu.vector_store %arg7[%c0_176, %c0_177, %c3_178, %c0_179], %193 {strides = array<i32>} : memref<1x4x16x32xbf16, #tpu.memory_space<vmem>>, vector<1x4x1x32xbf16>,
    %cst_180 = arith.constant 0.000000e+00 : f32
    %194 = vector.broadcast %cst_180 : f32 to vector<16x16xf32>
    %c2_181 = arith.constant 2 : index
    %c0_182 = arith.constant 0 : index
    %c0_183 = arith.constant 0 : index
    %195 = vector.load %arg8[%c2_181, %c0_182, %c0_183] : memref<10x4x18xbf16, #tpu.memory_space<vmem>>, vector<1x4x16xbf16>
    %196 = vector.shape_cast %195 : vector<1x4x16xbf16> to vector<4x16xbf16>
    %c0_184 = arith.constant 0 : index
    %c0_185 = arith.constant 0 : index
    %c0_186 = arith.constant 0 : index
    %197 = vector.load %arg3[%c0_184, %c0_185, %c0_186] : memref<9x16x4xbf16, #tpu.memory_space<vmem>>, vector<1x16x4xbf16>
    %198 = vector.shape_cast %197 : vector<1x16x4xbf16> to vector<16x4xbf16>
    %cst_187 = arith.constant dense<0.000000e+00> : vector<16x16xf32>
    %199 = tpu.matmul %198, %196, %cst_187 {dimension_numbers = #tpu.dot_dimension_numbers<[1], [0], [0], [1], [0, 0, 1, 1], [], []>} : vector<16x4xbf16>, vector<4x16xbf16>, vector<16x16xf32> -> vector<16x16xf32>
    %200 = arith.addf %194, %199 : vector<16x16xf32>
    %c2_188 = arith.constant 2 : index
    %c0_189 = arith.constant 0 : index
    %c1_190 = arith.constant 1 : index
    %201 = vector.load %arg8[%c2_188, %c0_189, %c1_190] : memref<10x4x18xbf16, #tpu.memory_space<vmem>>, vector<1x4x16xbf16>
    %202 = vector.shape_cast %201 : vector<1x4x16xbf16> to vector<4x16xbf16>
    %c1_191 = arith.constant 1 : index
    %c0_192 = arith.constant 0 : index
    %c0_193 = arith.constant 0 : index
    %203 = vector.load %arg3[%c1_191, %c0_192, %c0_193] : memref<9x16x4xbf16, #tpu.memory_space<vmem>>, vector<1x16x4xbf16>
    %204 = vector.shape_cast %203 : vector<1x16x4xbf16> to vector<16x4xbf16>
    %cst_194 = arith.constant dense<0.000000e+00> : vector<16x16xf32>
    %205 = tpu.matmul %204, %202, %cst_194 {dimension_numbers = #tpu.dot_dimension_numbers<[1], [0], [0], [1], [0, 0, 1, 1], [], []>} : vector<16x4xbf16>, vector<4x16xbf16>, vector<16x16xf32> -> vector<16x16xf32>
    %206 = arith.addf %200, %205 : vector<16x16xf32>
    %c2_195 = arith.constant 2 : index
    %c0_196 = arith.constant 0 : index
    %c2_197 = arith.constant 2 : index
    %207 = vector.load %arg8[%c2_195, %c0_196, %c2_197] : memref<10x4x18xbf16, #tpu.memory_space<vmem>>, vector<1x4x16xbf16>
    %208 = vector.shape_cast %207 : vector<1x4x16xbf16> to vector<4x16xbf16>
    %c2_198 = arith.constant 2 : index
    %c0_199 = arith.constant 0 : index
    %c0_200 = arith.constant 0 : index
    %209 = vector.load %arg3[%c2_198, %c0_199, %c0_200] : memref<9x16x4xbf16, #tpu.memory_space<vmem>>, vector<1x16x4xbf16>
    %210 = vector.shape_cast %209 : vector<1x16x4xbf16> to vector<16x4xbf16>
    %cst_201 = arith.constant dense<0.000000e+00> : vector<16x16xf32>
    %211 = tpu.matmul %210, %208, %cst_201 {dimension_numbers = #tpu.dot_dimension_numbers<[1], [0], [0], [1], [0, 0, 1, 1], [], []>} : vector<16x4xbf16>, vector<4x16xbf16>, vector<16x16xf32> -> vector<16x16xf32>
    %212 = arith.addf %206, %211 : vector<16x16xf32>
    %c3_202 = arith.constant 3 : index
    %c0_203 = arith.constant 0 : index
    %c0_204 = arith.constant 0 : index
    %213 = vector.load %arg8[%c3_202, %c0_203, %c0_204] : memref<10x4x18xbf16, #tpu.memory_space<vmem>>, vector<1x4x16xbf16>
    %214 = vector.shape_cast %213 : vector<1x4x16xbf16> to vector<4x16xbf16>
    %c3_205 = arith.constant 3 : index
    %c0_206 = arith.constant 0 : index
    %c0_207 = arith.constant 0 : index
    %215 = vector.load %arg3[%c3_205, %c0_206, %c0_207] : memref<9x16x4xbf16, #tpu.memory_space<vmem>>, vector<1x16x4xbf16>
    %216 = vector.shape_cast %215 : vector<1x16x4xbf16> to vector<16x4xbf16>
    %cst_208 = arith.constant dense<0.000000e+00> : vector<16x16xf32>
    %217 = tpu.matmul %216, %214, %cst_208 {dimension_numbers = #tpu.dot_dimension_numbers<[1], [0], [0], [1], [0, 0, 1, 1], [], []>} : vector<16x4xbf16>, vector<4x16xbf16>, vector<16x16xf32> -> vector<16x16xf32>
    %218 = arith.addf %212, %217 : vector<16x16xf32>
    %c3_209 = arith.constant 3 : index
    %c0_210 = arith.constant 0 : index
    %c1_211 = arith.constant 1 : index
    %219 = vector.load %arg8[%c3_209, %c0_210, %c1_211] : memref<10x4x18xbf16, #tpu.memory_space<vmem>>, vector<1x4x16xbf16>
    %220 = vector.shape_cast %219 : vector<1x4x16xbf16> to vector<4x16xbf16>
    %c4_212 = arith.constant 4 : index
    %c0_213 = arith.constant 0 : index
    %c0_214 = arith.constant 0 : index
    %221 = vector.load %arg3[%c4_212, %c0_213, %c0_214] : memref<9x16x4xbf16, #tpu.memory_space<vmem>>, vector<1x16x4xbf16>
    %222 = vector.shape_cast %221 : vector<1x16x4xbf16> to vector<16x4xbf16>
    %cst_215 = arith.constant dense<0.000000e+00> : vector<16x16xf32>
    %223 = tpu.matmul %222, %220, %cst_215 {dimension_numbers = #tpu.dot_dimension_numbers<[1], [0], [0], [1], [0, 0, 1, 1], [], []>} : vector<16x4xbf16>, vector<4x16xbf16>, vector<16x16xf32> -> vector<16x16xf32>
    %224 = arith.addf %218, %223 : vector<16x16xf32>
    %c3_216 = arith.constant 3 : index
    %c0_217 = arith.constant 0 : index
    %c2_218 = arith.constant 2 : index
    %225 = vector.load %arg8[%c3_216, %c0_217, %c2_218] : memref<10x4x18xbf16, #tpu.memory_space<vmem>>, vector<1x4x16xbf16>
    %226 = vector.shape_cast %225 : vector<1x4x16xbf16> to vector<4x16xbf16>
    %c5_219 = arith.constant 5 : index
    %c0_220 = arith.constant 0 : index
    %c0_221 = arith.constant 0 : index
    %227 = vector.load %arg3[%c5_219, %c0_220, %c0_221] : memref<9x16x4xbf16, #tpu.memory_space<vmem>>, vector<1x16x4xbf16>
    %228 = vector.shape_cast %227 : vector<1x16x4xbf16> to vector<16x4xbf16>
    %cst_222 = arith.constant dense<0.000000e+00> : vector<16x16xf32>
    %229 = tpu.matmul %228, %226, %cst_222 {dimension_numbers = #tpu.dot_dimension_numbers<[1], [0], [0], [1], [0, 0, 1, 1], [], []>} : vector<16x4xbf16>, vector<4x16xbf16>, vector<16x16xf32> -> vector<16x16xf32>
    %230 = arith.addf %224, %229 : vector<16x16xf32>
    %c4_223 = arith.constant 4 : index
    %c0_224 = arith.constant 0 : index
    %c0_225 = arith.constant 0 : index
    %231 = vector.load %arg8[%c4_223, %c0_224, %c0_225] : memref<10x4x18xbf16, #tpu.memory_space<vmem>>, vector<1x4x16xbf16>
    %232 = vector.shape_cast %231 : vector<1x4x16xbf16> to vector<4x16xbf16>
    %c6_226 = arith.constant 6 : index
    %c0_227 = arith.constant 0 : index
    %c0_228 = arith.constant 0 : index
    %233 = vector.load %arg3[%c6_226, %c0_227, %c0_228] : memref<9x16x4xbf16, #tpu.memory_space<vmem>>, vector<1x16x4xbf16>
    %234 = vector.shape_cast %233 : vector<1x16x4xbf16> to vector<16x4xbf16>
    %cst_229 = arith.constant dense<0.000000e+00> : vector<16x16xf32>
    %235 = tpu.matmul %234, %232, %cst_229 {dimension_numbers = #tpu.dot_dimension_numbers<[1], [0], [0], [1], [0, 0, 1, 1], [], []>} : vector<16x4xbf16>, vector<4x16xbf16>, vector<16x16xf32> -> vector<16x16xf32>
    %236 = arith.addf %230, %235 : vector<16x16xf32>
    %c4_230 = arith.constant 4 : index
    %c0_231 = arith.constant 0 : index
    %c1_232 = arith.constant 1 : index
    %237 = vector.load %arg8[%c4_230, %c0_231, %c1_232] : memref<10x4x18xbf16, #tpu.memory_space<vmem>>, vector<1x4x16xbf16>
    %238 = vector.shape_cast %237 : vector<1x4x16xbf16> to vector<4x16xbf16>
    %c7_233 = arith.constant 7 : index
    %c0_234 = arith.constant 0 : index
    %c0_235 = arith.constant 0 : index
    %239 = vector.load %arg3[%c7_233, %c0_234, %c0_235] : memref<9x16x4xbf16, #tpu.memory_space<vmem>>, vector<1x16x4xbf16>
    %240 = vector.shape_cast %239 : vector<1x16x4xbf16> to vector<16x4xbf16>
    %cst_236 = arith.constant dense<0.000000e+00> : vector<16x16xf32>
    %241 = tpu.matmul %240, %238, %cst_236 {dimension_numbers = #tpu.dot_dimension_numbers<[1], [0], [0], [1], [0, 0, 1, 1], [], []>} : vector<16x4xbf16>, vector<4x16xbf16>, vector<16x16xf32> -> vector<16x16xf32>
    %242 = arith.addf %236, %241 : vector<16x16xf32>
    %c4_237 = arith.constant 4 : index
    %c0_238 = arith.constant 0 : index
    %c2_239 = arith.constant 2 : index
    %243 = vector.load %arg8[%c4_237, %c0_238, %c2_239] : memref<10x4x18xbf16, #tpu.memory_space<vmem>>, vector<1x4x16xbf16>
    %244 = vector.shape_cast %243 : vector<1x4x16xbf16> to vector<4x16xbf16>
    %c8_240 = arith.constant 8 : index
    %c0_241 = arith.constant 0 : index
    %c0_242 = arith.constant 0 : index
    %245 = vector.load %arg3[%c8_240, %c0_241, %c0_242] : memref<9x16x4xbf16, #tpu.memory_space<vmem>>, vector<1x16x4xbf16>
    %246 = vector.shape_cast %245 : vector<1x16x4xbf16> to vector<16x4xbf16>
    %cst_243 = arith.constant dense<0.000000e+00> : vector<16x16xf32>
    %247 = tpu.matmul %246, %244, %cst_243 {dimension_numbers = #tpu.dot_dimension_numbers<[1], [0], [0], [1], [0, 0, 1, 1], [], []>} : vector<16x4xbf16>, vector<4x16xbf16>, vector<16x16xf32> -> vector<16x16xf32>
    %248 = arith.addf %242, %247 : vector<16x16xf32>
    %c0_244 = arith.constant 0 : index
    %c0_245 = arith.constant 0 : index
    %249 = vector.load %arg4[%c0_244, %c0_245] : memref<16x1xf32, #tpu.memory_space<vmem>>, vector<16x1xf32>
    %250 = vector.broadcast %249 : vector<16x1xf32> to vector<16x16xf32>
    %251 = arith.addf %248, %250 : vector<16x16xf32>
    %cst_246 = arith.constant 0.000000e+00 : f32
    %252 = vector.broadcast %cst_246 : f32 to vector<16x16xf32>
    %253 = arith.cmpf ogt, %251, %252 : vector<16x16xf32>
    %254 = vector.broadcast %5 : f32 to vector<16x16xf32>
    %255 = arith.mulf %254, %251 : vector<16x16xf32>
    %256 = arith.select %253, %251, %255 : vector<16x16xi1>, vector<16x16xf32>
    %257 = arith.truncf %256 : vector<16x16xf32> to vector<16x16xbf16>
    %cst_247 = arith.constant 0.000000e+00 : f32
    %258 = vector.broadcast %cst_247 : f32 to vector<4x32xf32>
    %259 = vector.extract_strided_slice %257 {offsets = [0, 0], sizes = [4, 16], strides = [1, 1]} : vector<16x16xbf16> to vector<4x16xbf16>
    %c0_248 = arith.constant 0 : index
    %c0_249 = arith.constant 0 : index
    %c0_250 = arith.constant 0 : index
    %260 = vector.load %arg5[%c0_248, %c0_249, %c0_250] : memref<2x16x32xbf16, #tpu.memory_space<vmem>>, vector<1x16x32xbf16>
    %261 = vector.shape_cast %260 : vector<1x16x32xbf16> to vector<16x32xbf16>
    %cst_251 = arith.constant dense<0.000000e+00> : vector<4x32xf32>
    %262 = tpu.matmul %259, %261, %cst_251 {dimension_numbers = #tpu.dot_dimension_numbers<[1], [0], [0], [1], [0, 0, 1, 1], [], []>} : vector<4x16xbf16>, vector<16x32xbf16>, vector<4x32xf32> -> vector<4x32xf32>
    %263 = arith.addf %258, %262 : vector<4x32xf32>
    %264 = vector.extract_strided_slice %257 {offsets = [4, 0], sizes = [4, 16], strides = [1, 1]} : vector<16x16xbf16> to vector<4x16xbf16>
    %c1_252 = arith.constant 1 : index
    %c0_253 = arith.constant 0 : index
    %c0_254 = arith.constant 0 : index
    %265 = vector.load %arg5[%c1_252, %c0_253, %c0_254] : memref<2x16x32xbf16, #tpu.memory_space<vmem>>, vector<1x16x32xbf16>
    %266 = vector.shape_cast %265 : vector<1x16x32xbf16> to vector<16x32xbf16>
    %cst_255 = arith.constant dense<0.000000e+00> : vector<4x32xf32>
    %267 = tpu.matmul %264, %266, %cst_255 {dimension_numbers = #tpu.dot_dimension_numbers<[1], [0], [0], [1], [0, 0, 1, 1], [], []>} : vector<4x16xbf16>, vector<16x32xbf16>, vector<4x32xf32> -> vector<4x32xf32>
    %268 = arith.addf %263, %267 : vector<4x32xf32>
    %269 = arith.truncf %268 : vector<4x32xf32> to vector<4x32xbf16>
    %c0_256 = arith.constant 0 : index
    %c0_257 = arith.constant 0 : index
    %c4_258 = arith.constant 4 : index
    %c0_259 = arith.constant 0 : index
    %270 = vector.load %arg7[%c0_256, %c0_257, %c4_258, %c0_259] : memref<1x4x16x32xbf16, #tpu.memory_space<vmem>>, vector<1x4x1x32xbf16>
    %271 = vector.shape_cast %270 : vector<1x4x1x32xbf16> to vector<4x32xbf16>
    %272 = vector.shape_cast %269 : vector<4x32xbf16> to vector<1x4x1x32xbf16>
    tpu.vector_store %arg7[%c0_256, %c0_257, %c4_258, %c0_259], %272 {strides = array<i32>} : memref<1x4x16x32xbf16, #tpu.memory_space<vmem>>, vector<1x4x1x32xbf16>,
    %cst_260 = arith.constant 0.000000e+00 : f32
    %273 = vector.broadcast %cst_260 : f32 to vector<4x32xf32>
    %274 = vector.extract_strided_slice %257 {offsets = [8, 0], sizes = [4, 16], strides = [1, 1]} : vector<16x16xbf16> to vector<4x16xbf16>
    %c0_261 = arith.constant 0 : index
    %c0_262 = arith.constant 0 : index
    %c0_263 = arith.constant 0 : index
    %275 = vector.load %arg5[%c0_261, %c0_262, %c0_263] : memref<2x16x32xbf16, #tpu.memory_space<vmem>>, vector<1x16x32xbf16>
    %276 = vector.shape_cast %275 : vector<1x16x32xbf16> to vector<16x32xbf16>
    %cst_264 = arith.constant dense<0.000000e+00> : vector<4x32xf32>
    %277 = tpu.matmul %274, %276, %cst_264 {dimension_numbers = #tpu.dot_dimension_numbers<[1], [0], [0], [1], [0, 0, 1, 1], [], []>} : vector<4x16xbf16>, vector<16x32xbf16>, vector<4x32xf32> -> vector<4x32xf32>
    %278 = arith.addf %273, %277 : vector<4x32xf32>
    %279 = vector.extract_strided_slice %257 {offsets = [12, 0], sizes = [4, 16], strides = [1, 1]} : vector<16x16xbf16> to vector<4x16xbf16>
    %c1_265 = arith.constant 1 : index
    %c0_266 = arith.constant 0 : index
    %c0_267 = arith.constant 0 : index
    %280 = vector.load %arg5[%c1_265, %c0_266, %c0_267] : memref<2x16x32xbf16, #tpu.memory_space<vmem>>, vector<1x16x32xbf16>
    %281 = vector.shape_cast %280 : vector<1x16x32xbf16> to vector<16x32xbf16>
    %cst_268 = arith.constant dense<0.000000e+00> : vector<4x32xf32>
    %282 = tpu.matmul %279, %281, %cst_268 {dimension_numbers = #tpu.dot_dimension_numbers<[1], [0], [0], [1], [0, 0, 1, 1], [], []>} : vector<4x16xbf16>, vector<16x32xbf16>, vector<4x32xf32> -> vector<4x32xf32>
    %283 = arith.addf %278, %282 : vector<4x32xf32>
    %284 = arith.truncf %283 : vector<4x32xf32> to vector<4x32xbf16>
    %c0_269 = arith.constant 0 : index
    %c0_270 = arith.constant 0 : index
    %c5_271 = arith.constant 5 : index
    %c0_272 = arith.constant 0 : index
    %285 = vector.load %arg7[%c0_269, %c0_270, %c5_271, %c0_272] : memref<1x4x16x32xbf16, #tpu.memory_space<vmem>>, vector<1x4x1x32xbf16>
    %286 = vector.shape_cast %285 : vector<1x4x1x32xbf16> to vector<4x32xbf16>
    %287 = vector.shape_cast %284 : vector<4x32xbf16> to vector<1x4x1x32xbf16>
    tpu.vector_store %arg7[%c0_269, %c0_270, %c5_271, %c0_272], %287 {strides = array<i32>} : memref<1x4x16x32xbf16, #tpu.memory_space<vmem>>, vector<1x4x1x32xbf16>,
    %cst_273 = arith.constant 0.000000e+00 : f32
    %288 = vector.broadcast %cst_273 : f32 to vector<16x16xf32>
    %c3_274 = arith.constant 3 : index
    %c0_275 = arith.constant 0 : index
    %c0_276 = arith.constant 0 : index
    %289 = vector.load %arg8[%c3_274, %c0_275, %c0_276] : memref<10x4x18xbf16, #tpu.memory_space<vmem>>, vector<1x4x16xbf16>
    %290 = vector.shape_cast %289 : vector<1x4x16xbf16> to vector<4x16xbf16>
    %c0_277 = arith.constant 0 : index
    %c0_278 = arith.constant 0 : index
    %c0_279 = arith.constant 0 : index
    %291 = vector.load %arg3[%c0_277, %c0_278, %c0_279] : memref<9x16x4xbf16, #tpu.memory_space<vmem>>, vector<1x16x4xbf16>
    %292 = vector.shape_cast %291 : vector<1x16x4xbf16> to vector<16x4xbf16>
    %cst_280 = arith.constant dense<0.000000e+00> : vector<16x16xf32>
    %293 = tpu.matmul %292, %290, %cst_280 {dimension_numbers = #tpu.dot_dimension_numbers<[1], [0], [0], [1], [0, 0, 1, 1], [], []>} : vector<16x4xbf16>, vector<4x16xbf16>, vector<16x16xf32> -> vector<16x16xf32>
    %294 = arith.addf %288, %293 : vector<16x16xf32>
    %c3_281 = arith.constant 3 : index
    %c0_282 = arith.constant 0 : index
    %c1_283 = arith.constant 1 : index
    %295 = vector.load %arg8[%c3_281, %c0_282, %c1_283] : memref<10x4x18xbf16, #tpu.memory_space<vmem>>, vector<1x4x16xbf16>
    %296 = vector.shape_cast %295 : vector<1x4x16xbf16> to vector<4x16xbf16>
    %c1_284 = arith.constant 1 : index
    %c0_285 = arith.constant 0 : index
    %c0_286 = arith.constant 0 : index
    %297 = vector.load %arg3[%c1_284, %c0_285, %c0_286] : memref<9x16x4xbf16, #tpu.memory_space<vmem>>, vector<1x16x4xbf16>
    %298 = vector.shape_cast %297 : vector<1x16x4xbf16> to vector<16x4xbf16>
    %cst_287 = arith.constant dense<0.000000e+00> : vector<16x16xf32>
    %299 = tpu.matmul %298, %296, %cst_287 {dimension_numbers = #tpu.dot_dimension_numbers<[1], [0], [0], [1], [0, 0, 1, 1], [], []>} : vector<16x4xbf16>, vector<4x16xbf16>, vector<16x16xf32> -> vector<16x16xf32>
    %300 = arith.addf %294, %299 : vector<16x16xf32>
    %c3_288 = arith.constant 3 : index
    %c0_289 = arith.constant 0 : index
    %c2_290 = arith.constant 2 : index
    %301 = vector.load %arg8[%c3_288, %c0_289, %c2_290] : memref<10x4x18xbf16, #tpu.memory_space<vmem>>, vector<1x4x16xbf16>
    %302 = vector.shape_cast %301 : vector<1x4x16xbf16> to vector<4x16xbf16>
    %c2_291 = arith.constant 2 : index
    %c0_292 = arith.constant 0 : index
    %c0_293 = arith.constant 0 : index
    %303 = vector.load %arg3[%c2_291, %c0_292, %c0_293] : memref<9x16x4xbf16, #tpu.memory_space<vmem>>, vector<1x16x4xbf16>
    %304 = vector.shape_cast %303 : vector<1x16x4xbf16> to vector<16x4xbf16>
    %cst_294 = arith.constant dense<0.000000e+00> : vector<16x16xf32>
    %305 = tpu.matmul %304, %302, %cst_294 {dimension_numbers = #tpu.dot_dimension_numbers<[1], [0], [0], [1], [0, 0, 1, 1], [], []>} : vector<16x4xbf16>, vector<4x16xbf16>, vector<16x16xf32> -> vector<16x16xf32>
    %306 = arith.addf %300, %305 : vector<16x16xf32>
    %c4_295 = arith.constant 4 : index
    %c0_296 = arith.constant 0 : index
    %c0_297 = arith.constant 0 : index
    %307 = vector.load %arg8[%c4_295, %c0_296, %c0_297] : memref<10x4x18xbf16, #tpu.memory_space<vmem>>, vector<1x4x16xbf16>
    %308 = vector.shape_cast %307 : vector<1x4x16xbf16> to vector<4x16xbf16>
    %c3_298 = arith.constant 3 : index
    %c0_299 = arith.constant 0 : index
    %c0_300 = arith.constant 0 : index
    %309 = vector.load %arg3[%c3_298, %c0_299, %c0_300] : memref<9x16x4xbf16, #tpu.memory_space<vmem>>, vector<1x16x4xbf16>
    %310 = vector.shape_cast %309 : vector<1x16x4xbf16> to vector<16x4xbf16>
    %cst_301 = arith.constant dense<0.000000e+00> : vector<16x16xf32>
    %311 = tpu.matmul %310, %308, %cst_301 {dimension_numbers = #tpu.dot_dimension_numbers<[1], [0], [0], [1], [0, 0, 1, 1], [], []>} : vector<16x4xbf16>, vector<4x16xbf16>, vector<16x16xf32> -> vector<16x16xf32>
    %312 = arith.addf %306, %311 : vector<16x16xf32>
    %c4_302 = arith.constant 4 : index
    %c0_303 = arith.constant 0 : index
    %c1_304 = arith.constant 1 : index
    %313 = vector.load %arg8[%c4_302, %c0_303, %c1_304] : memref<10x4x18xbf16, #tpu.memory_space<vmem>>, vector<1x4x16xbf16>
    %314 = vector.shape_cast %313 : vector<1x4x16xbf16> to vector<4x16xbf16>
    %c4_305 = arith.constant 4 : index
    %c0_306 = arith.constant 0 : index
    %c0_307 = arith.constant 0 : index
    %315 = vector.load %arg3[%c4_305, %c0_306, %c0_307] : memref<9x16x4xbf16, #tpu.memory_space<vmem>>, vector<1x16x4xbf16>
    %316 = vector.shape_cast %315 : vector<1x16x4xbf16> to vector<16x4xbf16>
    %cst_308 = arith.constant dense<0.000000e+00> : vector<16x16xf32>
    %317 = tpu.matmul %316, %314, %cst_308 {dimension_numbers = #tpu.dot_dimension_numbers<[1], [0], [0], [1], [0, 0, 1, 1], [], []>} : vector<16x4xbf16>, vector<4x16xbf16>, vector<16x16xf32> -> vector<16x16xf32>
    %318 = arith.addf %312, %317 : vector<16x16xf32>
    %c4_309 = arith.constant 4 : index
    %c0_310 = arith.constant 0 : index
    %c2_311 = arith.constant 2 : index
    %319 = vector.load %arg8[%c4_309, %c0_310, %c2_311] : memref<10x4x18xbf16, #tpu.memory_space<vmem>>, vector<1x4x16xbf16>
    %320 = vector.shape_cast %319 : vector<1x4x16xbf16> to vector<4x16xbf16>
    %c5_312 = arith.constant 5 : index
    %c0_313 = arith.constant 0 : index
    %c0_314 = arith.constant 0 : index
    %321 = vector.load %arg3[%c5_312, %c0_313, %c0_314] : memref<9x16x4xbf16, #tpu.memory_space<vmem>>, vector<1x16x4xbf16>
    %322 = vector.shape_cast %321 : vector<1x16x4xbf16> to vector<16x4xbf16>
    %cst_315 = arith.constant dense<0.000000e+00> : vector<16x16xf32>
    %323 = tpu.matmul %322, %320, %cst_315 {dimension_numbers = #tpu.dot_dimension_numbers<[1], [0], [0], [1], [0, 0, 1, 1], [], []>} : vector<16x4xbf16>, vector<4x16xbf16>, vector<16x16xf32> -> vector<16x16xf32>
    %324 = arith.addf %318, %323 : vector<16x16xf32>
    %c5_316 = arith.constant 5 : index
    %c0_317 = arith.constant 0 : index
    %c0_318 = arith.constant 0 : index
    %325 = vector.load %arg8[%c5_316, %c0_317, %c0_318] : memref<10x4x18xbf16, #tpu.memory_space<vmem>>, vector<1x4x16xbf16>
    %326 = vector.shape_cast %325 : vector<1x4x16xbf16> to vector<4x16xbf16>
    %c6_319 = arith.constant 6 : index
    %c0_320 = arith.constant 0 : index
    %c0_321 = arith.constant 0 : index
    %327 = vector.load %arg3[%c6_319, %c0_320, %c0_321] : memref<9x16x4xbf16, #tpu.memory_space<vmem>>, vector<1x16x4xbf16>
    %328 = vector.shape_cast %327 : vector<1x16x4xbf16> to vector<16x4xbf16>
    %cst_322 = arith.constant dense<0.000000e+00> : vector<16x16xf32>
    %329 = tpu.matmul %328, %326, %cst_322 {dimension_numbers = #tpu.dot_dimension_numbers<[1], [0], [0], [1], [0, 0, 1, 1], [], []>} : vector<16x4xbf16>, vector<4x16xbf16>, vector<16x16xf32> -> vector<16x16xf32>
    %330 = arith.addf %324, %329 : vector<16x16xf32>
    %c5_323 = arith.constant 5 : index
    %c0_324 = arith.constant 0 : index
    %c1_325 = arith.constant 1 : index
    %331 = vector.load %arg8[%c5_323, %c0_324, %c1_325] : memref<10x4x18xbf16, #tpu.memory_space<vmem>>, vector<1x4x16xbf16>
    %332 = vector.shape_cast %331 : vector<1x4x16xbf16> to vector<4x16xbf16>
    %c7_326 = arith.constant 7 : index
    %c0_327 = arith.constant 0 : index
    %c0_328 = arith.constant 0 : index
    %333 = vector.load %arg3[%c7_326, %c0_327, %c0_328] : memref<9x16x4xbf16, #tpu.memory_space<vmem>>, vector<1x16x4xbf16>
    %334 = vector.shape_cast %333 : vector<1x16x4xbf16> to vector<16x4xbf16>
    %cst_329 = arith.constant dense<0.000000e+00> : vector<16x16xf32>
    %335 = tpu.matmul %334, %332, %cst_329 {dimension_numbers = #tpu.dot_dimension_numbers<[1], [0], [0], [1], [0, 0, 1, 1], [], []>} : vector<16x4xbf16>, vector<4x16xbf16>, vector<16x16xf32> -> vector<16x16xf32>
    %336 = arith.addf %330, %335 : vector<16x16xf32>
    %c5_330 = arith.constant 5 : index
    %c0_331 = arith.constant 0 : index
    %c2_332 = arith.constant 2 : index
    %337 = vector.load %arg8[%c5_330, %c0_331, %c2_332] : memref<10x4x18xbf16, #tpu.memory_space<vmem>>, vector<1x4x16xbf16>
    %338 = vector.shape_cast %337 : vector<1x4x16xbf16> to vector<4x16xbf16>
    %c8_333 = arith.constant 8 : index
    %c0_334 = arith.constant 0 : index
    %c0_335 = arith.constant 0 : index
    %339 = vector.load %arg3[%c8_333, %c0_334, %c0_335] : memref<9x16x4xbf16, #tpu.memory_space<vmem>>, vector<1x16x4xbf16>
    %340 = vector.shape_cast %339 : vector<1x16x4xbf16> to vector<16x4xbf16>
    %cst_336 = arith.constant dense<0.000000e+00> : vector<16x16xf32>
    %341 = tpu.matmul %340, %338, %cst_336 {dimension_numbers = #tpu.dot_dimension_numbers<[1], [0], [0], [1], [0, 0, 1, 1], [], []>} : vector<16x4xbf16>, vector<4x16xbf16>, vector<16x16xf32> -> vector<16x16xf32>
    %342 = arith.addf %336, %341 : vector<16x16xf32>
    %c0_337 = arith.constant 0 : index
    %c0_338 = arith.constant 0 : index
    %343 = vector.load %arg4[%c0_337, %c0_338] : memref<16x1xf32, #tpu.memory_space<vmem>>, vector<16x1xf32>
    %344 = vector.broadcast %343 : vector<16x1xf32> to vector<16x16xf32>
    %345 = arith.addf %342, %344 : vector<16x16xf32>
    %cst_339 = arith.constant 0.000000e+00 : f32
    %346 = vector.broadcast %cst_339 : f32 to vector<16x16xf32>
    %347 = arith.cmpf ogt, %345, %346 : vector<16x16xf32>
    %348 = vector.broadcast %5 : f32 to vector<16x16xf32>
    %349 = arith.mulf %348, %345 : vector<16x16xf32>
    %350 = arith.select %347, %345, %349 : vector<16x16xi1>, vector<16x16xf32>
    %351 = arith.truncf %350 : vector<16x16xf32> to vector<16x16xbf16>
    %cst_340 = arith.constant 0.000000e+00 : f32
    %352 = vector.broadcast %cst_340 : f32 to vector<4x32xf32>
    %353 = vector.extract_strided_slice %351 {offsets = [0, 0], sizes = [4, 16], strides = [1, 1]} : vector<16x16xbf16> to vector<4x16xbf16>
    %c0_341 = arith.constant 0 : index
    %c0_342 = arith.constant 0 : index
    %c0_343 = arith.constant 0 : index
    %354 = vector.load %arg5[%c0_341, %c0_342, %c0_343] : memref<2x16x32xbf16, #tpu.memory_space<vmem>>, vector<1x16x32xbf16>
    %355 = vector.shape_cast %354 : vector<1x16x32xbf16> to vector<16x32xbf16>
    %cst_344 = arith.constant dense<0.000000e+00> : vector<4x32xf32>
    %356 = tpu.matmul %353, %355, %cst_344 {dimension_numbers = #tpu.dot_dimension_numbers<[1], [0], [0], [1], [0, 0, 1, 1], [], []>} : vector<4x16xbf16>, vector<16x32xbf16>, vector<4x32xf32> -> vector<4x32xf32>
    %357 = arith.addf %352, %356 : vector<4x32xf32>
    %358 = vector.extract_strided_slice %351 {offsets = [4, 0], sizes = [4, 16], strides = [1, 1]} : vector<16x16xbf16> to vector<4x16xbf16>
    %c1_345 = arith.constant 1 : index
    %c0_346 = arith.constant 0 : index
    %c0_347 = arith.constant 0 : index
    %359 = vector.load %arg5[%c1_345, %c0_346, %c0_347] : memref<2x16x32xbf16, #tpu.memory_space<vmem>>, vector<1x16x32xbf16>
    %360 = vector.shape_cast %359 : vector<1x16x32xbf16> to vector<16x32xbf16>
    %cst_348 = arith.constant dense<0.000000e+00> : vector<4x32xf32>
    %361 = tpu.matmul %358, %360, %cst_348 {dimension_numbers = #tpu.dot_dimension_numbers<[1], [0], [0], [1], [0, 0, 1, 1], [], []>} : vector<4x16xbf16>, vector<16x32xbf16>, vector<4x32xf32> -> vector<4x32xf32>
    %362 = arith.addf %357, %361 : vector<4x32xf32>
    %363 = arith.truncf %362 : vector<4x32xf32> to vector<4x32xbf16>
    %c0_349 = arith.constant 0 : index
    %c0_350 = arith.constant 0 : index
    %c6_351 = arith.constant 6 : index
    %c0_352 = arith.constant 0 : index
    %364 = vector.load %arg7[%c0_349, %c0_350, %c6_351, %c0_352] : memref<1x4x16x32xbf16, #tpu.memory_space<vmem>>, vector<1x4x1x32xbf16>
    %365 = vector.shape_cast %364 : vector<1x4x1x32xbf16> to vector<4x32xbf16>
    %366 = vector.shape_cast %363 : vector<4x32xbf16> to vector<1x4x1x32xbf16>
    tpu.vector_store %arg7[%c0_349, %c0_350, %c6_351, %c0_352], %366 {strides = array<i32>} : memref<1x4x16x32xbf16, #tpu.memory_space<vmem>>, vector<1x4x1x32xbf16>,
    %cst_353 = arith.constant 0.000000e+00 : f32
    %367 = vector.broadcast %cst_353 : f32 to vector<4x32xf32>
    %368 = vector.extract_strided_slice %351 {offsets = [8, 0], sizes = [4, 16], strides = [1, 1]} : vector<16x16xbf16> to vector<4x16xbf16>
    %c0_354 = arith.constant 0 : index
    %c0_355 = arith.constant 0 : index
    %c0_356 = arith.constant 0 : index
    %369 = vector.load %arg5[%c0_354, %c0_355, %c0_356] : memref<2x16x32xbf16, #tpu.memory_space<vmem>>, vector<1x16x32xbf16>
    %370 = vector.shape_cast %369 : vector<1x16x32xbf16> to vector<16x32xbf16>
    %cst_357 = arith.constant dense<0.000000e+00> : vector<4x32xf32>
    %371 = tpu.matmul %368, %370, %cst_357 {dimension_numbers = #tpu.dot_dimension_numbers<[1], [0], [0], [1], [0, 0, 1, 1], [], []>} : vector<4x16xbf16>, vector<16x32xbf16>, vector<4x32xf32> -> vector<4x32xf32>
    %372 = arith.addf %367, %371 : vector<4x32xf32>
    %373 = vector.extract_strided_slice %351 {offsets = [12, 0], sizes = [4, 16], strides = [1, 1]} : vector<16x16xbf16> to vector<4x16xbf16>
    %c1_358 = arith.constant 1 : index
    %c0_359 = arith.constant 0 : index
    %c0_360 = arith.constant 0 : index
    %374 = vector.load %arg5[%c1_358, %c0_359, %c0_360] : memref<2x16x32xbf16, #tpu.memory_space<vmem>>, vector<1x16x32xbf16>
    %375 = vector.shape_cast %374 : vector<1x16x32xbf16> to vector<16x32xbf16>
    %cst_361 = arith.constant dense<0.000000e+00> : vector<4x32xf32>
    %376 = tpu.matmul %373, %375, %cst_361 {dimension_numbers = #tpu.dot_dimension_numbers<[1], [0], [0], [1], [0, 0, 1, 1], [], []>} : vector<4x16xbf16>, vector<16x32xbf16>, vector<4x32xf32> -> vector<4x32xf32>
    %377 = arith.addf %372, %376 : vector<4x32xf32>
    %378 = arith.truncf %377 : vector<4x32xf32> to vector<4x32xbf16>
    %c0_362 = arith.constant 0 : index
    %c0_363 = arith.constant 0 : index
    %c7_364 = arith.constant 7 : index
    %c0_365 = arith.constant 0 : index
    %379 = vector.load %arg7[%c0_362, %c0_363, %c7_364, %c0_365] : memref<1x4x16x32xbf16, #tpu.memory_space<vmem>>, vector<1x4x1x32xbf16>
    %380 = vector.shape_cast %379 : vector<1x4x1x32xbf16> to vector<4x32xbf16>
    %381 = vector.shape_cast %378 : vector<4x32xbf16> to vector<1x4x1x32xbf16>
    tpu.vector_store %arg7[%c0_362, %c0_363, %c7_364, %c0_365], %381 {strides = array<i32>} : memref<1x4x16x32xbf16, #tpu.memory_space<vmem>>, vector<1x4x1x32xbf16>,
    %cst_366 = arith.constant 0.000000e+00 : f32
    %382 = vector.broadcast %cst_366 : f32 to vector<16x16xf32>
    %c4_367 = arith.constant 4 : index
    %c0_368 = arith.constant 0 : index
    %c0_369 = arith.constant 0 : index
    %383 = vector.load %arg8[%c4_367, %c0_368, %c0_369] : memref<10x4x18xbf16, #tpu.memory_space<vmem>>, vector<1x4x16xbf16>
    %384 = vector.shape_cast %383 : vector<1x4x16xbf16> to vector<4x16xbf16>
    %c0_370 = arith.constant 0 : index
    %c0_371 = arith.constant 0 : index
    %c0_372 = arith.constant 0 : index
    %385 = vector.load %arg3[%c0_370, %c0_371, %c0_372] : memref<9x16x4xbf16, #tpu.memory_space<vmem>>, vector<1x16x4xbf16>
    %386 = vector.shape_cast %385 : vector<1x16x4xbf16> to vector<16x4xbf16>
    %cst_373 = arith.constant dense<0.000000e+00> : vector<16x16xf32>
    %387 = tpu.matmul %386, %384, %cst_373 {dimension_numbers = #tpu.dot_dimension_numbers<[1], [0], [0], [1], [0, 0, 1, 1], [], []>} : vector<16x4xbf16>, vector<4x16xbf16>, vector<16x16xf32> -> vector<16x16xf32>
    %388 = arith.addf %382, %387 : vector<16x16xf32>
    %c4_374 = arith.constant 4 : index
    %c0_375 = arith.constant 0 : index
    %c1_376 = arith.constant 1 : index
    %389 = vector.load %arg8[%c4_374, %c0_375, %c1_376] : memref<10x4x18xbf16, #tpu.memory_space<vmem>>, vector<1x4x16xbf16>
    %390 = vector.shape_cast %389 : vector<1x4x16xbf16> to vector<4x16xbf16>
    %c1_377 = arith.constant 1 : index
    %c0_378 = arith.constant 0 : index
    %c0_379 = arith.constant 0 : index
    %391 = vector.load %arg3[%c1_377, %c0_378, %c0_379] : memref<9x16x4xbf16, #tpu.memory_space<vmem>>, vector<1x16x4xbf16>
    %392 = vector.shape_cast %391 : vector<1x16x4xbf16> to vector<16x4xbf16>
    %cst_380 = arith.constant dense<0.000000e+00> : vector<16x16xf32>
    %393 = tpu.matmul %392, %390, %cst_380 {dimension_numbers = #tpu.dot_dimension_numbers<[1], [0], [0], [1], [0, 0, 1, 1], [], []>} : vector<16x4xbf16>, vector<4x16xbf16>, vector<16x16xf32> -> vector<16x16xf32>
    %394 = arith.addf %388, %393 : vector<16x16xf32>
    %c4_381 = arith.constant 4 : index
    %c0_382 = arith.constant 0 : index
    %c2_383 = arith.constant 2 : index
    %395 = vector.load %arg8[%c4_381, %c0_382, %c2_383] : memref<10x4x18xbf16, #tpu.memory_space<vmem>>, vector<1x4x16xbf16>
    %396 = vector.shape_cast %395 : vector<1x4x16xbf16> to vector<4x16xbf16>
    %c2_384 = arith.constant 2 : index
    %c0_385 = arith.constant 0 : index
    %c0_386 = arith.constant 0 : index
    %397 = vector.load %arg3[%c2_384, %c0_385, %c0_386] : memref<9x16x4xbf16, #tpu.memory_space<vmem>>, vector<1x16x4xbf16>
    %398 = vector.shape_cast %397 : vector<1x16x4xbf16> to vector<16x4xbf16>
    %cst_387 = arith.constant dense<0.000000e+00> : vector<16x16xf32>
    %399 = tpu.matmul %398, %396, %cst_387 {dimension_numbers = #tpu.dot_dimension_numbers<[1], [0], [0], [1], [0, 0, 1, 1], [], []>} : vector<16x4xbf16>, vector<4x16xbf16>, vector<16x16xf32> -> vector<16x16xf32>
    %400 = arith.addf %394, %399 : vector<16x16xf32>
    %c5_388 = arith.constant 5 : index
    %c0_389 = arith.constant 0 : index
    %c0_390 = arith.constant 0 : index
    %401 = vector.load %arg8[%c5_388, %c0_389, %c0_390] : memref<10x4x18xbf16, #tpu.memory_space<vmem>>, vector<1x4x16xbf16>
    %402 = vector.shape_cast %401 : vector<1x4x16xbf16> to vector<4x16xbf16>
    %c3_391 = arith.constant 3 : index
    %c0_392 = arith.constant 0 : index
    %c0_393 = arith.constant 0 : index
    %403 = vector.load %arg3[%c3_391, %c0_392, %c0_393] : memref<9x16x4xbf16, #tpu.memory_space<vmem>>, vector<1x16x4xbf16>
    %404 = vector.shape_cast %403 : vector<1x16x4xbf16> to vector<16x4xbf16>
    %cst_394 = arith.constant dense<0.000000e+00> : vector<16x16xf32>
    %405 = tpu.matmul %404, %402, %cst_394 {dimension_numbers = #tpu.dot_dimension_numbers<[1], [0], [0], [1], [0, 0, 1, 1], [], []>} : vector<16x4xbf16>, vector<4x16xbf16>, vector<16x16xf32> -> vector<16x16xf32>
    %406 = arith.addf %400, %405 : vector<16x16xf32>
    %c5_395 = arith.constant 5 : index
    %c0_396 = arith.constant 0 : index
    %c1_397 = arith.constant 1 : index
    %407 = vector.load %arg8[%c5_395, %c0_396, %c1_397] : memref<10x4x18xbf16, #tpu.memory_space<vmem>>, vector<1x4x16xbf16>
    %408 = vector.shape_cast %407 : vector<1x4x16xbf16> to vector<4x16xbf16>
    %c4_398 = arith.constant 4 : index
    %c0_399 = arith.constant 0 : index
    %c0_400 = arith.constant 0 : index
    %409 = vector.load %arg3[%c4_398, %c0_399, %c0_400] : memref<9x16x4xbf16, #tpu.memory_space<vmem>>, vector<1x16x4xbf16>
    %410 = vector.shape_cast %409 : vector<1x16x4xbf16> to vector<16x4xbf16>
    %cst_401 = arith.constant dense<0.000000e+00> : vector<16x16xf32>
    %411 = tpu.matmul %410, %408, %cst_401 {dimension_numbers = #tpu.dot_dimension_numbers<[1], [0], [0], [1], [0, 0, 1, 1], [], []>} : vector<16x4xbf16>, vector<4x16xbf16>, vector<16x16xf32> -> vector<16x16xf32>
    %412 = arith.addf %406, %411 : vector<16x16xf32>
    %c5_402 = arith.constant 5 : index
    %c0_403 = arith.constant 0 : index
    %c2_404 = arith.constant 2 : index
    %413 = vector.load %arg8[%c5_402, %c0_403, %c2_404] : memref<10x4x18xbf16, #tpu.memory_space<vmem>>, vector<1x4x16xbf16>
    %414 = vector.shape_cast %413 : vector<1x4x16xbf16> to vector<4x16xbf16>
    %c5_405 = arith.constant 5 : index
    %c0_406 = arith.constant 0 : index
    %c0_407 = arith.constant 0 : index
    %415 = vector.load %arg3[%c5_405, %c0_406, %c0_407] : memref<9x16x4xbf16, #tpu.memory_space<vmem>>, vector<1x16x4xbf16>
    %416 = vector.shape_cast %415 : vector<1x16x4xbf16> to vector<16x4xbf16>
    %cst_408 = arith.constant dense<0.000000e+00> : vector<16x16xf32>
    %417 = tpu.matmul %416, %414, %cst_408 {dimension_numbers = #tpu.dot_dimension_numbers<[1], [0], [0], [1], [0, 0, 1, 1], [], []>} : vector<16x4xbf16>, vector<4x16xbf16>, vector<16x16xf32> -> vector<16x16xf32>
    %418 = arith.addf %412, %417 : vector<16x16xf32>
    %c6_409 = arith.constant 6 : index
    %c0_410 = arith.constant 0 : index
    %c0_411 = arith.constant 0 : index
    %419 = vector.load %arg8[%c6_409, %c0_410, %c0_411] : memref<10x4x18xbf16, #tpu.memory_space<vmem>>, vector<1x4x16xbf16>
    %420 = vector.shape_cast %419 : vector<1x4x16xbf16> to vector<4x16xbf16>
    %c6_412 = arith.constant 6 : index
    %c0_413 = arith.constant 0 : index
    %c0_414 = arith.constant 0 : index
    %421 = vector.load %arg3[%c6_412, %c0_413, %c0_414] : memref<9x16x4xbf16, #tpu.memory_space<vmem>>, vector<1x16x4xbf16>
    %422 = vector.shape_cast %421 : vector<1x16x4xbf16> to vector<16x4xbf16>
    %cst_415 = arith.constant dense<0.000000e+00> : vector<16x16xf32>
    %423 = tpu.matmul %422, %420, %cst_415 {dimension_numbers = #tpu.dot_dimension_numbers<[1], [0], [0], [1], [0, 0, 1, 1], [], []>} : vector<16x4xbf16>, vector<4x16xbf16>, vector<16x16xf32> -> vector<16x16xf32>
    %424 = arith.addf %418, %423 : vector<16x16xf32>
    %c6_416 = arith.constant 6 : index
    %c0_417 = arith.constant 0 : index
    %c1_418 = arith.constant 1 : index
    %425 = vector.load %arg8[%c6_416, %c0_417, %c1_418] : memref<10x4x18xbf16, #tpu.memory_space<vmem>>, vector<1x4x16xbf16>
    %426 = vector.shape_cast %425 : vector<1x4x16xbf16> to vector<4x16xbf16>
    %c7_419 = arith.constant 7 : index
    %c0_420 = arith.constant 0 : index
    %c0_421 = arith.constant 0 : index
    %427 = vector.load %arg3[%c7_419, %c0_420, %c0_421] : memref<9x16x4xbf16, #tpu.memory_space<vmem>>, vector<1x16x4xbf16>
    %428 = vector.shape_cast %427 : vector<1x16x4xbf16> to vector<16x4xbf16>
    %cst_422 = arith.constant dense<0.000000e+00> : vector<16x16xf32>
    %429 = tpu.matmul %428, %426, %cst_422 {dimension_numbers = #tpu.dot_dimension_numbers<[1], [0], [0], [1], [0, 0, 1, 1], [], []>} : vector<16x4xbf16>, vector<4x16xbf16>, vector<16x16xf32> -> vector<16x16xf32>
    %430 = arith.addf %424, %429 : vector<16x16xf32>
    %c6_423 = arith.constant 6 : index
    %c0_424 = arith.constant 0 : index
    %c2_425 = arith.constant 2 : index
    %431 = vector.load %arg8[%c6_423, %c0_424, %c2_425] : memref<10x4x18xbf16, #tpu.memory_space<vmem>>, vector<1x4x16xbf16>
    %432 = vector.shape_cast %431 : vector<1x4x16xbf16> to vector<4x16xbf16>
    %c8_426 = arith.constant 8 : index
    %c0_427 = arith.constant 0 : index
    %c0_428 = arith.constant 0 : index
    %433 = vector.load %arg3[%c8_426, %c0_427, %c0_428] : memref<9x16x4xbf16, #tpu.memory_space<vmem>>, vector<1x16x4xbf16>
    %434 = vector.shape_cast %433 : vector<1x16x4xbf16> to vector<16x4xbf16>
    %cst_429 = arith.constant dense<0.000000e+00> : vector<16x16xf32>
    %435 = tpu.matmul %434, %432, %cst_429 {dimension_numbers = #tpu.dot_dimension_numbers<[1], [0], [0], [1], [0, 0, 1, 1], [], []>} : vector<16x4xbf16>, vector<4x16xbf16>, vector<16x16xf32> -> vector<16x16xf32>
    %436 = arith.addf %430, %435 : vector<16x16xf32>
    %c0_430 = arith.constant 0 : index
    %c0_431 = arith.constant 0 : index
    %437 = vector.load %arg4[%c0_430, %c0_431] : memref<16x1xf32, #tpu.memory_space<vmem>>, vector<16x1xf32>
    %438 = vector.broadcast %437 : vector<16x1xf32> to vector<16x16xf32>
    %439 = arith.addf %436, %438 : vector<16x16xf32>
    %cst_432 = arith.constant 0.000000e+00 : f32
    %440 = vector.broadcast %cst_432 : f32 to vector<16x16xf32>
    %441 = arith.cmpf ogt, %439, %440 : vector<16x16xf32>
    %442 = vector.broadcast %5 : f32 to vector<16x16xf32>
    %443 = arith.mulf %442, %439 : vector<16x16xf32>
    %444 = arith.select %441, %439, %443 : vector<16x16xi1>, vector<16x16xf32>
    %445 = arith.truncf %444 : vector<16x16xf32> to vector<16x16xbf16>
    %cst_433 = arith.constant 0.000000e+00 : f32
    %446 = vector.broadcast %cst_433 : f32 to vector<4x32xf32>
    %447 = vector.extract_strided_slice %445 {offsets = [0, 0], sizes = [4, 16], strides = [1, 1]} : vector<16x16xbf16> to vector<4x16xbf16>
    %c0_434 = arith.constant 0 : index
    %c0_435 = arith.constant 0 : index
    %c0_436 = arith.constant 0 : index
    %448 = vector.load %arg5[%c0_434, %c0_435, %c0_436] : memref<2x16x32xbf16, #tpu.memory_space<vmem>>, vector<1x16x32xbf16>
    %449 = vector.shape_cast %448 : vector<1x16x32xbf16> to vector<16x32xbf16>
    %cst_437 = arith.constant dense<0.000000e+00> : vector<4x32xf32>
    %450 = tpu.matmul %447, %449, %cst_437 {dimension_numbers = #tpu.dot_dimension_numbers<[1], [0], [0], [1], [0, 0, 1, 1], [], []>} : vector<4x16xbf16>, vector<16x32xbf16>, vector<4x32xf32> -> vector<4x32xf32>
    %451 = arith.addf %446, %450 : vector<4x32xf32>
    %452 = vector.extract_strided_slice %445 {offsets = [4, 0], sizes = [4, 16], strides = [1, 1]} : vector<16x16xbf16> to vector<4x16xbf16>
    %c1_438 = arith.constant 1 : index
    %c0_439 = arith.constant 0 : index
    %c0_440 = arith.constant 0 : index
    %453 = vector.load %arg5[%c1_438, %c0_439, %c0_440] : memref<2x16x32xbf16, #tpu.memory_space<vmem>>, vector<1x16x32xbf16>
    %454 = vector.shape_cast %453 : vector<1x16x32xbf16> to vector<16x32xbf16>
    %cst_441 = arith.constant dense<0.000000e+00> : vector<4x32xf32>
    %455 = tpu.matmul %452, %454, %cst_441 {dimension_numbers = #tpu.dot_dimension_numbers<[1], [0], [0], [1], [0, 0, 1, 1], [], []>} : vector<4x16xbf16>, vector<16x32xbf16>, vector<4x32xf32> -> vector<4x32xf32>
    %456 = arith.addf %451, %455 : vector<4x32xf32>
    %457 = arith.truncf %456 : vector<4x32xf32> to vector<4x32xbf16>
    %c0_442 = arith.constant 0 : index
    %c0_443 = arith.constant 0 : index
    %c8_444 = arith.constant 8 : index
    %c0_445 = arith.constant 0 : index
    %458 = vector.load %arg7[%c0_442, %c0_443, %c8_444, %c0_445] : memref<1x4x16x32xbf16, #tpu.memory_space<vmem>>, vector<1x4x1x32xbf16>
    %459 = vector.shape_cast %458 : vector<1x4x1x32xbf16> to vector<4x32xbf16>
    %460 = vector.shape_cast %457 : vector<4x32xbf16> to vector<1x4x1x32xbf16>
    tpu.vector_store %arg7[%c0_442, %c0_443, %c8_444, %c0_445], %460 {strides = array<i32>} : memref<1x4x16x32xbf16, #tpu.memory_space<vmem>>, vector<1x4x1x32xbf16>,
    %cst_446 = arith.constant 0.000000e+00 : f32
    %461 = vector.broadcast %cst_446 : f32 to vector<4x32xf32>
    %462 = vector.extract_strided_slice %445 {offsets = [8, 0], sizes = [4, 16], strides = [1, 1]} : vector<16x16xbf16> to vector<4x16xbf16>
    %c0_447 = arith.constant 0 : index
    %c0_448 = arith.constant 0 : index
    %c0_449 = arith.constant 0 : index
    %463 = vector.load %arg5[%c0_447, %c0_448, %c0_449] : memref<2x16x32xbf16, #tpu.memory_space<vmem>>, vector<1x16x32xbf16>
    %464 = vector.shape_cast %463 : vector<1x16x32xbf16> to vector<16x32xbf16>
    %cst_450 = arith.constant dense<0.000000e+00> : vector<4x32xf32>
    %465 = tpu.matmul %462, %464, %cst_450 {dimension_numbers = #tpu.dot_dimension_numbers<[1], [0], [0], [1], [0, 0, 1, 1], [], []>} : vector<4x16xbf16>, vector<16x32xbf16>, vector<4x32xf32> -> vector<4x32xf32>
    %466 = arith.addf %461, %465 : vector<4x32xf32>
    %467 = vector.extract_strided_slice %445 {offsets = [12, 0], sizes = [4, 16], strides = [1, 1]} : vector<16x16xbf16> to vector<4x16xbf16>
    %c1_451 = arith.constant 1 : index
    %c0_452 = arith.constant 0 : index
    %c0_453 = arith.constant 0 : index
    %468 = vector.load %arg5[%c1_451, %c0_452, %c0_453] : memref<2x16x32xbf16, #tpu.memory_space<vmem>>, vector<1x16x32xbf16>
    %469 = vector.shape_cast %468 : vector<1x16x32xbf16> to vector<16x32xbf16>
    %cst_454 = arith.constant dense<0.000000e+00> : vector<4x32xf32>
    %470 = tpu.matmul %467, %469, %cst_454 {dimension_numbers = #tpu.dot_dimension_numbers<[1], [0], [0], [1], [0, 0, 1, 1], [], []>} : vector<4x16xbf16>, vector<16x32xbf16>, vector<4x32xf32> -> vector<4x32xf32>
    %471 = arith.addf %466, %470 : vector<4x32xf32>
    %472 = arith.truncf %471 : vector<4x32xf32> to vector<4x32xbf16>
    %c0_455 = arith.constant 0 : index
    %c0_456 = arith.constant 0 : index
    %c9 = arith.constant 9 : index
    %c0_457 = arith.constant 0 : index
    %473 = vector.load %arg7[%c0_455, %c0_456, %c9, %c0_457] : memref<1x4x16x32xbf16, #tpu.memory_space<vmem>>, vector<1x4x1x32xbf16>
    %474 = vector.shape_cast %473 : vector<1x4x1x32xbf16> to vector<4x32xbf16>
    %475 = vector.shape_cast %472 : vector<4x32xbf16> to vector<1x4x1x32xbf16>
    tpu.vector_store %arg7[%c0_455, %c0_456, %c9, %c0_457], %475 {strides = array<i32>} : memref<1x4x16x32xbf16, #tpu.memory_space<vmem>>, vector<1x4x1x32xbf16>,
    %cst_458 = arith.constant 0.000000e+00 : f32
    %476 = vector.broadcast %cst_458 : f32 to vector<16x16xf32>
    %c5_459 = arith.constant 5 : index
    %c0_460 = arith.constant 0 : index
    %c0_461 = arith.constant 0 : index
    %477 = vector.load %arg8[%c5_459, %c0_460, %c0_461] : memref<10x4x18xbf16, #tpu.memory_space<vmem>>, vector<1x4x16xbf16>
    %478 = vector.shape_cast %477 : vector<1x4x16xbf16> to vector<4x16xbf16>
    %c0_462 = arith.constant 0 : index
    %c0_463 = arith.constant 0 : index
    %c0_464 = arith.constant 0 : index
    %479 = vector.load %arg3[%c0_462, %c0_463, %c0_464] : memref<9x16x4xbf16, #tpu.memory_space<vmem>>, vector<1x16x4xbf16>
    %480 = vector.shape_cast %479 : vector<1x16x4xbf16> to vector<16x4xbf16>
    %cst_465 = arith.constant dense<0.000000e+00> : vector<16x16xf32>
    %481 = tpu.matmul %480, %478, %cst_465 {dimension_numbers = #tpu.dot_dimension_numbers<[1], [0], [0], [1], [0, 0, 1, 1], [], []>} : vector<16x4xbf16>, vector<4x16xbf16>, vector<16x16xf32> -> vector<16x16xf32>
    %482 = arith.addf %476, %481 : vector<16x16xf32>
    %c5_466 = arith.constant 5 : index
    %c0_467 = arith.constant 0 : index
    %c1_468 = arith.constant 1 : index
    %483 = vector.load %arg8[%c5_466, %c0_467, %c1_468] : memref<10x4x18xbf16, #tpu.memory_space<vmem>>, vector<1x4x16xbf16>
    %484 = vector.shape_cast %483 : vector<1x4x16xbf16> to vector<4x16xbf16>
    %c1_469 = arith.constant 1 : index
    %c0_470 = arith.constant 0 : index
    %c0_471 = arith.constant 0 : index
    %485 = vector.load %arg3[%c1_469, %c0_470, %c0_471] : memref<9x16x4xbf16, #tpu.memory_space<vmem>>, vector<1x16x4xbf16>
    %486 = vector.shape_cast %485 : vector<1x16x4xbf16> to vector<16x4xbf16>
    %cst_472 = arith.constant dense<0.000000e+00> : vector<16x16xf32>
    %487 = tpu.matmul %486, %484, %cst_472 {dimension_numbers = #tpu.dot_dimension_numbers<[1], [0], [0], [1], [0, 0, 1, 1], [], []>} : vector<16x4xbf16>, vector<4x16xbf16>, vector<16x16xf32> -> vector<16x16xf32>
    %488 = arith.addf %482, %487 : vector<16x16xf32>
    %c5_473 = arith.constant 5 : index
    %c0_474 = arith.constant 0 : index
    %c2_475 = arith.constant 2 : index
    %489 = vector.load %arg8[%c5_473, %c0_474, %c2_475] : memref<10x4x18xbf16, #tpu.memory_space<vmem>>, vector<1x4x16xbf16>
    %490 = vector.shape_cast %489 : vector<1x4x16xbf16> to vector<4x16xbf16>
    %c2_476 = arith.constant 2 : index
    %c0_477 = arith.constant 0 : index
    %c0_478 = arith.constant 0 : index
    %491 = vector.load %arg3[%c2_476, %c0_477, %c0_478] : memref<9x16x4xbf16, #tpu.memory_space<vmem>>, vector<1x16x4xbf16>
    %492 = vector.shape_cast %491 : vector<1x16x4xbf16> to vector<16x4xbf16>
    %cst_479 = arith.constant dense<0.000000e+00> : vector<16x16xf32>
    %493 = tpu.matmul %492, %490, %cst_479 {dimension_numbers = #tpu.dot_dimension_numbers<[1], [0], [0], [1], [0, 0, 1, 1], [], []>} : vector<16x4xbf16>, vector<4x16xbf16>, vector<16x16xf32> -> vector<16x16xf32>
    %494 = arith.addf %488, %493 : vector<16x16xf32>
    %c6_480 = arith.constant 6 : index
    %c0_481 = arith.constant 0 : index
    %c0_482 = arith.constant 0 : index
    %495 = vector.load %arg8[%c6_480, %c0_481, %c0_482] : memref<10x4x18xbf16, #tpu.memory_space<vmem>>, vector<1x4x16xbf16>
    %496 = vector.shape_cast %495 : vector<1x4x16xbf16> to vector<4x16xbf16>
    %c3_483 = arith.constant 3 : index
    %c0_484 = arith.constant 0 : index
    %c0_485 = arith.constant 0 : index
    %497 = vector.load %arg3[%c3_483, %c0_484, %c0_485] : memref<9x16x4xbf16, #tpu.memory_space<vmem>>, vector<1x16x4xbf16>
    %498 = vector.shape_cast %497 : vector<1x16x4xbf16> to vector<16x4xbf16>
    %cst_486 = arith.constant dense<0.000000e+00> : vector<16x16xf32>
    %499 = tpu.matmul %498, %496, %cst_486 {dimension_numbers = #tpu.dot_dimension_numbers<[1], [0], [0], [1], [0, 0, 1, 1], [], []>} : vector<16x4xbf16>, vector<4x16xbf16>, vector<16x16xf32> -> vector<16x16xf32>
    %500 = arith.addf %494, %499 : vector<16x16xf32>
    %c6_487 = arith.constant 6 : index
    %c0_488 = arith.constant 0 : index
    %c1_489 = arith.constant 1 : index
    %501 = vector.load %arg8[%c6_487, %c0_488, %c1_489] : memref<10x4x18xbf16, #tpu.memory_space<vmem>>, vector<1x4x16xbf16>
    %502 = vector.shape_cast %501 : vector<1x4x16xbf16> to vector<4x16xbf16>
    %c4_490 = arith.constant 4 : index
    %c0_491 = arith.constant 0 : index
    %c0_492 = arith.constant 0 : index
    %503 = vector.load %arg3[%c4_490, %c0_491, %c0_492] : memref<9x16x4xbf16, #tpu.memory_space<vmem>>, vector<1x16x4xbf16>
    %504 = vector.shape_cast %503 : vector<1x16x4xbf16> to vector<16x4xbf16>
    %cst_493 = arith.constant dense<0.000000e+00> : vector<16x16xf32>
    %505 = tpu.matmul %504, %502, %cst_493 {dimension_numbers = #tpu.dot_dimension_numbers<[1], [0], [0], [1], [0, 0, 1, 1], [], []>} : vector<16x4xbf16>, vector<4x16xbf16>, vector<16x16xf32> -> vector<16x16xf32>
    %506 = arith.addf %500, %505 : vector<16x16xf32>
    %c6_494 = arith.constant 6 : index
    %c0_495 = arith.constant 0 : index
    %c2_496 = arith.constant 2 : index
    %507 = vector.load %arg8[%c6_494, %c0_495, %c2_496] : memref<10x4x18xbf16, #tpu.memory_space<vmem>>, vector<1x4x16xbf16>
    %508 = vector.shape_cast %507 : vector<1x4x16xbf16> to vector<4x16xbf16>
    %c5_497 = arith.constant 5 : index
    %c0_498 = arith.constant 0 : index
    %c0_499 = arith.constant 0 : index
    %509 = vector.load %arg3[%c5_497, %c0_498, %c0_499] : memref<9x16x4xbf16, #tpu.memory_space<vmem>>, vector<1x16x4xbf16>
    %510 = vector.shape_cast %509 : vector<1x16x4xbf16> to vector<16x4xbf16>
    %cst_500 = arith.constant dense<0.000000e+00> : vector<16x16xf32>
    %511 = tpu.matmul %510, %508, %cst_500 {dimension_numbers = #tpu.dot_dimension_numbers<[1], [0], [0], [1], [0, 0, 1, 1], [], []>} : vector<16x4xbf16>, vector<4x16xbf16>, vector<16x16xf32> -> vector<16x16xf32>
    %512 = arith.addf %506, %511 : vector<16x16xf32>
    %c7_501 = arith.constant 7 : index
    %c0_502 = arith.constant 0 : index
    %c0_503 = arith.constant 0 : index
    %513 = vector.load %arg8[%c7_501, %c0_502, %c0_503] : memref<10x4x18xbf16, #tpu.memory_space<vmem>>, vector<1x4x16xbf16>
    %514 = vector.shape_cast %513 : vector<1x4x16xbf16> to vector<4x16xbf16>
    %c6_504 = arith.constant 6 : index
    %c0_505 = arith.constant 0 : index
    %c0_506 = arith.constant 0 : index
    %515 = vector.load %arg3[%c6_504, %c0_505, %c0_506] : memref<9x16x4xbf16, #tpu.memory_space<vmem>>, vector<1x16x4xbf16>
    %516 = vector.shape_cast %515 : vector<1x16x4xbf16> to vector<16x4xbf16>
    %cst_507 = arith.constant dense<0.000000e+00> : vector<16x16xf32>
    %517 = tpu.matmul %516, %514, %cst_507 {dimension_numbers = #tpu.dot_dimension_numbers<[1], [0], [0], [1], [0, 0, 1, 1], [], []>} : vector<16x4xbf16>, vector<4x16xbf16>, vector<16x16xf32> -> vector<16x16xf32>
    %518 = arith.addf %512, %517 : vector<16x16xf32>
    %c7_508 = arith.constant 7 : index
    %c0_509 = arith.constant 0 : index
    %c1_510 = arith.constant 1 : index
    %519 = vector.load %arg8[%c7_508, %c0_509, %c1_510] : memref<10x4x18xbf16, #tpu.memory_space<vmem>>, vector<1x4x16xbf16>
    %520 = vector.shape_cast %519 : vector<1x4x16xbf16> to vector<4x16xbf16>
    %c7_511 = arith.constant 7 : index
    %c0_512 = arith.constant 0 : index
    %c0_513 = arith.constant 0 : index
    %521 = vector.load %arg3[%c7_511, %c0_512, %c0_513] : memref<9x16x4xbf16, #tpu.memory_space<vmem>>, vector<1x16x4xbf16>
    %522 = vector.shape_cast %521 : vector<1x16x4xbf16> to vector<16x4xbf16>
    %cst_514 = arith.constant dense<0.000000e+00> : vector<16x16xf32>
    %523 = tpu.matmul %522, %520, %cst_514 {dimension_numbers = #tpu.dot_dimension_numbers<[1], [0], [0], [1], [0, 0, 1, 1], [], []>} : vector<16x4xbf16>, vector<4x16xbf16>, vector<16x16xf32> -> vector<16x16xf32>
    %524 = arith.addf %518, %523 : vector<16x16xf32>
    %c7_515 = arith.constant 7 : index
    %c0_516 = arith.constant 0 : index
    %c2_517 = arith.constant 2 : index
    %525 = vector.load %arg8[%c7_515, %c0_516, %c2_517] : memref<10x4x18xbf16, #tpu.memory_space<vmem>>, vector<1x4x16xbf16>
    %526 = vector.shape_cast %525 : vector<1x4x16xbf16> to vector<4x16xbf16>
    %c8_518 = arith.constant 8 : index
    %c0_519 = arith.constant 0 : index
    %c0_520 = arith.constant 0 : index
    %527 = vector.load %arg3[%c8_518, %c0_519, %c0_520] : memref<9x16x4xbf16, #tpu.memory_space<vmem>>, vector<1x16x4xbf16>
    %528 = vector.shape_cast %527 : vector<1x16x4xbf16> to vector<16x4xbf16>
    %cst_521 = arith.constant dense<0.000000e+00> : vector<16x16xf32>
    %529 = tpu.matmul %528, %526, %cst_521 {dimension_numbers = #tpu.dot_dimension_numbers<[1], [0], [0], [1], [0, 0, 1, 1], [], []>} : vector<16x4xbf16>, vector<4x16xbf16>, vector<16x16xf32> -> vector<16x16xf32>
    %530 = arith.addf %524, %529 : vector<16x16xf32>
    %c0_522 = arith.constant 0 : index
    %c0_523 = arith.constant 0 : index
    %531 = vector.load %arg4[%c0_522, %c0_523] : memref<16x1xf32, #tpu.memory_space<vmem>>, vector<16x1xf32>
    %532 = vector.broadcast %531 : vector<16x1xf32> to vector<16x16xf32>
    %533 = arith.addf %530, %532 : vector<16x16xf32>
    %cst_524 = arith.constant 0.000000e+00 : f32
    %534 = vector.broadcast %cst_524 : f32 to vector<16x16xf32>
    %535 = arith.cmpf ogt, %533, %534 : vector<16x16xf32>
    %536 = vector.broadcast %5 : f32 to vector<16x16xf32>
    %537 = arith.mulf %536, %533 : vector<16x16xf32>
    %538 = arith.select %535, %533, %537 : vector<16x16xi1>, vector<16x16xf32>
    %539 = arith.truncf %538 : vector<16x16xf32> to vector<16x16xbf16>
    %cst_525 = arith.constant 0.000000e+00 : f32
    %540 = vector.broadcast %cst_525 : f32 to vector<4x32xf32>
    %541 = vector.extract_strided_slice %539 {offsets = [0, 0], sizes = [4, 16], strides = [1, 1]} : vector<16x16xbf16> to vector<4x16xbf16>
    %c0_526 = arith.constant 0 : index
    %c0_527 = arith.constant 0 : index
    %c0_528 = arith.constant 0 : index
    %542 = vector.load %arg5[%c0_526, %c0_527, %c0_528] : memref<2x16x32xbf16, #tpu.memory_space<vmem>>, vector<1x16x32xbf16>
    %543 = vector.shape_cast %542 : vector<1x16x32xbf16> to vector<16x32xbf16>
    %cst_529 = arith.constant dense<0.000000e+00> : vector<4x32xf32>
    %544 = tpu.matmul %541, %543, %cst_529 {dimension_numbers = #tpu.dot_dimension_numbers<[1], [0], [0], [1], [0, 0, 1, 1], [], []>} : vector<4x16xbf16>, vector<16x32xbf16>, vector<4x32xf32> -> vector<4x32xf32>
    %545 = arith.addf %540, %544 : vector<4x32xf32>
    %546 = vector.extract_strided_slice %539 {offsets = [4, 0], sizes = [4, 16], strides = [1, 1]} : vector<16x16xbf16> to vector<4x16xbf16>
    %c1_530 = arith.constant 1 : index
    %c0_531 = arith.constant 0 : index
    %c0_532 = arith.constant 0 : index
    %547 = vector.load %arg5[%c1_530, %c0_531, %c0_532] : memref<2x16x32xbf16, #tpu.memory_space<vmem>>, vector<1x16x32xbf16>
    %548 = vector.shape_cast %547 : vector<1x16x32xbf16> to vector<16x32xbf16>
    %cst_533 = arith.constant dense<0.000000e+00> : vector<4x32xf32>
    %549 = tpu.matmul %546, %548, %cst_533 {dimension_numbers = #tpu.dot_dimension_numbers<[1], [0], [0], [1], [0, 0, 1, 1], [], []>} : vector<4x16xbf16>, vector<16x32xbf16>, vector<4x32xf32> -> vector<4x32xf32>
    %550 = arith.addf %545, %549 : vector<4x32xf32>
    %551 = arith.truncf %550 : vector<4x32xf32> to vector<4x32xbf16>
    %c0_534 = arith.constant 0 : index
    %c0_535 = arith.constant 0 : index
    %c10 = arith.constant 10 : index
    %c0_536 = arith.constant 0 : index
    %552 = vector.load %arg7[%c0_534, %c0_535, %c10, %c0_536] : memref<1x4x16x32xbf16, #tpu.memory_space<vmem>>, vector<1x4x1x32xbf16>
    %553 = vector.shape_cast %552 : vector<1x4x1x32xbf16> to vector<4x32xbf16>
    %554 = vector.shape_cast %551 : vector<4x32xbf16> to vector<1x4x1x32xbf16>
    tpu.vector_store %arg7[%c0_534, %c0_535, %c10, %c0_536], %554 {strides = array<i32>} : memref<1x4x16x32xbf16, #tpu.memory_space<vmem>>, vector<1x4x1x32xbf16>,
    %cst_537 = arith.constant 0.000000e+00 : f32
    %555 = vector.broadcast %cst_537 : f32 to vector<4x32xf32>
    %556 = vector.extract_strided_slice %539 {offsets = [8, 0], sizes = [4, 16], strides = [1, 1]} : vector<16x16xbf16> to vector<4x16xbf16>
    %c0_538 = arith.constant 0 : index
    %c0_539 = arith.constant 0 : index
    %c0_540 = arith.constant 0 : index
    %557 = vector.load %arg5[%c0_538, %c0_539, %c0_540] : memref<2x16x32xbf16, #tpu.memory_space<vmem>>, vector<1x16x32xbf16>
    %558 = vector.shape_cast %557 : vector<1x16x32xbf16> to vector<16x32xbf16>
    %cst_541 = arith.constant dense<0.000000e+00> : vector<4x32xf32>
    %559 = tpu.matmul %556, %558, %cst_541 {dimension_numbers = #tpu.dot_dimension_numbers<[1], [0], [0], [1], [0, 0, 1, 1], [], []>} : vector<4x16xbf16>, vector<16x32xbf16>, vector<4x32xf32> -> vector<4x32xf32>
    %560 = arith.addf %555, %559 : vector<4x32xf32>
    %561 = vector.extract_strided_slice %539 {offsets = [12, 0], sizes = [4, 16], strides = [1, 1]} : vector<16x16xbf16> to vector<4x16xbf16>
    %c1_542 = arith.constant 1 : index
    %c0_543 = arith.constant 0 : index
    %c0_544 = arith.constant 0 : index
    %562 = vector.load %arg5[%c1_542, %c0_543, %c0_544] : memref<2x16x32xbf16, #tpu.memory_space<vmem>>, vector<1x16x32xbf16>
    %563 = vector.shape_cast %562 : vector<1x16x32xbf16> to vector<16x32xbf16>
    %cst_545 = arith.constant dense<0.000000e+00> : vector<4x32xf32>
    %564 = tpu.matmul %561, %563, %cst_545 {dimension_numbers = #tpu.dot_dimension_numbers<[1], [0], [0], [1], [0, 0, 1, 1], [], []>} : vector<4x16xbf16>, vector<16x32xbf16>, vector<4x32xf32> -> vector<4x32xf32>
    %565 = arith.addf %560, %564 : vector<4x32xf32>
    %566 = arith.truncf %565 : vector<4x32xf32> to vector<4x32xbf16>
    %c0_546 = arith.constant 0 : index
    %c0_547 = arith.constant 0 : index
    %c11 = arith.constant 11 : index
    %c0_548 = arith.constant 0 : index
    %567 = vector.load %arg7[%c0_546, %c0_547, %c11, %c0_548] : memref<1x4x16x32xbf16, #tpu.memory_space<vmem>>, vector<1x4x1x32xbf16>
    %568 = vector.shape_cast %567 : vector<1x4x1x32xbf16> to vector<4x32xbf16>
    %569 = vector.shape_cast %566 : vector<4x32xbf16> to vector<1x4x1x32xbf16>
    tpu.vector_store %arg7[%c0_546, %c0_547, %c11, %c0_548], %569 {strides = array<i32>} : memref<1x4x16x32xbf16, #tpu.memory_space<vmem>>, vector<1x4x1x32xbf16>,
    %cst_549 = arith.constant 0.000000e+00 : f32
    %570 = vector.broadcast %cst_549 : f32 to vector<16x16xf32>
    %c6_550 = arith.constant 6 : index
    %c0_551 = arith.constant 0 : index
    %c0_552 = arith.constant 0 : index
    %571 = vector.load %arg8[%c6_550, %c0_551, %c0_552] : memref<10x4x18xbf16, #tpu.memory_space<vmem>>, vector<1x4x16xbf16>
    %572 = vector.shape_cast %571 : vector<1x4x16xbf16> to vector<4x16xbf16>
    %c0_553 = arith.constant 0 : index
    %c0_554 = arith.constant 0 : index
    %c0_555 = arith.constant 0 : index
    %573 = vector.load %arg3[%c0_553, %c0_554, %c0_555] : memref<9x16x4xbf16, #tpu.memory_space<vmem>>, vector<1x16x4xbf16>
    %574 = vector.shape_cast %573 : vector<1x16x4xbf16> to vector<16x4xbf16>
    %cst_556 = arith.constant dense<0.000000e+00> : vector<16x16xf32>
    %575 = tpu.matmul %574, %572, %cst_556 {dimension_numbers = #tpu.dot_dimension_numbers<[1], [0], [0], [1], [0, 0, 1, 1], [], []>} : vector<16x4xbf16>, vector<4x16xbf16>, vector<16x16xf32> -> vector<16x16xf32>
    %576 = arith.addf %570, %575 : vector<16x16xf32>
    %c6_557 = arith.constant 6 : index
    %c0_558 = arith.constant 0 : index
    %c1_559 = arith.constant 1 : index
    %577 = vector.load %arg8[%c6_557, %c0_558, %c1_559] : memref<10x4x18xbf16, #tpu.memory_space<vmem>>, vector<1x4x16xbf16>
    %578 = vector.shape_cast %577 : vector<1x4x16xbf16> to vector<4x16xbf16>
    %c1_560 = arith.constant 1 : index
    %c0_561 = arith.constant 0 : index
    %c0_562 = arith.constant 0 : index
    %579 = vector.load %arg3[%c1_560, %c0_561, %c0_562] : memref<9x16x4xbf16, #tpu.memory_space<vmem>>, vector<1x16x4xbf16>
    %580 = vector.shape_cast %579 : vector<1x16x4xbf16> to vector<16x4xbf16>
    %cst_563 = arith.constant dense<0.000000e+00> : vector<16x16xf32>
    %581 = tpu.matmul %580, %578, %cst_563 {dimension_numbers = #tpu.dot_dimension_numbers<[1], [0], [0], [1], [0, 0, 1, 1], [], []>} : vector<16x4xbf16>, vector<4x16xbf16>, vector<16x16xf32> -> vector<16x16xf32>
    %582 = arith.addf %576, %581 : vector<16x16xf32>
    %c6_564 = arith.constant 6 : index
    %c0_565 = arith.constant 0 : index
    %c2_566 = arith.constant 2 : index
    %583 = vector.load %arg8[%c6_564, %c0_565, %c2_566] : memref<10x4x18xbf16, #tpu.memory_space<vmem>>, vector<1x4x16xbf16>
    %584 = vector.shape_cast %583 : vector<1x4x16xbf16> to vector<4x16xbf16>
    %c2_567 = arith.constant 2 : index
    %c0_568 = arith.constant 0 : index
    %c0_569 = arith.constant 0 : index
    %585 = vector.load %arg3[%c2_567, %c0_568, %c0_569] : memref<9x16x4xbf16, #tpu.memory_space<vmem>>, vector<1x16x4xbf16>
    %586 = vector.shape_cast %585 : vector<1x16x4xbf16> to vector<16x4xbf16>
    %cst_570 = arith.constant dense<0.000000e+00> : vector<16x16xf32>
    %587 = tpu.matmul %586, %584, %cst_570 {dimension_numbers = #tpu.dot_dimension_numbers<[1], [0], [0], [1], [0, 0, 1, 1], [], []>} : vector<16x4xbf16>, vector<4x16xbf16>, vector<16x16xf32> -> vector<16x16xf32>
    %588 = arith.addf %582, %587 : vector<16x16xf32>
    %c7_571 = arith.constant 7 : index
    %c0_572 = arith.constant 0 : index
    %c0_573 = arith.constant 0 : index
    %589 = vector.load %arg8[%c7_571, %c0_572, %c0_573] : memref<10x4x18xbf16, #tpu.memory_space<vmem>>, vector<1x4x16xbf16>
    %590 = vector.shape_cast %589 : vector<1x4x16xbf16> to vector<4x16xbf16>
    %c3_574 = arith.constant 3 : index
    %c0_575 = arith.constant 0 : index
    %c0_576 = arith.constant 0 : index
    %591 = vector.load %arg3[%c3_574, %c0_575, %c0_576] : memref<9x16x4xbf16, #tpu.memory_space<vmem>>, vector<1x16x4xbf16>
    %592 = vector.shape_cast %591 : vector<1x16x4xbf16> to vector<16x4xbf16>
    %cst_577 = arith.constant dense<0.000000e+00> : vector<16x16xf32>
    %593 = tpu.matmul %592, %590, %cst_577 {dimension_numbers = #tpu.dot_dimension_numbers<[1], [0], [0], [1], [0, 0, 1, 1], [], []>} : vector<16x4xbf16>, vector<4x16xbf16>, vector<16x16xf32> -> vector<16x16xf32>
    %594 = arith.addf %588, %593 : vector<16x16xf32>
    %c7_578 = arith.constant 7 : index
    %c0_579 = arith.constant 0 : index
    %c1_580 = arith.constant 1 : index
    %595 = vector.load %arg8[%c7_578, %c0_579, %c1_580] : memref<10x4x18xbf16, #tpu.memory_space<vmem>>, vector<1x4x16xbf16>
    %596 = vector.shape_cast %595 : vector<1x4x16xbf16> to vector<4x16xbf16>
    %c4_581 = arith.constant 4 : index
    %c0_582 = arith.constant 0 : index
    %c0_583 = arith.constant 0 : index
    %597 = vector.load %arg3[%c4_581, %c0_582, %c0_583] : memref<9x16x4xbf16, #tpu.memory_space<vmem>>, vector<1x16x4xbf16>
    %598 = vector.shape_cast %597 : vector<1x16x4xbf16> to vector<16x4xbf16>
    %cst_584 = arith.constant dense<0.000000e+00> : vector<16x16xf32>
    %599 = tpu.matmul %598, %596, %cst_584 {dimension_numbers = #tpu.dot_dimension_numbers<[1], [0], [0], [1], [0, 0, 1, 1], [], []>} : vector<16x4xbf16>, vector<4x16xbf16>, vector<16x16xf32> -> vector<16x16xf32>
    %600 = arith.addf %594, %599 : vector<16x16xf32>
    %c7_585 = arith.constant 7 : index
    %c0_586 = arith.constant 0 : index
    %c2_587 = arith.constant 2 : index
    %601 = vector.load %arg8[%c7_585, %c0_586, %c2_587] : memref<10x4x18xbf16, #tpu.memory_space<vmem>>, vector<1x4x16xbf16>
    %602 = vector.shape_cast %601 : vector<1x4x16xbf16> to vector<4x16xbf16>
    %c5_588 = arith.constant 5 : index
    %c0_589 = arith.constant 0 : index
    %c0_590 = arith.constant 0 : index
    %603 = vector.load %arg3[%c5_588, %c0_589, %c0_590] : memref<9x16x4xbf16, #tpu.memory_space<vmem>>, vector<1x16x4xbf16>
    %604 = vector.shape_cast %603 : vector<1x16x4xbf16> to vector<16x4xbf16>
    %cst_591 = arith.constant dense<0.000000e+00> : vector<16x16xf32>
    %605 = tpu.matmul %604, %602, %cst_591 {dimension_numbers = #tpu.dot_dimension_numbers<[1], [0], [0], [1], [0, 0, 1, 1], [], []>} : vector<16x4xbf16>, vector<4x16xbf16>, vector<16x16xf32> -> vector<16x16xf32>
    %606 = arith.addf %600, %605 : vector<16x16xf32>
    %c8_592 = arith.constant 8 : index
    %c0_593 = arith.constant 0 : index
    %c0_594 = arith.constant 0 : index
    %607 = vector.load %arg8[%c8_592, %c0_593, %c0_594] : memref<10x4x18xbf16, #tpu.memory_space<vmem>>, vector<1x4x16xbf16>
    %608 = vector.shape_cast %607 : vector<1x4x16xbf16> to vector<4x16xbf16>
    %c6_595 = arith.constant 6 : index
    %c0_596 = arith.constant 0 : index
    %c0_597 = arith.constant 0 : index
    %609 = vector.load %arg3[%c6_595, %c0_596, %c0_597] : memref<9x16x4xbf16, #tpu.memory_space<vmem>>, vector<1x16x4xbf16>
    %610 = vector.shape_cast %609 : vector<1x16x4xbf16> to vector<16x4xbf16>
    %cst_598 = arith.constant dense<0.000000e+00> : vector<16x16xf32>
    %611 = tpu.matmul %610, %608, %cst_598 {dimension_numbers = #tpu.dot_dimension_numbers<[1], [0], [0], [1], [0, 0, 1, 1], [], []>} : vector<16x4xbf16>, vector<4x16xbf16>, vector<16x16xf32> -> vector<16x16xf32>
    %612 = arith.addf %606, %611 : vector<16x16xf32>
    %c8_599 = arith.constant 8 : index
    %c0_600 = arith.constant 0 : index
    %c1_601 = arith.constant 1 : index
    %613 = vector.load %arg8[%c8_599, %c0_600, %c1_601] : memref<10x4x18xbf16, #tpu.memory_space<vmem>>, vector<1x4x16xbf16>
    %614 = vector.shape_cast %613 : vector<1x4x16xbf16> to vector<4x16xbf16>
    %c7_602 = arith.constant 7 : index
    %c0_603 = arith.constant 0 : index
    %c0_604 = arith.constant 0 : index
    %615 = vector.load %arg3[%c7_602, %c0_603, %c0_604] : memref<9x16x4xbf16, #tpu.memory_space<vmem>>, vector<1x16x4xbf16>
    %616 = vector.shape_cast %615 : vector<1x16x4xbf16> to vector<16x4xbf16>
    %cst_605 = arith.constant dense<0.000000e+00> : vector<16x16xf32>
    %617 = tpu.matmul %616, %614, %cst_605 {dimension_numbers = #tpu.dot_dimension_numbers<[1], [0], [0], [1], [0, 0, 1, 1], [], []>} : vector<16x4xbf16>, vector<4x16xbf16>, vector<16x16xf32> -> vector<16x16xf32>
    %618 = arith.addf %612, %617 : vector<16x16xf32>
    %c8_606 = arith.constant 8 : index
    %c0_607 = arith.constant 0 : index
    %c2_608 = arith.constant 2 : index
    %619 = vector.load %arg8[%c8_606, %c0_607, %c2_608] : memref<10x4x18xbf16, #tpu.memory_space<vmem>>, vector<1x4x16xbf16>
    %620 = vector.shape_cast %619 : vector<1x4x16xbf16> to vector<4x16xbf16>
    %c8_609 = arith.constant 8 : index
    %c0_610 = arith.constant 0 : index
    %c0_611 = arith.constant 0 : index
    %621 = vector.load %arg3[%c8_609, %c0_610, %c0_611] : memref<9x16x4xbf16, #tpu.memory_space<vmem>>, vector<1x16x4xbf16>
    %622 = vector.shape_cast %621 : vector<1x16x4xbf16> to vector<16x4xbf16>
    %cst_612 = arith.constant dense<0.000000e+00> : vector<16x16xf32>
    %623 = tpu.matmul %622, %620, %cst_612 {dimension_numbers = #tpu.dot_dimension_numbers<[1], [0], [0], [1], [0, 0, 1, 1], [], []>} : vector<16x4xbf16>, vector<4x16xbf16>, vector<16x16xf32> -> vector<16x16xf32>
    %624 = arith.addf %618, %623 : vector<16x16xf32>
    %c0_613 = arith.constant 0 : index
    %c0_614 = arith.constant 0 : index
    %625 = vector.load %arg4[%c0_613, %c0_614] : memref<16x1xf32, #tpu.memory_space<vmem>>, vector<16x1xf32>
    %626 = vector.broadcast %625 : vector<16x1xf32> to vector<16x16xf32>
    %627 = arith.addf %624, %626 : vector<16x16xf32>
    %cst_615 = arith.constant 0.000000e+00 : f32
    %628 = vector.broadcast %cst_615 : f32 to vector<16x16xf32>
    %629 = arith.cmpf ogt, %627, %628 : vector<16x16xf32>
    %630 = vector.broadcast %5 : f32 to vector<16x16xf32>
    %631 = arith.mulf %630, %627 : vector<16x16xf32>
    %632 = arith.select %629, %627, %631 : vector<16x16xi1>, vector<16x16xf32>
    %633 = arith.truncf %632 : vector<16x16xf32> to vector<16x16xbf16>
    %cst_616 = arith.constant 0.000000e+00 : f32
    %634 = vector.broadcast %cst_616 : f32 to vector<4x32xf32>
    %635 = vector.extract_strided_slice %633 {offsets = [0, 0], sizes = [4, 16], strides = [1, 1]} : vector<16x16xbf16> to vector<4x16xbf16>
    %c0_617 = arith.constant 0 : index
    %c0_618 = arith.constant 0 : index
    %c0_619 = arith.constant 0 : index
    %636 = vector.load %arg5[%c0_617, %c0_618, %c0_619] : memref<2x16x32xbf16, #tpu.memory_space<vmem>>, vector<1x16x32xbf16>
    %637 = vector.shape_cast %636 : vector<1x16x32xbf16> to vector<16x32xbf16>
    %cst_620 = arith.constant dense<0.000000e+00> : vector<4x32xf32>
    %638 = tpu.matmul %635, %637, %cst_620 {dimension_numbers = #tpu.dot_dimension_numbers<[1], [0], [0], [1], [0, 0, 1, 1], [], []>} : vector<4x16xbf16>, vector<16x32xbf16>, vector<4x32xf32> -> vector<4x32xf32>
    %639 = arith.addf %634, %638 : vector<4x32xf32>
    %640 = vector.extract_strided_slice %633 {offsets = [4, 0], sizes = [4, 16], strides = [1, 1]} : vector<16x16xbf16> to vector<4x16xbf16>
    %c1_621 = arith.constant 1 : index
    %c0_622 = arith.constant 0 : index
    %c0_623 = arith.constant 0 : index
    %641 = vector.load %arg5[%c1_621, %c0_622, %c0_623] : memref<2x16x32xbf16, #tpu.memory_space<vmem>>, vector<1x16x32xbf16>
    %642 = vector.shape_cast %641 : vector<1x16x32xbf16> to vector<16x32xbf16>
    %cst_624 = arith.constant dense<0.000000e+00> : vector<4x32xf32>
    %643 = tpu.matmul %640, %642, %cst_624 {dimension_numbers = #tpu.dot_dimension_numbers<[1], [0], [0], [1], [0, 0, 1, 1], [], []>} : vector<4x16xbf16>, vector<16x32xbf16>, vector<4x32xf32> -> vector<4x32xf32>
    %644 = arith.addf %639, %643 : vector<4x32xf32>
    %645 = arith.truncf %644 : vector<4x32xf32> to vector<4x32xbf16>
    %c0_625 = arith.constant 0 : index
    %c0_626 = arith.constant 0 : index
    %c12 = arith.constant 12 : index
    %c0_627 = arith.constant 0 : index
    %646 = vector.load %arg7[%c0_625, %c0_626, %c12, %c0_627] : memref<1x4x16x32xbf16, #tpu.memory_space<vmem>>, vector<1x4x1x32xbf16>
    %647 = vector.shape_cast %646 : vector<1x4x1x32xbf16> to vector<4x32xbf16>
    %648 = vector.shape_cast %645 : vector<4x32xbf16> to vector<1x4x1x32xbf16>
    tpu.vector_store %arg7[%c0_625, %c0_626, %c12, %c0_627], %648 {strides = array<i32>} : memref<1x4x16x32xbf16, #tpu.memory_space<vmem>>, vector<1x4x1x32xbf16>,
    %cst_628 = arith.constant 0.000000e+00 : f32
    %649 = vector.broadcast %cst_628 : f32 to vector<4x32xf32>
    %650 = vector.extract_strided_slice %633 {offsets = [8, 0], sizes = [4, 16], strides = [1, 1]} : vector<16x16xbf16> to vector<4x16xbf16>
    %c0_629 = arith.constant 0 : index
    %c0_630 = arith.constant 0 : index
    %c0_631 = arith.constant 0 : index
    %651 = vector.load %arg5[%c0_629, %c0_630, %c0_631] : memref<2x16x32xbf16, #tpu.memory_space<vmem>>, vector<1x16x32xbf16>
    %652 = vector.shape_cast %651 : vector<1x16x32xbf16> to vector<16x32xbf16>
    %cst_632 = arith.constant dense<0.000000e+00> : vector<4x32xf32>
    %653 = tpu.matmul %650, %652, %cst_632 {dimension_numbers = #tpu.dot_dimension_numbers<[1], [0], [0], [1], [0, 0, 1, 1], [], []>} : vector<4x16xbf16>, vector<16x32xbf16>, vector<4x32xf32> -> vector<4x32xf32>
    %654 = arith.addf %649, %653 : vector<4x32xf32>
    %655 = vector.extract_strided_slice %633 {offsets = [12, 0], sizes = [4, 16], strides = [1, 1]} : vector<16x16xbf16> to vector<4x16xbf16>
    %c1_633 = arith.constant 1 : index
    %c0_634 = arith.constant 0 : index
    %c0_635 = arith.constant 0 : index
    %656 = vector.load %arg5[%c1_633, %c0_634, %c0_635] : memref<2x16x32xbf16, #tpu.memory_space<vmem>>, vector<1x16x32xbf16>
    %657 = vector.shape_cast %656 : vector<1x16x32xbf16> to vector<16x32xbf16>
    %cst_636 = arith.constant dense<0.000000e+00> : vector<4x32xf32>
    %658 = tpu.matmul %655, %657, %cst_636 {dimension_numbers = #tpu.dot_dimension_numbers<[1], [0], [0], [1], [0, 0, 1, 1], [], []>} : vector<4x16xbf16>, vector<16x32xbf16>, vector<4x32xf32> -> vector<4x32xf32>
    %659 = arith.addf %654, %658 : vector<4x32xf32>
    %660 = arith.truncf %659 : vector<4x32xf32> to vector<4x32xbf16>
    %c0_637 = arith.constant 0 : index
    %c0_638 = arith.constant 0 : index
    %c13 = arith.constant 13 : index
    %c0_639 = arith.constant 0 : index
    %661 = vector.load %arg7[%c0_637, %c0_638, %c13, %c0_639] : memref<1x4x16x32xbf16, #tpu.memory_space<vmem>>, vector<1x4x1x32xbf16>
    %662 = vector.shape_cast %661 : vector<1x4x1x32xbf16> to vector<4x32xbf16>
    %663 = vector.shape_cast %660 : vector<4x32xbf16> to vector<1x4x1x32xbf16>
    tpu.vector_store %arg7[%c0_637, %c0_638, %c13, %c0_639], %663 {strides = array<i32>} : memref<1x4x16x32xbf16, #tpu.memory_space<vmem>>, vector<1x4x1x32xbf16>,
    %cst_640 = arith.constant 0.000000e+00 : f32
    %664 = vector.broadcast %cst_640 : f32 to vector<16x16xf32>
    %c7_641 = arith.constant 7 : index
    %c0_642 = arith.constant 0 : index
    %c0_643 = arith.constant 0 : index
    %665 = vector.load %arg8[%c7_641, %c0_642, %c0_643] : memref<10x4x18xbf16, #tpu.memory_space<vmem>>, vector<1x4x16xbf16>
    %666 = vector.shape_cast %665 : vector<1x4x16xbf16> to vector<4x16xbf16>
    %c0_644 = arith.constant 0 : index
    %c0_645 = arith.constant 0 : index
    %c0_646 = arith.constant 0 : index
    %667 = vector.load %arg3[%c0_644, %c0_645, %c0_646] : memref<9x16x4xbf16, #tpu.memory_space<vmem>>, vector<1x16x4xbf16>
    %668 = vector.shape_cast %667 : vector<1x16x4xbf16> to vector<16x4xbf16>
    %cst_647 = arith.constant dense<0.000000e+00> : vector<16x16xf32>
    %669 = tpu.matmul %668, %666, %cst_647 {dimension_numbers = #tpu.dot_dimension_numbers<[1], [0], [0], [1], [0, 0, 1, 1], [], []>} : vector<16x4xbf16>, vector<4x16xbf16>, vector<16x16xf32> -> vector<16x16xf32>
    %670 = arith.addf %664, %669 : vector<16x16xf32>
    %c7_648 = arith.constant 7 : index
    %c0_649 = arith.constant 0 : index
    %c1_650 = arith.constant 1 : index
    %671 = vector.load %arg8[%c7_648, %c0_649, %c1_650] : memref<10x4x18xbf16, #tpu.memory_space<vmem>>, vector<1x4x16xbf16>
    %672 = vector.shape_cast %671 : vector<1x4x16xbf16> to vector<4x16xbf16>
    %c1_651 = arith.constant 1 : index
    %c0_652 = arith.constant 0 : index
    %c0_653 = arith.constant 0 : index
    %673 = vector.load %arg3[%c1_651, %c0_652, %c0_653] : memref<9x16x4xbf16, #tpu.memory_space<vmem>>, vector<1x16x4xbf16>
    %674 = vector.shape_cast %673 : vector<1x16x4xbf16> to vector<16x4xbf16>
    %cst_654 = arith.constant dense<0.000000e+00> : vector<16x16xf32>
    %675 = tpu.matmul %674, %672, %cst_654 {dimension_numbers = #tpu.dot_dimension_numbers<[1], [0], [0], [1], [0, 0, 1, 1], [], []>} : vector<16x4xbf16>, vector<4x16xbf16>, vector<16x16xf32> -> vector<16x16xf32>
    %676 = arith.addf %670, %675 : vector<16x16xf32>
    %c7_655 = arith.constant 7 : index
    %c0_656 = arith.constant 0 : index
    %c2_657 = arith.constant 2 : index
    %677 = vector.load %arg8[%c7_655, %c0_656, %c2_657] : memref<10x4x18xbf16, #tpu.memory_space<vmem>>, vector<1x4x16xbf16>
    %678 = vector.shape_cast %677 : vector<1x4x16xbf16> to vector<4x16xbf16>
    %c2_658 = arith.constant 2 : index
    %c0_659 = arith.constant 0 : index
    %c0_660 = arith.constant 0 : index
    %679 = vector.load %arg3[%c2_658, %c0_659, %c0_660] : memref<9x16x4xbf16, #tpu.memory_space<vmem>>, vector<1x16x4xbf16>
    %680 = vector.shape_cast %679 : vector<1x16x4xbf16> to vector<16x4xbf16>
    %cst_661 = arith.constant dense<0.000000e+00> : vector<16x16xf32>
    %681 = tpu.matmul %680, %678, %cst_661 {dimension_numbers = #tpu.dot_dimension_numbers<[1], [0], [0], [1], [0, 0, 1, 1], [], []>} : vector<16x4xbf16>, vector<4x16xbf16>, vector<16x16xf32> -> vector<16x16xf32>
    %682 = arith.addf %676, %681 : vector<16x16xf32>
    %c8_662 = arith.constant 8 : index
    %c0_663 = arith.constant 0 : index
    %c0_664 = arith.constant 0 : index
    %683 = vector.load %arg8[%c8_662, %c0_663, %c0_664] : memref<10x4x18xbf16, #tpu.memory_space<vmem>>, vector<1x4x16xbf16>
    %684 = vector.shape_cast %683 : vector<1x4x16xbf16> to vector<4x16xbf16>
    %c3_665 = arith.constant 3 : index
    %c0_666 = arith.constant 0 : index
    %c0_667 = arith.constant 0 : index
    %685 = vector.load %arg3[%c3_665, %c0_666, %c0_667] : memref<9x16x4xbf16, #tpu.memory_space<vmem>>, vector<1x16x4xbf16>
    %686 = vector.shape_cast %685 : vector<1x16x4xbf16> to vector<16x4xbf16>
    %cst_668 = arith.constant dense<0.000000e+00> : vector<16x16xf32>
    %687 = tpu.matmul %686, %684, %cst_668 {dimension_numbers = #tpu.dot_dimension_numbers<[1], [0], [0], [1], [0, 0, 1, 1], [], []>} : vector<16x4xbf16>, vector<4x16xbf16>, vector<16x16xf32> -> vector<16x16xf32>
    %688 = arith.addf %682, %687 : vector<16x16xf32>
    %c8_669 = arith.constant 8 : index
    %c0_670 = arith.constant 0 : index
    %c1_671 = arith.constant 1 : index
    %689 = vector.load %arg8[%c8_669, %c0_670, %c1_671] : memref<10x4x18xbf16, #tpu.memory_space<vmem>>, vector<1x4x16xbf16>
    %690 = vector.shape_cast %689 : vector<1x4x16xbf16> to vector<4x16xbf16>
    %c4_672 = arith.constant 4 : index
    %c0_673 = arith.constant 0 : index
    %c0_674 = arith.constant 0 : index
    %691 = vector.load %arg3[%c4_672, %c0_673, %c0_674] : memref<9x16x4xbf16, #tpu.memory_space<vmem>>, vector<1x16x4xbf16>
    %692 = vector.shape_cast %691 : vector<1x16x4xbf16> to vector<16x4xbf16>
    %cst_675 = arith.constant dense<0.000000e+00> : vector<16x16xf32>
    %693 = tpu.matmul %692, %690, %cst_675 {dimension_numbers = #tpu.dot_dimension_numbers<[1], [0], [0], [1], [0, 0, 1, 1], [], []>} : vector<16x4xbf16>, vector<4x16xbf16>, vector<16x16xf32> -> vector<16x16xf32>
    %694 = arith.addf %688, %693 : vector<16x16xf32>
    %c8_676 = arith.constant 8 : index
    %c0_677 = arith.constant 0 : index
    %c2_678 = arith.constant 2 : index
    %695 = vector.load %arg8[%c8_676, %c0_677, %c2_678] : memref<10x4x18xbf16, #tpu.memory_space<vmem>>, vector<1x4x16xbf16>
    %696 = vector.shape_cast %695 : vector<1x4x16xbf16> to vector<4x16xbf16>
    %c5_679 = arith.constant 5 : index
    %c0_680 = arith.constant 0 : index
    %c0_681 = arith.constant 0 : index
    %697 = vector.load %arg3[%c5_679, %c0_680, %c0_681] : memref<9x16x4xbf16, #tpu.memory_space<vmem>>, vector<1x16x4xbf16>
    %698 = vector.shape_cast %697 : vector<1x16x4xbf16> to vector<16x4xbf16>
    %cst_682 = arith.constant dense<0.000000e+00> : vector<16x16xf32>
    %699 = tpu.matmul %698, %696, %cst_682 {dimension_numbers = #tpu.dot_dimension_numbers<[1], [0], [0], [1], [0, 0, 1, 1], [], []>} : vector<16x4xbf16>, vector<4x16xbf16>, vector<16x16xf32> -> vector<16x16xf32>
    %700 = arith.addf %694, %699 : vector<16x16xf32>
    %c9_683 = arith.constant 9 : index
    %c0_684 = arith.constant 0 : index
    %c0_685 = arith.constant 0 : index
    %701 = vector.load %arg8[%c9_683, %c0_684, %c0_685] : memref<10x4x18xbf16, #tpu.memory_space<vmem>>, vector<1x4x16xbf16>
    %702 = vector.shape_cast %701 : vector<1x4x16xbf16> to vector<4x16xbf16>
    %c6_686 = arith.constant 6 : index
    %c0_687 = arith.constant 0 : index
    %c0_688 = arith.constant 0 : index
    %703 = vector.load %arg3[%c6_686, %c0_687, %c0_688] : memref<9x16x4xbf16, #tpu.memory_space<vmem>>, vector<1x16x4xbf16>
    %704 = vector.shape_cast %703 : vector<1x16x4xbf16> to vector<16x4xbf16>
    %cst_689 = arith.constant dense<0.000000e+00> : vector<16x16xf32>
    %705 = tpu.matmul %704, %702, %cst_689 {dimension_numbers = #tpu.dot_dimension_numbers<[1], [0], [0], [1], [0, 0, 1, 1], [], []>} : vector<16x4xbf16>, vector<4x16xbf16>, vector<16x16xf32> -> vector<16x16xf32>
    %706 = arith.addf %700, %705 : vector<16x16xf32>
    %c9_690 = arith.constant 9 : index
    %c0_691 = arith.constant 0 : index
    %c1_692 = arith.constant 1 : index
    %707 = vector.load %arg8[%c9_690, %c0_691, %c1_692] : memref<10x4x18xbf16, #tpu.memory_space<vmem>>, vector<1x4x16xbf16>
    %708 = vector.shape_cast %707 : vector<1x4x16xbf16> to vector<4x16xbf16>
    %c7_693 = arith.constant 7 : index
    %c0_694 = arith.constant 0 : index
    %c0_695 = arith.constant 0 : index
    %709 = vector.load %arg3[%c7_693, %c0_694, %c0_695] : memref<9x16x4xbf16, #tpu.memory_space<vmem>>, vector<1x16x4xbf16>
    %710 = vector.shape_cast %709 : vector<1x16x4xbf16> to vector<16x4xbf16>
    %cst_696 = arith.constant dense<0.000000e+00> : vector<16x16xf32>
    %711 = tpu.matmul %710, %708, %cst_696 {dimension_numbers = #tpu.dot_dimension_numbers<[1], [0], [0], [1], [0, 0, 1, 1], [], []>} : vector<16x4xbf16>, vector<4x16xbf16>, vector<16x16xf32> -> vector<16x16xf32>
    %712 = arith.addf %706, %711 : vector<16x16xf32>
    %c9_697 = arith.constant 9 : index
    %c0_698 = arith.constant 0 : index
    %c2_699 = arith.constant 2 : index
    %713 = vector.load %arg8[%c9_697, %c0_698, %c2_699] : memref<10x4x18xbf16, #tpu.memory_space<vmem>>, vector<1x4x16xbf16>
    %714 = vector.shape_cast %713 : vector<1x4x16xbf16> to vector<4x16xbf16>
    %c8_700 = arith.constant 8 : index
    %c0_701 = arith.constant 0 : index
    %c0_702 = arith.constant 0 : index
    %715 = vector.load %arg3[%c8_700, %c0_701, %c0_702] : memref<9x16x4xbf16, #tpu.memory_space<vmem>>, vector<1x16x4xbf16>
    %716 = vector.shape_cast %715 : vector<1x16x4xbf16> to vector<16x4xbf16>
    %cst_703 = arith.constant dense<0.000000e+00> : vector<16x16xf32>
    %717 = tpu.matmul %716, %714, %cst_703 {dimension_numbers = #tpu.dot_dimension_numbers<[1], [0], [0], [1], [0, 0, 1, 1], [], []>} : vector<16x4xbf16>, vector<4x16xbf16>, vector<16x16xf32> -> vector<16x16xf32>
    %718 = arith.addf %712, %717 : vector<16x16xf32>
    %c0_704 = arith.constant 0 : index
    %c0_705 = arith.constant 0 : index
    %719 = vector.load %arg4[%c0_704, %c0_705] : memref<16x1xf32, #tpu.memory_space<vmem>>, vector<16x1xf32>
    %720 = vector.broadcast %719 : vector<16x1xf32> to vector<16x16xf32>
    %721 = arith.addf %718, %720 : vector<16x16xf32>
    %cst_706 = arith.constant 0.000000e+00 : f32
    %722 = vector.broadcast %cst_706 : f32 to vector<16x16xf32>
    %723 = arith.cmpf ogt, %721, %722 : vector<16x16xf32>
    %724 = vector.broadcast %5 : f32 to vector<16x16xf32>
    %725 = arith.mulf %724, %721 : vector<16x16xf32>
    %726 = arith.select %723, %721, %725 : vector<16x16xi1>, vector<16x16xf32>
    %727 = arith.truncf %726 : vector<16x16xf32> to vector<16x16xbf16>
    %cst_707 = arith.constant 0.000000e+00 : f32
    %728 = vector.broadcast %cst_707 : f32 to vector<4x32xf32>
    %729 = vector.extract_strided_slice %727 {offsets = [0, 0], sizes = [4, 16], strides = [1, 1]} : vector<16x16xbf16> to vector<4x16xbf16>
    %c0_708 = arith.constant 0 : index
    %c0_709 = arith.constant 0 : index
    %c0_710 = arith.constant 0 : index
    %730 = vector.load %arg5[%c0_708, %c0_709, %c0_710] : memref<2x16x32xbf16, #tpu.memory_space<vmem>>, vector<1x16x32xbf16>
    %731 = vector.shape_cast %730 : vector<1x16x32xbf16> to vector<16x32xbf16>
    %cst_711 = arith.constant dense<0.000000e+00> : vector<4x32xf32>
    %732 = tpu.matmul %729, %731, %cst_711 {dimension_numbers = #tpu.dot_dimension_numbers<[1], [0], [0], [1], [0, 0, 1, 1], [], []>} : vector<4x16xbf16>, vector<16x32xbf16>, vector<4x32xf32> -> vector<4x32xf32>
    %733 = arith.addf %728, %732 : vector<4x32xf32>
    %734 = vector.extract_strided_slice %727 {offsets = [4, 0], sizes = [4, 16], strides = [1, 1]} : vector<16x16xbf16> to vector<4x16xbf16>
    %c1_712 = arith.constant 1 : index
    %c0_713 = arith.constant 0 : index
    %c0_714 = arith.constant 0 : index
    %735 = vector.load %arg5[%c1_712, %c0_713, %c0_714] : memref<2x16x32xbf16, #tpu.memory_space<vmem>>, vector<1x16x32xbf16>
    %736 = vector.shape_cast %735 : vector<1x16x32xbf16> to vector<16x32xbf16>
    %cst_715 = arith.constant dense<0.000000e+00> : vector<4x32xf32>
    %737 = tpu.matmul %734, %736, %cst_715 {dimension_numbers = #tpu.dot_dimension_numbers<[1], [0], [0], [1], [0, 0, 1, 1], [], []>} : vector<4x16xbf16>, vector<16x32xbf16>, vector<4x32xf32> -> vector<4x32xf32>
    %738 = arith.addf %733, %737 : vector<4x32xf32>
    %739 = arith.truncf %738 : vector<4x32xf32> to vector<4x32xbf16>
    %c0_716 = arith.constant 0 : index
    %c0_717 = arith.constant 0 : index
    %c14 = arith.constant 14 : index
    %c0_718 = arith.constant 0 : index
    %740 = vector.load %arg7[%c0_716, %c0_717, %c14, %c0_718] : memref<1x4x16x32xbf16, #tpu.memory_space<vmem>>, vector<1x4x1x32xbf16>
    %741 = vector.shape_cast %740 : vector<1x4x1x32xbf16> to vector<4x32xbf16>
    %742 = vector.shape_cast %739 : vector<4x32xbf16> to vector<1x4x1x32xbf16>
    tpu.vector_store %arg7[%c0_716, %c0_717, %c14, %c0_718], %742 {strides = array<i32>} : memref<1x4x16x32xbf16, #tpu.memory_space<vmem>>, vector<1x4x1x32xbf16>,
    %cst_719 = arith.constant 0.000000e+00 : f32
    %743 = vector.broadcast %cst_719 : f32 to vector<4x32xf32>
    %744 = vector.extract_strided_slice %727 {offsets = [8, 0], sizes = [4, 16], strides = [1, 1]} : vector<16x16xbf16> to vector<4x16xbf16>
    %c0_720 = arith.constant 0 : index
    %c0_721 = arith.constant 0 : index
    %c0_722 = arith.constant 0 : index
    %745 = vector.load %arg5[%c0_720, %c0_721, %c0_722] : memref<2x16x32xbf16, #tpu.memory_space<vmem>>, vector<1x16x32xbf16>
    %746 = vector.shape_cast %745 : vector<1x16x32xbf16> to vector<16x32xbf16>
    %cst_723 = arith.constant dense<0.000000e+00> : vector<4x32xf32>
    %747 = tpu.matmul %744, %746, %cst_723 {dimension_numbers = #tpu.dot_dimension_numbers<[1], [0], [0], [1], [0, 0, 1, 1], [], []>} : vector<4x16xbf16>, vector<16x32xbf16>, vector<4x32xf32> -> vector<4x32xf32>
    %748 = arith.addf %743, %747 : vector<4x32xf32>
    %749 = vector.extract_strided_slice %727 {offsets = [12, 0], sizes = [4, 16], strides = [1, 1]} : vector<16x16xbf16> to vector<4x16xbf16>
    %c1_724 = arith.constant 1 : index
    %c0_725 = arith.constant 0 : index
    %c0_726 = arith.constant 0 : index
    %750 = vector.load %arg5[%c1_724, %c0_725, %c0_726] : memref<2x16x32xbf16, #tpu.memory_space<vmem>>, vector<1x16x32xbf16>
    %751 = vector.shape_cast %750 : vector<1x16x32xbf16> to vector<16x32xbf16>
    %cst_727 = arith.constant dense<0.000000e+00> : vector<4x32xf32>
    %752 = tpu.matmul %749, %751, %cst_727 {dimension_numbers = #tpu.dot_dimension_numbers<[1], [0], [0], [1], [0, 0, 1, 1], [], []>} : vector<4x16xbf16>, vector<16x32xbf16>, vector<4x32xf32> -> vector<4x32xf32>
    %753 = arith.addf %748, %752 : vector<4x32xf32>
    %754 = arith.truncf %753 : vector<4x32xf32> to vector<4x32xbf16>
    %c0_728 = arith.constant 0 : index
    %c0_729 = arith.constant 0 : index
    %c15 = arith.constant 15 : index
    %c0_730 = arith.constant 0 : index
    %755 = vector.load %arg7[%c0_728, %c0_729, %c15, %c0_730] : memref<1x4x16x32xbf16, #tpu.memory_space<vmem>>, vector<1x4x1x32xbf16>
    %756 = vector.shape_cast %755 : vector<1x4x1x32xbf16> to vector<4x32xbf16>
    %757 = vector.shape_cast %754 : vector<4x32xbf16> to vector<1x4x1x32xbf16>
    tpu.vector_store %arg7[%c0_728, %c0_729, %c15, %c0_730], %757 {strides = array<i32>} : memref<1x4x16x32xbf16, #tpu.memory_space<vmem>>, vector<1x4x1x32xbf16>,
    return
  }
  func.func @transform_1(%arg0: i32, %arg1: i32) -> (i32, i32, i32) {
    %c0_i32 = arith.constant 0 : i32
    %c0_i32_0 = arith.constant 0 : i32
    %c0_i32_1 = arith.constant 0 : i32
    %c0_i32_2 = arith.constant 0 : i32
    return %c0_i32, %c0_i32_0, %c0_i32_1 : i32, i32, i32
  }
  func.func @transform_2(%arg0: i32, %arg1: i32) -> (i32, i32) {
    %c0_i32 = arith.constant 0 : i32
    %c0_i32_0 = arith.constant 0 : i32
    %c0_i32_1 = arith.constant 0 : i32
    return %c0_i32, %c0_i32_0 : i32, i32
  }
  func.func @transform_3(%arg0: i32, %arg1: i32) -> (i32, i32, i32) {
    %c0_i32 = arith.constant 0 : i32
    %c0_i32_0 = arith.constant 0 : i32
    %c0_i32_1 = arith.constant 0 : i32
    %c0_i32_2 = arith.constant 0 : i32
    return %c0_i32, %c0_i32_0, %c0_i32_1 : i32, i32, i32
  }
  func.func @transform_4(%arg0: i32, %arg1: i32) -> i32 {
    %c0_i32 = arith.constant 0 : i32
    %c0_i32_0 = arith.constant 0 : i32
    return %c0_i32 : i32
  }
  func.func @transform_5(%arg0: i32, %arg1: i32) -> (i32, i32, i32, i32) {
    %c0_i32 = arith.constant 0 : i32
    %c0_i32_0 = arith.constant 0 : i32
    %c0_i32_1 = arith.constant 0 : i32
    return %arg0, %c0_i32, %arg1, %c0_i32_0 : i32, i32, i32, i32
  }
}

</mosaic_0001>

<bundles_post_ra>
// kernel: tpu_custom_call.1
= control target key start
LH: loop header
LB: loop body
LE: loop exit
PB: predicated region body
PF: predicated region fallthrough
CT: control target
= control target key end

     0   :  { %s6849_s0 = inlined_call_operand.vmem [shape: bf16[2,18,4,18], index: 0, kind: input, shape index: {}]   ;;  %s6850_s1 = inlined_call_operand.vmem [shape: bf16[9,16,4], index: 1, kind: input, shape index: {}]   ;;  %s6851_s2 = inlined_call_operand.vmem [shape: f32[16,1], index: 2, kind: input, shape index: {}]   ;;  %s6852_s3 = inlined_call_operand.vmem [shape: bf16[2,16,32], index: 3, kind: input, shape index: {}]   ;;  %s6853_s4 = inlined_call_operand.<no memory space> [shape: f32[1], index: 4, kind: input, shape index: {}]   ;;  %s6854_s5 = inlined_call_operand.hbm [shape: bf16[2,4,32,32], index: 5, kind: output, shape index: {}]  }
   0x1   :  { %10 = sst [smem:[#allocation4]] %s6853_s4 }
   0x2   :  { %11 = vsyncpa [#allocation6], 0 }
   0x3   :  { %13 = vsyncpa [#allocation6 + $0x1], 0  ;;  %s5617_s20 = smov 0   ;;  %s5619_s21 = smov 0  }
   0x4   :  { %s5621_s22 = smov 0   ;;  %s5623_s23 = smov 0  }
   0x5   :  { %s5625_s24 = smov 0   ;;  %s5627_s25 = smov 0  }
   0x6   :  { %s5629_s26 = smov 0   ;;  %s5631_s27 = smov 0  }
   0x7 LB: > { %s4581_s4 = sadd.s32 4294967295, %s5571_s27   ;;  %s4582_s28 = sadd.s32 4294967294, %s5571_s27   ;;  %s5571_s27 = sphi %s5631_s27, %s19_s27   ;;  %s5567_s26 = sphi %s5629_s26, %s6879_s26   ;;  %s5563_s25 = sphi %s5627_s25, %s6878_s25   ;;  %s5559_s24 = sphi %s5625_s24, %s6877_s24   ;;  %s5555_s23 = sphi %s5623_s23, %s6876_s23   ;;  %s5551_s22 = sphi %s5621_s22, %s6875_s22   ;;  %s5547_s21 = sphi %s5619_s21, %s6874_s21   ;;  %s5543_s20 = sphi %s5617_s20, %s6873_s20  }
   0x8   : > { %s28_s29 = sadd.s32 1, %s5563_s25  ;;  %s31_s30 = sadd.s32 1, %s5567_s26 }
   0x9   : > { %p29_p0 = scmp.ge.s32.totalorder %s28_s29, 2  ;;  %p134_p1 = scmp.ne.s32.totalorder %s5551_s22, %s5547_s21 }
   0xa   : > { %p135_p2 = scmp.eq.s32.totalorder %s4581_s4, 3  ;;  %p140_p5 = scmp.ne.s32.totalorder %s5547_s21, %s5543_s20 }
   0xb   : > { %s6881_s29 = smov (%p29_p0, %s28_s29), 0  ;;  %s6883_s30 = smov (!%p29_p0, %s31_s30), %s5567_s26 }
   0xc   : > { %s120_s6 = ssub.s32 %s5563_s25, %s6881_s29  ;;  %p5668_p3 = por %p135_p2, %p134_p1 }
   0xd   : > { %p33_p4 = scmp.ge.s32.totalorder %s6883_s30, 2  ;;  %p141_p6 = scmp.eq.s32.totalorder %s4582_s28, 3 }
   0xe   : > { %p4584_p7 = scmp.ge.s32.totalorder %s5571_s27, 1  ;;  %p171_p9 = scmp.lt.s32.totalorder %s5571_s27, 5 }
   0xf   : > { %s6885_s30 = smov (%p33_p4, %s6883_s30), 0  ;;  %p5677_p8 = por %p141_p6, %p140_p5 }
  0x10   : > { %s119_s9 = ssub.s32 %s5567_s26, %s6885_s30  ;;  %s124_s10 = sadd.s32 1, %s5551_s22 }
  0x11   : > { %s121_s11 = sor.u32 %s120_s6, %s119_s9  ;;  %p172_p10 = pnand %p4584_p7, %p171_p9 }
  0x12   : > { %p122_p11 = scmp.eq.s32.totalorder %s121_s11, 0  ;;  %s189_s13 = sand.u32 (!%p172_p10), 1, %s5547_s21  }
  0x13   : > { %175 = sbr.rel (%p172_p10) target bundleno = 1864 (0x748), region = 36  ;;  %s4586_s14 = sshll.u32 (!%p172_p10), %s5555_s23, 3 }
  0x14   : > { %s5686_s12 = scalar_select %p122_p11, %s5551_s22, %s124_s10  }
  0x15   : > { %s4585_s15 = sshll.u32 (!%p172_p10), %s189_s13, 5  ;;  %s195_s16 = smul.u32 (!%p172_p10), 18, %s5559_s24 }
  0x16   : > { %s5696_s6 = scalar_lea.vmem (!%p172_p10), [#allocation5], %s4585_s15 }
  0x17   : > { %s196_s17 = sadd.s32 (!%p172_p10), %s4586_s14, %s195_s16 }
  0x18   : > { %s4587_s18 = sshll.u32 %s196_s17, 1 }
  0x19   : > { %s198_s28 = scalar_lea.vmem %s6849_s0, %s4587_s18 }
  0x1a   : > { %v211_v0 = vld [vmem:[%s198_s28] sm:$0xff]  ;;  %v213_v1 = vld [vmem:[%s198_s28 + $0x8] sm:$0xff]  ;;  %v4588_v2 = vld [vmem:[%s198_s28 + $0x10] sm:$0xf] }
  0x1b   : > { %212 = vst [vmem:[#allocation2] sm:$0xff] %v211_v0 }
  0x1c   : > { %214 = vst [vmem:[#allocation2 + $0x8] sm:$0xff] %v213_v1 }
  0x1d   : > { %226 = vst [vmem:[#allocation2 + $0x10] sm:$0xf] %v4588_v2 }
  0x1e   : > { %230 = vsyncadd [#allocation3], 320 }
  0x1f   : > { %5535 = dma.done.wait [#allocation3], 320 }
  0x20   : > { %5536 = vsyncadd [#allocation3], 4294966976  ;;  %s5573_s9 = smov 127   ;;  %s5574_s10 = smov 126   ;;  %vm258_vm0 = vcmask 1041408   ;;  %vm254_vm1 = vcmask 31744  }
  0x21   : > { %v5308_v27 = vld [vmem:[%s6850_s1] sm:$0xff]  ;;  %v5575_v29 = vmov 0   ;;  %v5728_v30 = vld [vmem:[%s6851_s2 + $0x8] sm:$0xff]  ;;  %v5311_v33 = vld [vmem:[%s6850_s1 + $0x18] sm:$0xff]  ;;  %s236_s16 = sld [smem:[#allocation4]]  ;;  %vm583_vm3 = vcmask 130048  }
  0x22   : > { %v237_v3 = vld [vmem:[#allocation2] sm:$0x3]  ;;  %v338_v6 = vld [vmem:[#allocation2 + $0x2] sm:$0x3]  ;;  %v5701_v10 = vld [vmem:[#allocation2 + $0x4] sm:$0x3]  ;;  %5501 = vset.pattern.permute.xlu1 %v5575_v29  ;;  %5500 = vset.pattern.permute.xlu0 %v5575_v29 }
  0x23   : > { %249 = vst [vmem:[#allocation1] ss:$4 sm:$0xff] %v237_v3  ;;  %v300_v4 = vld [vmem:[#allocation2] sm:$0x3]  ;;  %v404_v8 = vld [vmem:[#allocation2 + $0x2] sm:$0x3]  ;;  %5502 = vset.pattern.permute.xlu2 %v5575_v29 }
  0x24   : > { %v508_v12 = vld [vmem:[#allocation2 + $0x4] sm:$0x3]  ;;  %v5706_v14 = vld [vmem:[#allocation2 + $0x2] sm:$0x3]  ;;  %v5715_v22 = vld [vmem:[#allocation2 + $0x6] sm:$0x3] }
  0x25   : > { %v841_v16 = vld [vmem:[#allocation2 + $0x2] sm:$0x3]  ;;  %v5711_v18 = vld [vmem:[#allocation2 + $0x4] sm:$0x3]  ;;  %v1042_v24 = vld [vmem:[#allocation2 + $0x6] sm:$0x3] }
  0x26   : > { %v941_v20 = vld [vmem:[#allocation2 + $0x4] sm:$0x3]  ;;  %v284_v26 = vsel %vm258_vm0, %v237_v3, 0  ;;  %v351_v32 = vsel %vm258_vm0, %v338_v6, 0  ;;  %v5743_v36 = vld [vmem:[%s6851_s2] sm:$0xff]  ;;  %v455_v50 = vsel %vm258_vm0, %v5701_v10, 0 }
  0x27   : > { %293 = vmatpush.bf16.msra.mxu1 %v284_v26  ;;  %v5722_v28 = vld [vmem:[#allocation2 + $0x4] sm:$0x3]  ;;  %360 = vmatpush.bf16.msra.mxu3 %v351_v32  ;;  %v5745_v37 = vld [vmem:[#allocation2 + $0x6] sm:$0x3]  ;;  %v5760_v47 = vld [vmem:[#allocation2 + $0x8] sm:$0x3] }
  0x28   : > { %v1369_v34 = vld [vmem:[#allocation2 + $0x4] sm:$0x3]  ;;  %v1469_v39 = vld [vmem:[#allocation2 + $0x6] sm:$0x3]  ;;  %v5310_v52 = vld [vmem:[%s6850_s1 + $0x10] sm:$0xff]  ;;  %vm625_vm5 = vcmask 1040384  }
  0x29   : > { %v5309_v44 = vld [vmem:[%s6850_s1 + $0x8] sm:$0xff]  ;;  %v1570_v53 = vld [vmem:[#allocation2 + $0x8] sm:$0x3]  ;;  %v5312_v58 = vld [vmem:[%s6850_s1 + $0x20] sm:$0xff]  ;;  %vm630_vm6 = vcmask 1041409   ;;  %vm662_vm7 = vcmask 253952  }
  0x2a   : > { %v250_v5 = vld.sshfl [vmem:[#allocation1] sm:$0xff pattern:$0x73625140]  ;;  %4600 = vmatmul.msk.bf16.vlgmr.msra.gmra.mxu1 %vm254_vm1, %v5308_v27  ;;  %4614 = vmatmul.msk.bf16.vlgmr.msra.gmra.mxu3 %vm254_vm1, %v5311_v33  ;;  %v5313_v46 = vld [vmem:[%s6850_s1 + $0x28] sm:$0xff]  ;;  %v5314_v62 = vld [vmem:[%s6850_s1 + $0x30] sm:$0xff]  ;;  %vm1190_vm14 = vcmask 254977  }
  0x2b   : > { %252 = vrot.lane.b32.xlu0 %v250_v5, %s5573_s9  ;;  %310 = vst [vmem:[#allocation1] ss:$4 sm:$0xff] %v300_v4  ;;  %v5782_v60 = vld [vmem:[#allocation2 + $0x6] sm:$0x3]  ;;  %v5315_v3 = vld [vmem:[%s6850_s1 + $0x38] sm:$0xff]  ;;  %v5316_v4 = vld [vmem:[%s6850_s1 + $0x40] sm:$0xff] }
  0x2c   : > { %v1897_v63 = vld [vmem:[#allocation2 + $0x6] sm:$0x3]  ;;  %v5800_v5 = vld [vmem:[#allocation2 + $0x8] sm:$0x3]  ;;  %v2626_v26 = vld [vmem:[#allocation2 + $0xc] sm:$0x3] }
  0x2d   : > { %v5832_v29 = vld [vmem:[#allocation2 + $0xa] sm:$0x3]  ;;  %vm663_vm8 = vsmask.f32 256  ;;  %vm767_vm10 = vsmask.f32 7938 }
  0x2e   : > { %v2948_v32 = vld [vmem:[#allocation2 + $0xa] sm:$0x3]  ;;  %vm5964_vm9 = vmand %vm662_vm7, %vm663_vm8  ;;  %vm1191_vm15 = vsmask.f32 1280  ;;  %s4458_s14 = scalar_lea.sflag [#allocation6], %s189_s13 }
  0x2f   : > { %vm5991_vm11 = vmand %vm662_vm7, %vm767_vm10 }
  0x32   : > { %v311_v7 = vld.sshfl [vmem:[#allocation1] sm:$0xff pattern:$0x73625140] }
  0x33   : > { %313 = vrot.lane.b32.xlu0 %v311_v7, %s5574_s10  ;;  %377 = vst [vmem:[#allocation1] ss:$4 sm:$0xff] %v338_v6  ;;  %v1997_v7 = vld [vmem:[#allocation2 + $0x8] sm:$0x3] }
  0x3a   : > { %v378_v9 = vld.sshfl [vmem:[#allocation1] sm:$0xff pattern:$0x73625140] }
  0x3b   : > { %380 = vrot.lane.b32.xlu1 %v378_v9, %s5573_s9  ;;  %414 = vst [vmem:[#allocation1] ss:$4 sm:$0xff] %v404_v8  ;;  %549 = vperm.xlu0 %5500, %v5743_v36   ;;  %v5808_v9 = vld [vmem:[#allocation2 + $0xa] sm:$0x3] }
  0x42   : > { %v415_v11 = vld.sshfl [vmem:[#allocation1] sm:$0xff pattern:$0x73625140] }
  0x43   : > { %481 = vst [vmem:[#allocation1] ss:$4 sm:$0xff] %v5701_v10  ;;  %417 = vrot.lane.b32.xlu2 %v415_v11, %s5574_s10  ;;  %v2098_v11 = vld [vmem:[#allocation2 + $0xa] sm:$0x3] }
  0x4a   : > { %v482_v13 = vld.sshfl [vmem:[#allocation1] sm:$0xff pattern:$0x73625140] }
  0x4b   : > { %484 = vrot.lane.b32.xlu1 %v482_v13, %s5573_s9  ;;  %518 = vst [vmem:[#allocation1] ss:$4 sm:$0xff] %v508_v12  ;;  %v5814_v13 = vld [vmem:[#allocation2 + $0x8] sm:$0x3] }
  0x52   : > { %v519_v15 = vld.sshfl [vmem:[#allocation1] sm:$0xff pattern:$0x73625140] }
  0x53   : > { %521 = vrot.lane.b32.xlu2 %v519_v15, %s5574_s10  ;;  %792 = vst [vmem:[#allocation1] ss:$4 sm:$0xff] %v5706_v14  ;;  %554 = vperm.xlu1 %5501, %v5728_v30  }
  0x5a   : > { %v793_v17 = vld.sshfl [vmem:[#allocation1] sm:$0xff pattern:$0x73625140] }
  0x5b   : > { %850 = vst [vmem:[#allocation1] ss:$4 sm:$0xff] %v841_v16  ;;  %795 = vrot.lane.b32.xlu2 %v793_v17, %s5573_s9  ;;  %v2425_v16 = vld [vmem:[#allocation2 + $0x8] sm:$0x3] }
  0x62   : > { %v851_v19 = vld.sshfl [vmem:[#allocation1] sm:$0xff pattern:$0x73625140] }
  0x63   : > { %914 = vst [vmem:[#allocation1] ss:$4 sm:$0xff] %v5711_v18  ;;  %853 = vrot.lane.b32.xlu1 %v851_v19, %s5574_s10  ;;  %v5820_v19 = vld [vmem:[#allocation2 + $0xa] sm:$0x3] }
  0x6a   : > { %v915_v21 = vld.sshfl [vmem:[#allocation1] sm:$0xff pattern:$0x73625140] }
  0x6b   : > { %950 = vst [vmem:[#allocation1] ss:$4 sm:$0xff] %v941_v20  ;;  %917 = vrot.lane.b32.xlu2 %v915_v21, %s5573_s9  ;;  %v2525_v21 = vld [vmem:[#allocation2 + $0xa] sm:$0x3] }
  0x72   : > { %v951_v23 = vld.sshfl [vmem:[#allocation1] sm:$0xff pattern:$0x73625140] }
  0x73   : > { %1015 = vst [vmem:[#allocation1] ss:$4 sm:$0xff] %v5715_v22  ;;  %953 = vrot.lane.b32.xlu0 %v951_v23, %s5574_s10 }
  0x7a   : > { %v1016_v25 = vld.sshfl [vmem:[#allocation1] sm:$0xff pattern:$0x73625140] }
  0x7b   : > { %1051 = vst [vmem:[#allocation1] ss:$4 sm:$0xff] %v1042_v24  ;;  %1018 = vrot.lane.b32.xlu1 %v1016_v25, %s5573_s9  ;;  %1082 = vperm.xlu0 %5500, %v5743_v36   ;;  %v5826_v24 = vld [vmem:[#allocation2 + $0xc] sm:$0x3] }
  0x82   : > { %v1052_v31 = vld.sshfl [vmem:[#allocation1] sm:$0xff pattern:$0x73625140] }
  0x83   : > { %1320 = vst [vmem:[#allocation1] ss:$4 sm:$0xff] %v5722_v28  ;;  %1054 = vrot.lane.b32.xlu2 %v1052_v31, %s5574_s10  ;;  %1087 = vperm.xlu1 %5501, %v5728_v30  }
  0x8a   : > { %v1321_v35 = vld.sshfl [vmem:[#allocation1] sm:$0xff pattern:$0x73625140] }
  0x8b   : > { %1378 = vst [vmem:[#allocation1] ss:$4 sm:$0xff] %v1369_v34  ;;  %1323 = vrot.lane.b32.xlu2 %v1321_v35, %s5573_s9  ;;  %v5840_v35 = vld [vmem:[#allocation2 + $0xc] sm:$0x3] }
  0x92   : > { %v1379_v38 = vld.sshfl [vmem:[#allocation1] sm:$0xff pattern:$0x73625140] }
  0x93   : > { %1442 = vst [vmem:[#allocation1] ss:$4 sm:$0xff] %v5745_v37  ;;  %1381 = vrot.lane.b32.xlu1 %v1379_v38, %s5574_s10 }
  0x9a   : > { %v1443_v40 = vld.sshfl [vmem:[#allocation1] sm:$0xff pattern:$0x73625140] }
  0x9b   : > { %1478 = vst [vmem:[#allocation1] ss:$4 sm:$0xff] %v1469_v39  ;;  %1445 = vrot.lane.b32.xlu0 %v1443_v40, %s5573_s9  ;;  %v3048_v40 = vld [vmem:[#allocation2 + $0xc] sm:$0x3] }
  0x9d   : > { %v253_v41 = vpop.permute.xlu0 %252  ;;  %v418_v42 = vpop.permute.xlu2 %417 }
  0x9e   : > { %v260_v43 = vsel %vm258_vm0, %v253_v41, 0  ;;  %v423_v45 = vsel %vm258_vm0, %v418_v42, 0 }
  0x9f   : > { %269 = vmatpush.bf16.msra.mxu0 %v260_v43  ;;  %432 = vmatpush.bf16.msrb.mxu1 %v423_v45  ;;  %v5317_v43 = vld [vmem:[%s6852_s3] sm:$0xff] }
  0xa2   : > { %4595 = vmatmul.msk.bf16.vlgmr.msra.gmra.mxu0 %vm254_vm1, %v5309_v44  ;;  %4628 = vmatmul.msk.bf16.vlgmr.msrb.gmra.mxu1 %vm254_vm1, %v5313_v46  ;;  %v1479_v48 = vld.sshfl [vmem:[#allocation1] sm:$0xff pattern:$0x73625140]  ;;  %v5850_v46 = vld [vmem:[#allocation2 + $0xe] sm:$0x3] }
  0xa3   : > { %1543 = vst [vmem:[#allocation1] ss:$4 sm:$0xff] %v5760_v47  ;;  %1481 = vrot.lane.b32.xlu2 %v1479_v48, %s5574_s10 }
  0xa5   : > { %v314_v49 = vpop.permute.xlu0 %313 }
  0xa6   : > { %v319_v51 = vsel %vm258_vm0, %v314_v49, 0 }
  0xa7   : > { %328 = vmatpush.bf16.msra.mxu2 %v319_v51  ;;  %v295_v42 = vpop.f32.mrf.mxu1 }
  0xaa   : > { %4607 = vmatmul.msk.bf16.vlgmr.msra.gmra.mxu2 %vm254_vm1, %v5310_v52  ;;  %v1544_v54 = vld.sshfl [vmem:[#allocation1] sm:$0xff pattern:$0x73625140] }
  0xab   : > { %464 = vmatpush.bf16.msrb.mxu2 %v455_v50  ;;  %1546 = vrot.lane.b32.xlu1 %v1544_v54, %s5573_s9  ;;  %1579 = vst [vmem:[#allocation1] ss:$4 sm:$0xff] %v1570_v53  ;;  %v5318_v50 = vld [vmem:[%s6852_s3 + $0x8] sm:$0xff]  ;;  %v5319_v53 = vld [vmem:[%s6852_s3] sm:$0xff] }
  0xac   : > { %594 = vmatpush.bf16.msra.mxu1 %v5318_v50  ;;  %v889_v50 = vsel %vm258_vm0, %v5711_v18, 0 }
  0xad   : > { %v381_v55 = vpop.permute.xlu1 %380  ;;  %v522_v56 = vpop.permute.xlu2 %521 }
  0xae   : > { %v386_v57 = vsel %vm258_vm0, %v381_v55, 0  ;;  %v527_v59 = vsel %vm258_vm0, %v522_v56, 0  ;;  %v362_v51 = vpop.f32.mrf.mxu3 }
  0xaf   : > { %395 = vmatpush.bf16.msrb.mxu0 %v386_v57  ;;  %616 = vmatpush.bf16.msra.mxu2 %v5317_v43  ;;  %v297_v54 = vpop.f32.mrf.mxu1  ;;  %v3149_v57 = vld [vmem:[#allocation2 + $0xe] sm:$0x3] }
  0xb2   : > { %4621 = vmatmul.msk.bf16.vlgmr.msrb.gmra.mxu0 %vm254_vm1, %v5312_v58  ;;  %v1580_v61 = vld.sshfl [vmem:[#allocation1] sm:$0xff pattern:$0x73625140] }
  0xb3   : > { %536 = vmatpush.bf16.msra.mxu0 %v527_v59  ;;  %1848 = vst [vmem:[#allocation1] ss:$4 sm:$0xff] %v5782_v60  ;;  %1582 = vrot.lane.b32.xlu0 %v1580_v61, %s5574_s10 }
  0xb7   : > { %723 = vmatpush.bf16.msrb.mxu0 %v5319_v53 }
  0xba   : > { %4635 = vmatmul.msk.bf16.vlgmr.msrb.gmra.mxu2 %vm254_vm1, %v5314_v62  ;;  %v1849_v0 = vld.sshfl [vmem:[#allocation1] sm:$0xff pattern:$0x73625140] }
  0xbb   : > { %1851 = vrot.lane.b32.xlu1 %v1849_v0, %s5573_s9  ;;  %1906 = vst [vmem:[#allocation1] ss:$4 sm:$0xff] %v1897_v63  ;;  %1615 = vperm.xlu0 %5500, %v5728_v30   ;;  %v5320_v63 = vld [vmem:[%s6852_s3 + $0x8] sm:$0xff] }
  0xbd   : > { %v485_v1 = vpop.permute.xlu1 %484 }
  0xbe   : > { %v490_v2 = vsel %vm258_vm0, %v485_v1, 0 }
  0xbf   : > { %499 = vmatpush.bf16.msrb.mxu3 %v490_v2 }
  0xc2   : > { %4642 = vmatmul.msk.bf16.vlgmr.msrb.gmra.mxu3 %vm254_vm1, %v5315_v3  ;;  %4649 = vmatmul.msk.bf16.vlgmr.msra.gmra.mxu0 %vm254_vm1, %v5316_v4  ;;  %v1907_v6 = vld.sshfl [vmem:[#allocation1] sm:$0xff pattern:$0x73625140]  ;;  %v364_v3 = vpop.f32.mrf.mxu3  ;;  %v825_v4 = vsel %vm258_vm0, %v5706_v14, 0 }
  0xc3   : > { %1970 = vst [vmem:[#allocation1] ss:$4 sm:$0xff] %v5800_v5  ;;  %1909 = vrot.lane.b32.xlu0 %v1907_v6, %s5574_s10  ;;  %701 = vmatpush.bf16.msra.mxu3 %v5320_v63 }
  0xc4   : > { %834 = vmatpush.bf16.msrb.mxu2 %v825_v4  ;;  %898 = vmatpush.bf16.msra.mxu0 %v889_v50 }
  0xc5   : > { %v5848_v45 = vpop.permute.xlu1 %554 }
  0xca   : > { %v5806_v8 = vld.sshfl [vmem:[#allocation1] sm:$0xff pattern:$0x73625140] }
  0xcb   : > { %2006 = vst [vmem:[#allocation1] ss:$4 sm:$0xff] %v1997_v7 }
  0xd2   : > { %v5810_v10 = vld.sshfl [vmem:[#allocation1] sm:$0xff pattern:$0x73625140] }
  0xd3   : > { %2071 = vst [vmem:[#allocation1] ss:$4 sm:$0xff] %v5808_v9 }
  0xd5   : > { %v854_v58 = vpop.permute.xlu1 %853 }
  0xd6   : > { %v859_v59 = vsel %vm258_vm0, %v854_v58, 0 }
  0xd7   : > { %868 = vmatpush.bf16.msrb.mxu3 %v859_v59 }
  0xda   : > { %v2072_v12 = vld.sshfl [vmem:[#allocation1] sm:$0xff pattern:$0x73625140] }
  0xdb   : > { %2074 = vrot.lane.b32.xlu1 %v2072_v12, %s5573_s9  ;;  %2107 = vst [vmem:[#allocation1] ss:$4 sm:$0xff] %v2098_v11  ;;  %v5868_v12 = vld [vmem:[#allocation2 + $0xc] sm:$0x3] }
  0xe2   : > { %v2108_v15 = vld.sshfl [vmem:[#allocation1] sm:$0xff pattern:$0x73625140] }
  0xe3   : > { %2138 = vperm.xlu1 %5501, %v5743_v36   ;;  %2110 = vrot.lane.b32.xlu0 %v2108_v15, %s5574_s10  ;;  %2376 = vst [vmem:[#allocation1] ss:$4 sm:$0xff] %v5814_v13 }
  0xea   : > { %v2377_v17 = vld.sshfl [vmem:[#allocation1] sm:$0xff pattern:$0x73625140] }
  0xeb   : > { %2434 = vst [vmem:[#allocation1] ss:$4 sm:$0xff] %v2425_v16  ;;  %2379 = vrot.lane.b32.xlu0 %v2377_v17, %s5573_s9 }
  0xf2   : > { %v2435_v20 = vld.sshfl [vmem:[#allocation1] sm:$0xff pattern:$0x73625140] }
  0xf3   : > { %2437 = vrot.lane.b32.xlu1 %v2435_v20, %s5574_s10  ;;  %2498 = vst [vmem:[#allocation1] ss:$4 sm:$0xff] %v5820_v19  ;;  %v796_v20 = vpop.permute.xlu2 %795 }
  0xf4   : > { %v801_v14 = vsel %vm258_vm0, %v796_v20, 0 }
  0xf5   : > { %810 = vmatpush.bf16.msrb.mxu1 %v801_v14 }
  0xfa   : > { %v5824_v23 = vld.sshfl [vmem:[#allocation1] sm:$0xff pattern:$0x73625140] }
  0xfb   : > { %2534 = vst [vmem:[#allocation1] ss:$4 sm:$0xff] %v2525_v21  ;;  %v550_v21 = vpop.permute.xlu0 %549 }
 0x102   : > { %v2535_v25 = vld.sshfl [vmem:[#allocation1] sm:$0xff pattern:$0x73625140] }
 0x103   : > { %2537 = vrot.lane.b32.xlu1 %v2535_v25, %s5574_s10  ;;  %2599 = vst [vmem:[#allocation1] ss:$4 sm:$0xff] %v5826_v24 }
 0x10a   : > { %v2600_v27 = vld.sshfl [vmem:[#allocation1] sm:$0xff pattern:$0x73625140] }
 0x10b   : > { %2671 = vperm.xlu1 %5501, %v5728_v30   ;;  %2602 = vrot.lane.b32.xlu0 %v2600_v27, %s5573_s9  ;;  %2635 = vst [vmem:[#allocation1] ss:$4 sm:$0xff] %v2626_v26 }
 0x112   : > { %v5834_v31 = vld.sshfl [vmem:[#allocation1] sm:$0xff pattern:$0x73625140] }
 0x113   : > { %2899 = vst [vmem:[#allocation1] ss:$4 sm:$0xff] %v5832_v29  ;;  %2666 = vperm.xlu0 %5500, %v5743_v36  }
 0x11a   : > { %v5838_v33 = vld.sshfl [vmem:[#allocation1] sm:$0xff pattern:$0x73625140] }
 0x11b   : > { %2957 = vst [vmem:[#allocation1] ss:$4 sm:$0xff] %v2948_v32 }
 0x11f   : > { %v271_v34 = vpop.f32.mrf.mxu0  ;;  %v434_v2 = vpop.f32.mrf.mxu1 }
 0x120   : > { %v296_v52 = vadd.f32 %v295_v42, %v271_v34  ;;  %v5874_v42 = vstv %s236_s16 }
 0x122   : > { %v2958_v38 = vld.sshfl [vmem:[#allocation1] sm:$0xff pattern:$0x73625140] }
 0x123   : > { %2960 = vrot.lane.b32.xlu0 %v2958_v38, %s5574_s10  ;;  %3021 = vst [vmem:[#allocation1] ss:$4 sm:$0xff] %v5840_v35 }
 0x127   : > { %v273_v39 = vpop.f32.mrf.mxu0  ;;  %v436_v38 = vpop.f32.mrf.mxu1 }
 0x128   : > { %v298_v1 = vadd.f32 %v297_v54, %v273_v39  ;;  %v954_v54 = vpop.permute.xlu0 %953 }
 0x12a   : > { %v3022_v41 = vld.sshfl [vmem:[#allocation1] sm:$0xff pattern:$0x73625140] }
 0x12b   : > { %3057 = vst [vmem:[#allocation1] ss:$4 sm:$0xff] %v3048_v40  ;;  %3024 = vrot.lane.b32.xlu1 %v3022_v41, %s5573_s9  ;;  %v3471_v40 = vld [vmem:[#allocation2 + $0xc] sm:$0x3] }
 0x12d   : > { %v330_v44 = vpop.f32.mrf.mxu2 }
 0x12e   : > { %v335_v56 = vadd.f32 %v330_v44, %v296_v52 }
 0x12f   : > { %v397_v48 = vpop.f32.mrf.mxu0 }
 0x130   : > { %v367_v61 = vadd.f32 %v362_v51, %v335_v56 }
 0x132   : > { %v5852_v49 = vld.sshfl [vmem:[#allocation1] sm:$0xff pattern:$0x73625140]  ;;  %v402_v6 = vadd.f32 %v397_v48, %v367_v61 }
 0x133   : > { %3122 = vst [vmem:[#allocation1] ss:$4 sm:$0xff] %v5850_v46 }
 0x134   : > { %v439_v15 = vadd.f32 %v434_v2, %v402_v6 }
 0x135   : > { %v332_v55 = vpop.f32.mrf.mxu2 }
 0x136   : > { %v336_v7 = vadd.f32 %v332_v55, %v298_v1  ;;  %v918_v1 = vpop.permute.xlu2 %917 }
 0x137   : > { %v399_v0 = vpop.f32.mrf.mxu0  ;;  %v923_v6 = vsel %vm258_vm0, %v918_v1, 0 }
 0x138   : > { %v368_v16 = vadd.f32 %v364_v3, %v336_v7  ;;  %v1019_v7 = vpop.permute.xlu1 %1018 }
 0x13a   : > { %v3123_v62 = vld.sshfl [vmem:[#allocation1] sm:$0xff pattern:$0x73625140]  ;;  %v403_v32 = vadd.f32 %v399_v0, %v368_v16 }
 0x13b   : > { %3125 = vrot.lane.b32.xlu0 %v3123_v62, %s5573_s9  ;;  %3158 = vst [vmem:[#allocation1] ss:$4 sm:$0xff] %v3149_v57  ;;  %v959_v57 = vsel %vm258_vm0, %v954_v54, 0  ;;  %v5881_v62 = vld [vmem:[#allocation2 + $0xe] sm:$0x3] }
 0x13c   : > { %v440_v43 = vadd.f32 %v436_v38, %v403_v32  ;;  %v5322_v38 = vld [vmem:[%s6850_s1 + $0x8] sm:$0xff] }
 0x13d   : > { %v466_v11 = vpop.f32.mrf.mxu2 }
 0x13e   : > { %v471_v25 = vadd.f32 %v466_v11, %v439_v15  ;;  %v1024_v15 = vsel %vm258_vm0, %v1019_v7, 0 }
 0x13f   : > { %v538_v27 = vpop.f32.mrf.mxu0 }
 0x142   : > { %v3159_v17 = vld.sshfl [vmem:[#allocation1] sm:$0xff pattern:$0x73625140] }
 0x143   : > { %3194 = vperm.xlu0 %5500, %v5728_v30   ;;  %3161 = vrot.lane.b32.xlu1 %v3159_v17, %s5574_s10  ;;  %3422 = vst [vmem:[#allocation1] ss:$4 sm:$0xff] %v5868_v12 }
 0x145   : > { %v501_v26 = vpop.f32.mrf.mxu3  ;;  %v468_v41 = vpop.f32.mrf.mxu2 }
 0x146   : > { %v506_v34 = vadd.f32 %v501_v26, %v471_v25  ;;  %v472_v51 = vadd.f32 %v468_v41, %v440_v43  ;;  %v5321_v25 = vld [vmem:[%s6850_s1] sm:$0xff]  ;;  %v990_v26 = vsel %vm258_vm0, %v5715_v22, 0  ;;  %v5324_v22 = vld [vmem:[%s6850_s1 + $0x18] sm:$0xff]  ;;  %v5323_v43 = vld [vmem:[%s6850_s1 + $0x10] sm:$0xff] }
 0x147   : > { %v540_v59 = vpop.f32.mrf.mxu0 }
 0x148   : > { %v543_v39 = vadd.f32 %v538_v27, %v506_v34  ;;  %v5900_v27 = vld [vmem:[#allocation2 + $0x10] sm:$0x3]  ;;  %v1055_v34 = vpop.permute.xlu2 %1054 }
 0x14a   : > { %v557_v44 = vadd.f32 %v550_v21, %v543_v39  ;;  %v3423_v48 = vld.sshfl [vmem:[#allocation1] sm:$0xff pattern:$0x73625140]  ;;  %v1060_v39 = vsel %vm258_vm0, %v1055_v34, 0 }
 0x14b   : > { %3425 = vrot.lane.b32.xlu1 %v3423_v48, %s5573_s9  ;;  %3480 = vst [vmem:[#allocation1] ss:$4 sm:$0xff] %v3471_v40  ;;  %v3672_v40 = vld [vmem:[#allocation2 + $0x10] sm:$0x3]  ;;  %v5923_v48 = vld [vmem:[#allocation2 + $0xe] sm:$0x3] }
 0x14c   : > { %vm559_vm2 = vcmp.gt.f32.partialorder %v557_v44, 0.0  ;;  %v562_v52 = vmul.f32 %v5874_v42, %v557_v44 }
 0x14d   : > { %v503_v53 = vpop.f32.mrf.mxu3 }
 0x14e   : > { %v564_v55 = vsel %vm559_vm2, %v557_v44, %v562_v52  ;;  %v507_v56 = vadd.f32 %v503_v53, %v472_v51  ;;  %v5326_v44 = vld [vmem:[%s6850_s1 + $0x28] sm:$0xff]  ;;  %v5325_v51 = vld [vmem:[%s6850_s1 + $0x20] sm:$0xff]  ;;  %v5328_v52 = vld [vmem:[%s6850_s1 + $0x38] sm:$0xff] }
 0x14f   : > { %v566_v58 = vpack.c.bf16 %v564_v55, %v564_v55  ;;  %v3994_v53 = vld [vmem:[#allocation2 + $0xe] sm:$0x3]  ;;  %vm6115_vm2 = vmand %vm1190_vm14, %vm1191_vm15  ;;  %vm1823_vm15 = vsmask.f32 7946 }
 0x150   : > { %v544_v61 = vadd.f32 %v540_v59, %v507_v56  ;;  %v5327_v55 = vld [vmem:[%s6850_s1 + $0x30] sm:$0xff]  ;;  %v5942_v56 = vld [vmem:[#allocation2 + $0x10] sm:$0x3] }
 0x151   : > { %v574_v63 = vunpack.c.l.b16 %v566_v58  ;;  %4661 = vmatmul.msk.bf16.vlgmr.msra.gmra.mxu2 %vm583_vm3, %v566_v58  ;;  %v5329_v58 = vld [vmem:[%s6850_s1 + $0x40] sm:$0xff]  ;;  %v4094_v59 = vld [vmem:[#allocation2 + $0x10] sm:$0x3] }
 0x152   : > { %v558_v18 = vadd.f32 %v5848_v45, %v544_v61  ;;  %v3481_v0 = vld.sshfl [vmem:[#allocation1] sm:$0xff pattern:$0x73625140]  ;;  %968 = vmatpush.bf16.msra.mxu2 %v959_v57  ;;  %v3571_v45 = vld [vmem:[#allocation2 + $0xe] sm:$0x3] }
 0x153   : > { %v575_v2 = vpack.c.b16 %v574_v63, %v574_v63  ;;  %3544 = vst [vmem:[#allocation1] ss:$4 sm:$0xff] %v5881_v62  ;;  %3483 = vrot.lane.b32.xlu0 %v3481_v0, %s5574_s10  ;;  %v5952_v63 = vld [vmem:[#allocation2 + $0x12] sm:$0x3] }
 0x154   : > { %vm560_vm4 = vcmp.gt.f32.partialorder %v558_v18, 0.0  ;;  %v563_v3 = vmul.f32 %v5874_v42, %v558_v18 }
 0x155   : > { %v576_v4 = vrot.slane %v575_v2, 2 }
 0x156   : > { %v565_v11 = vsel %vm560_vm4, %v558_v18, %v563_v3  ;;  %vm1295_vm4 = vsmask.f32 7942 }
 0x157   : > { %v567_v16 = vpack.c.bf16 %v565_v11, %v565_v11  ;;  %4656 = vmatmul.msk.bf16.vlgmr.msra.gmra.mxu1 %vm583_vm3, %v576_v4  ;;  %v5576_v4 = vmov 286326784   ;;  %vm6142_vm7 = vmand %vm1190_vm14, %vm1295_vm4 }
 0x158   : > { %932 = vmatpush.bf16.msra.mxu1 %v923_v6  ;;  %v643_v6 = vunpack.c.l.s4 %v5576_v4 }
 0x159   : > { %v682_v17 = vunpack.c.l.b16 %v567_v16  ;;  %4675 = vmatmul.msk.bf16.vlgmr.msrb.gmra.mxu0 %vm583_vm3, %v567_v16 }
 0x15a   : > { %v5892_v20 = vld.sshfl [vmem:[#allocation1] sm:$0xff pattern:$0x73625140]  ;;  %1033 = vmatpush.bf16.msrb.mxu0 %v1024_v15  ;;  %v5959_v16 = vunpack.c.0.s8 %v643_v6 }
 0x15b   : > { %v683_v14 = vpack.c.b16 %v682_v17, %v682_v17  ;;  %3580 = vst [vmem:[#allocation1] ss:$4 sm:$0xff] %v3571_v45 }
 0x15d   : > { %v684_v21 = vrot.slane %v683_v14, 2 }
 0x15f   : > { %4670 = vmatmul.msk.bf16.vlgmr.msra.gmra.mxu3 %vm583_vm3, %v684_v21 }
 0x160   : > { %999 = vmatpush.bf16.msra.mxu3 %v990_v26 }
 0x161   : > { %4689 = vmatmul.msk.bf16.vlgmr.msrb.gmra.mxu2 %vm254_vm1, %v5321_v25 }
 0x162   : > { %v3581_v32 = vld.sshfl [vmem:[#allocation1] sm:$0xff pattern:$0x73625140] }
 0x163   : > { %3583 = vrot.lane.b32.xlu1 %v3581_v32, %s5574_s10  ;;  %3645 = vst [vmem:[#allocation1] ss:$4 sm:$0xff] %v5900_v27  ;;  %v665_v32 = vld [vmem:[%s5696_s6] sm:$0x1] }
 0x167   : > { %4684 = vmatmul.msk.bf16.vlgmr.msrb.gmra.mxu1 %vm254_vm1, %v5322_v38 }
 0x168   : > { %1069 = vmatpush.bf16.msrb.mxu1 %v1060_v39 }
 0x169   : > { %4703 = vmatmul.msk.bf16.vlgmr.msra.gmra.mxu0 %vm254_vm1, %v5324_v22 }
 0x16a   : > { %v3646_v41 = vld.sshfl [vmem:[#allocation1] sm:$0xff pattern:$0x73625140] }
 0x16b   : > { %3712 = vperm.xlu1 %5501, %v5743_v36   ;;  %3648 = vrot.lane.b32.xlu0 %v3646_v41, %s5573_s9  ;;  %3681 = vst [vmem:[#allocation1] ss:$4 sm:$0xff] %v3672_v40  ;;  %v668_v41 = vld [vmem:[%s5696_s6 + $0x8] sm:$0x1] }
 0x16f   : > { %4696 = vmatmul.msk.bf16.vlgmr.msrb.gmra.mxu3 %vm254_vm1, %v5323_v43  ;;  %v671_v43 = vld [vmem:[%s5696_s6 + $0x10] sm:$0x1] }
 0x171   : > { %4717 = vmatmul.msk.bf16.vlgmr.msra.gmra.mxu2 %vm254_vm1, %v5326_v44 }
 0x172   : > { %v5926_v50 = vld.sshfl [vmem:[#allocation1] sm:$0xff pattern:$0x73625140] }
 0x173   : > { %3945 = vst [vmem:[#allocation1] ss:$4 sm:$0xff] %v5923_v48 }
 0x177   : > { %4710 = vmatmul.msk.bf16.vlgmr.msra.gmra.mxu1 %vm254_vm1, %v5325_v51 }
 0x179   : > { %4731 = vmatmul.msk.bf16.vlgmr.msrb.gmra.mxu0 %vm254_vm1, %v5328_v52 }
 0x17a   : > { %v3946_v54 = vld.sshfl [vmem:[#allocation1] sm:$0xff pattern:$0x73625140] }
 0x17b   : > { %4003 = vst [vmem:[#allocation1] ss:$4 sm:$0xff] %v3994_v53  ;;  %3948 = vrot.lane.b32.xlu0 %v3946_v54, %s5573_s9  ;;  %v674_v54 = vld [vmem:[%s5696_s6 + $0x18] sm:$0x1] }
 0x17f   : > { %4724 = vmatmul.msk.bf16.vlgmr.msra.gmra.mxu3 %vm254_vm1, %v5327_v55 }
 0x182   : > { %v5944_v57 = vld.sshfl [vmem:[#allocation1] sm:$0xff pattern:$0x73625140] }
 0x183   : > { %4067 = vst [vmem:[#allocation1] ss:$4 sm:$0xff] %v5942_v56 }
 0x187   : > { %4738 = vmatmul.msk.bf16.vlgmr.msrb.gmra.mxu1 %vm254_vm1, %v5329_v58 }
 0x18a   : > { %v4068_v61 = vld.sshfl [vmem:[#allocation1] sm:$0xff pattern:$0x73625140] }
 0x18b   : > { %4070 = vrot.lane.b32.xlu1 %v4068_v61, %s5573_s9  ;;  %4103 = vst [vmem:[#allocation1] ss:$4 sm:$0xff] %v4094_v59 }
 0x192   : > { %v4104_v18 = vld.sshfl [vmem:[#allocation1] sm:$0xff pattern:$0x73625140] }
 0x193   : > { %4106 = vrot.lane.b32.xlu1 %v4104_v18, %s5574_s10  ;;  %4168 = vst [vmem:[#allocation1] ss:$4 sm:$0xff] %v5952_v63 }
 0x19a   : > { %v4169_v0 = vld.sshfl [vmem:[#allocation1] sm:$0xff pattern:$0x73625140] }
 0x19b   : > { %4240 = vperm.xlu1 %5501, %v5728_v30   ;;  %4171 = vrot.lane.b32.xlu0 %v4169_v0, %s5573_s9 }
 0x1a3   : > { %4235 = vperm.xlu0 %5500, %v5743_v36  }
 0x1d4   : > { %v596_v1 = vpop.f32.mrf.mxu1  ;;  %v618_v2 = vpop.f32.mrf.mxu2 }
 0x1d5   : > { %v619_v3 = vadd.f32 %v618_v2, %v596_v1 }
 0x1d6   : > { %v725_v7 = vpop.f32.mrf.mxu0 }
 0x1d7   : > { %v622_v11 = vpack.c.bf16 %v619_v3, %v619_v3 }
 0x1d9   : > { %v624_v15 = vrot.slane %v622_v11, 3 }
 0x1db   : > { %v628_v30 = vsel %vm625_vm5, %v622_v11, %v624_v15  ;;  %v631_v36 = vsel %vm630_vm6, %v622_v11, %v624_v15 }
 0x1dc   : > { %v633_v45 = vrot.slane %v631_v36, 1  ;;  %v635_v17 = vunpack.i.h.s16 %v628_v30  ;;  %v4662_v14 = vpack.i.b16 %v628_v30, %v628_v30  ;;  %v598_v21 = vpop.f32.mrf.mxu1  ;;  %v620_v25 = vpop.f32.mrf.mxu2 }
 0x1de   : > { %v637_v34 = vunpack.i.h.s16 %v633_v45  ;;  %v639_v38 = vpack.i.b16 %v635_v17, %v635_v17  ;;  %v4663_v22 = vpack.i.b16 %v633_v45, %v633_v45  ;;  %v645_v39 = vperm.slane %v4662_v14, %v5959_v16  ;;  %v727_v40 = vpop.f32.mrf.mxu0 }
 0x1e0   : > { %v641_v44 = vpack.i.b16 %v637_v34, %v637_v34  ;;  %v649_v51 = vperm.slane %v639_v38, %v5959_v16  ;;  %v653_v52 = vperm.slane %v4663_v22, %v5959_v16  ;;  %v666_v53 = vsel %vm5964_vm9, %v645_v39, %v665_v32  ;;  %v5330_v34 = vld [vmem:[%s6852_s3] sm:$0xff] }
 0x1e1   : > { %667 = vst [vmem:[%s5696_s6] sm:$0x1] %v666_v53  ;;  %1146 = vmatpush.bf16.msrb.mxu3 %v5330_v34 }
 0x1e2   : > { %v657_v55 = vperm.slane %v641_v44, %v5959_v16  ;;  %v669_v58 = vsel %vm5964_vm9, %v649_v51, %v668_v41  ;;  %v672_v59 = vsel %vm5964_vm9, %v653_v52, %v671_v43  ;;  %v703_v61 = vpop.f32.mrf.mxu3  ;;  %v6004_v44 = vpop.permute.xlu1 %1087 }
 0x1e3   : > { %670 = vst [vmem:[%s5696_s6 + $0x8] sm:$0x1] %v669_v58  ;;  %v726_v18 = vadd.f32 %v725_v7, %v703_v61 }
 0x1e4   : > { %673 = vst [vmem:[%s5696_s6 + $0x10] sm:$0x1] %v672_v59  ;;  %v675_v0 = vsel %vm5964_vm9, %v657_v55, %v674_v54  ;;  %v812_v1 = vpop.f32.mrf.mxu1  ;;  %v836_v36 = vpop.f32.mrf.mxu2 }
 0x1e5   : > { %676 = vst [vmem:[%s5696_s6 + $0x18] sm:$0x1] %v675_v0  ;;  %v729_v2 = vpack.c.bf16 %v726_v18, %v726_v18  ;;  %v5331_v18 = vld [vmem:[%s6852_s3 + $0x8] sm:$0xff]  ;;  %v837_v0 = vadd.f32 %v836_v36, %v812_v1 }
 0x1e6   : > { %v900_v43 = vpop.f32.mrf.mxu0  ;;  %1124 = vmatpush.bf16.msrb.mxu2 %v5331_v18  ;;  %v5333_v36 = vld [vmem:[%s6852_s3 + $0x8] sm:$0xff] }
 0x1e7   : > { %v731_v3 = vrot.slane %v729_v2, 3  ;;  %1229 = vmatpush.bf16.msra.mxu0 %v5333_v36 }
 0x1e8   : > { %v769_v38 = vld [vmem:[%s5696_s6] sm:$0x1] }
 0x1e9   : > { %v734_v4 = vsel %vm625_vm5, %v729_v2, %v731_v3  ;;  %v736_v6 = vsel %vm630_vm6, %v729_v2, %v731_v3 }
 0x1ea   : > { %v738_v11 = vrot.slane %v736_v6, 1  ;;  %v740_v15 = vunpack.i.h.s16 %v734_v4  ;;  %v4676_v30 = vpack.i.b16 %v734_v4, %v734_v4  ;;  %v705_v45 = vpop.f32.mrf.mxu3  ;;  %v772_v51 = vld [vmem:[%s5696_s6 + $0x8] sm:$0x1] }
 0x1eb   : > { %v775_v52 = vld [vmem:[%s5696_s6 + $0x10] sm:$0x1]  ;;  %v5332_v4 = vld [vmem:[%s6852_s3] sm:$0xff] }
 0x1ec   : > { %v742_v17 = vunpack.i.h.s16 %v738_v11  ;;  %v744_v14 = vpack.i.b16 %v740_v15, %v740_v15  ;;  %v4677_v21 = vpack.i.b16 %v738_v11, %v738_v11  ;;  %v750_v25 = vperm.slane %v4676_v30, %v5959_v16  ;;  %v814_v32 = vpop.f32.mrf.mxu1  ;;  %v778_v58 = vld [vmem:[%s5696_s6 + $0x18] sm:$0x1]  ;;  %v838_v2 = vpop.f32.mrf.mxu2  ;;  %1251 = vmatpush.bf16.msra.mxu1 %v5332_v4  ;;  %v6029_v45 = vld [vmem:[%s6851_s2] sm:$0xff] }
 0x1ed   : > { %v1382_v15 = vpop.permute.xlu1 %1381  ;;  %1610 = vperm.xlu2 %5502, %v6029_v45  }
 0x1ee   : > { %v746_v22 = vpack.i.b16 %v742_v17, %v742_v17  ;;  %v754_v39 = vperm.slane %v744_v14, %v5959_v16  ;;  %v758_v40 = vperm.slane %v4677_v21, %v5959_v16  ;;  %v770_v41 = vsel %vm5991_vm11, %v750_v25, %v769_v38  ;;  %v902_v11 = vpop.f32.mrf.mxu0 }
 0x1ef   : > { %771 = vst [vmem:[%s5696_s6] sm:$0x1] %v770_v41  ;;  %v1387_v17 = vsel %vm258_vm0, %v1382_v15, 0  ;;  %v839_v14 = vadd.f32 %v838_v2, %v814_v32 }
 0x1f0   : > { %v762_v53 = vperm.slane %v746_v22, %v5959_v16  ;;  %v773_v54 = vsel %vm5991_vm11, %v754_v39, %v772_v51  ;;  %v776_v55 = vsel %vm5991_vm11, %v758_v40, %v775_v52  ;;  %1396 = vmatpush.bf16.msrb.mxu0 %v1387_v17  ;;  %v1324_v22 = vpop.permute.xlu2 %1323  ;;  %v1353_v39 = vsel %vm258_vm0, %v5722_v28, 0 }
 0x1f1   : > { %774 = vst [vmem:[%s5696_s6 + $0x8] sm:$0x1] %v773_v54  ;;  %v1329_v40 = vsel %vm258_vm0, %v1324_v22, 0  ;;  %1362 = vmatpush.bf16.msra.mxu3 %v1353_v39 }
 0x1f2   : > { %777 = vst [vmem:[%s5696_s6 + $0x10] sm:$0x1] %v776_v55  ;;  %v779_v59 = vsel %vm5991_vm11, %v762_v53, %v778_v58  ;;  %v870_v61 = vpop.f32.mrf.mxu3  ;;  %1338 = vmatpush.bf16.msra.mxu2 %v1329_v40 }
 0x1f3   : > { %780 = vst [vmem:[%s5696_s6 + $0x18] sm:$0x1] %v779_v59  ;;  %v875_v6 = vadd.f32 %v870_v61, %v837_v0  ;;  %v1417_v59 = vsel %vm258_vm0, %v5745_v37, 0  ;;  %v1083_v61 = vpop.permute.xlu0 %1082 }
 0x1f4   : > { %v934_v3 = vpop.f32.mrf.mxu1  ;;  %v970_v21 = vpop.f32.mrf.mxu2  ;;  %1426 = vmatpush.bf16.msrb.mxu1 %v1417_v59  ;;  %v5338_v59 = vld [vmem:[%s6850_s1 + $0x20] sm:$0xff] }
 0x1f5   : > { %v905_v30 = vadd.f32 %v900_v43, %v875_v6  ;;  %1973 = vrot.lane.b32.xlu2 %v5806_v8, %s5573_s9  ;;  %v1547_v39 = vpop.permute.xlu1 %1546 }
 0x1f6   : > { %v1035_v52 = vpop.f32.mrf.mxu0 }
 0x1f7   : > { %v939_v34 = vadd.f32 %v934_v3, %v905_v30 }
 0x1f8   : > { %v1482_v17 = vpop.permute.xlu2 %1481 }
 0x1f9   : > { %v975_v41 = vadd.f32 %v970_v21, %v939_v34 }
 0x1fa   : > { %v872_v1 = vpop.f32.mrf.mxu3 }
 0x1fb   : > { %v876_v38 = vadd.f32 %v872_v1, %v839_v14  ;;  %v1487_v1 = vsel %vm258_vm0, %v1482_v17, 0 }
 0x1fc   : > { %v936_v25 = vpop.f32.mrf.mxu1  ;;  %v972_v58 = vpop.f32.mrf.mxu2 }
 0x1fd   : > { %v906_v43 = vadd.f32 %v902_v11, %v876_v38  ;;  %2009 = vrot.lane.b32.xlu2 %v5810_v10, %s5574_s10  ;;  %v2135_v10 = vld [vmem:[%s6851_s2 + $0x8] sm:$0xff] }
 0x1fe   : > { %v1037_v4 = vpop.f32.mrf.mxu0 }
 0x1ff   : > { %v940_v54 = vadd.f32 %v936_v25, %v906_v43  ;;  %v1446_v25 = vpop.permute.xlu0 %1445 }
 0x200   : > { %v1451_v38 = vsel %vm258_vm0, %v1446_v25, 0 }
 0x201   : > { %v976_v18 = vadd.f32 %v972_v58, %v940_v54  ;;  %v5335_v54 = vld [vmem:[%s6850_s1 + $0x8] sm:$0xff]  ;;  %v5337_v58 = vld [vmem:[%s6850_s1 + $0x18] sm:$0xff] }
 0x202   : > { %v1001_v51 = vpop.f32.mrf.mxu3 }
 0x203   : > { %v1006_v32 = vadd.f32 %v1001_v51, %v975_v41  ;;  %v1552_v41 = vsel %vm258_vm0, %v1547_v39, 0 }
 0x204   : > { %v1071_v53 = vpop.f32.mrf.mxu1 }
 0x205   : > { %v1040_v55 = vadd.f32 %v1035_v52, %v1006_v32  ;;  %2143 = vperm.xlu2 %5502, %v2135_v10   ;;  %v5334_v32 = vld [vmem:[%s6850_s1] sm:$0xff] }
 0x207   : > { %v1076_v28 = vadd.f32 %v1071_v53, %v1040_v55  ;;  %v1518_v53 = vsel %vm258_vm0, %v5760_v47, 0  ;;  %v5336_v47 = vld [vmem:[%s6850_s1 + $0x10] sm:$0xff] }
 0x209   : > { %v1090_v0 = vadd.f32 %v1083_v61, %v1076_v28  ;;  %v5341_v28 = vld [vmem:[%s6850_s1 + $0x38] sm:$0xff] }
 0x20a   : > { %v1003_v2 = vpop.f32.mrf.mxu3 }
 0x20b   : > { %vm1092_vm12 = vcmp.gt.f32.partialorder %v1090_v0, 0.0  ;;  %v1094_v8 = vmul.f32 %v1090_v0, %v5874_v42  ;;  %v1007_v3 = vadd.f32 %v1003_v2, %v976_v18 }
 0x20c   : > { %v1073_v30 = vpop.f32.mrf.mxu1 }
 0x20d   : > { %v1096_v6 = vsel %vm1092_vm12, %v1090_v0, %v1094_v8  ;;  %v1041_v11 = vadd.f32 %v1037_v4, %v1007_v3  ;;  %2501 = vrot.lane.b32.xlu2 %v5824_v23, %s5573_s9  ;;  %v1583_v23 = vpop.permute.xlu0 %1582  ;;  %vm1718_vm12 = vcmask 256002  }
 0x20e   : > { %v1098_v15 = vpack.c.bf16 %v1096_v6, %v1096_v6  ;;  %v1588_v55 = vsel %vm258_vm0, %v1583_v23, 0  ;;  %vm6262_vm4 = vmand %vm1718_vm12, %vm1823_vm15 }
 0x20f   : > { %v1077_v37 = vadd.f32 %v1073_v30, %v1041_v11 }
 0x210   : > { %v1105_v36 = vunpack.c.l.b16 %v1098_v15  ;;  %4750 = vmatmul.msk.bf16.vlgmr.msrb.gmra.mxu3 %vm583_vm3, %v1098_v15 }
 0x211   : > { %v1091_v14 = vadd.f32 %v6004_v44, %v1077_v37  ;;  %1496 = vmatpush.bf16.msrb.mxu3 %v1487_v1 }
 0x212   : > { %v1106_v21 = vpack.c.b16 %v1105_v36, %v1105_v36 }
 0x213   : > { %vm1093_vm13 = vcmp.gt.f32.partialorder %v1091_v14, 0.0  ;;  %v1095_v34 = vmul.f32 %v1091_v14, %v5874_v42 }
 0x214   : > { %v1107_v22 = vrot.slane %v1106_v21, 2 }
 0x215   : > { %v1097_v40 = vsel %vm1093_vm13, %v1091_v14, %v1095_v34  ;;  %2638 = vrot.lane.b32.xlu2 %v5834_v31, %s5574_s10  ;;  %v5339_v31 = vld [vmem:[%s6850_s1 + $0x28] sm:$0xff]  ;;  %v1193_v14 = vld [vmem:[%s5696_s6] sm:$0x2]  ;;  %vm1719_vm13 = vsmask.f32 2304 }
 0x216   : > { %v1099_v43 = vpack.c.bf16 %v1097_v40, %v1097_v40  ;;  %4745 = vmatmul.msk.bf16.vlgmr.msrb.gmra.mxu2 %vm583_vm3, %v1107_v22  ;;  %v1196_v40 = vld [vmem:[%s5696_s6 + $0x8] sm:$0x2]  ;;  %vm6235_vm14 = vmand %vm1718_vm12, %vm1719_vm13  ;;  %vm2246_vm12 = vcmask 257027   ;;  %vm2247_vm13 = vsmask.f32 3328 }
 0x217   : > { %1460 = vmatpush.bf16.msrb.mxu2 %v1451_v38  ;;  %vm6355_vm15 = vmand %vm2246_vm12, %vm2247_vm13 }
 0x218   : > { %v1210_v44 = vunpack.c.l.b16 %v1099_v43  ;;  %4764 = vmatmul.msk.bf16.vlgmr.msra.gmra.mxu1 %vm583_vm3, %v1099_v43 }
 0x219   : > { %1561 = vmatpush.bf16.msra.mxu1 %v1552_v41  ;;  %v1199_v41 = vld [vmem:[%s5696_s6 + $0x10] sm:$0x2] }
 0x21a   : > { %v1211_v51 = vpack.c.b16 %v1210_v44, %v1210_v44 }
 0x21c   : > { %v1212_v52 = vrot.slane %v1211_v51, 2 }
 0x21d   : > { %2902 = vrot.lane.b32.xlu2 %v5838_v33, %s5573_s9  ;;  %v5340_v33 = vld [vmem:[%s6850_s1 + $0x30] sm:$0xff] }
 0x21e   : > { %4759 = vmatmul.msk.bf16.vlgmr.msra.gmra.mxu0 %vm583_vm3, %v1212_v52 }
 0x21f   : > { %1527 = vmatpush.bf16.msra.mxu0 %v1518_v53  ;;  %v1202_v53 = vld [vmem:[%s5696_s6 + $0x18] sm:$0x2] }
 0x220   : > { %4778 = vmatmul.msk.bf16.vlgmr.msra.gmra.mxu3 %vm254_vm1, %v5334_v32 }
 0x225   : > { %3060 = vrot.lane.b32.xlu2 %v5852_v49, %s5574_s10  ;;  %v5342_v49 = vld [vmem:[%s6850_s1 + $0x40] sm:$0xff] }
 0x226   : > { %4773 = vmatmul.msk.bf16.vlgmr.msra.gmra.mxu2 %vm254_vm1, %v5335_v54 }
 0x227   : > { %1597 = vmatpush.bf16.msra.mxu2 %v1588_v55 }
 0x228   : > { %4792 = vmatmul.msk.bf16.vlgmr.msrb.gmra.mxu1 %vm254_vm1, %v5337_v58 }
 0x22d   : > { %3189 = vperm.xlu2 %5502, %v6029_v45  }
 0x22e   : > { %4785 = vmatmul.msk.bf16.vlgmr.msrb.gmra.mxu0 %vm254_vm1, %v5336_v47 }
 0x230   : > { %4806 = vmatmul.msk.bf16.vlgmr.msrb.gmra.mxu3 %vm254_vm1, %v5339_v31 }
 0x235   : > { %3547 = vrot.lane.b32.xlu2 %v5892_v20, %s5573_s9 }
 0x236   : > { %4799 = vmatmul.msk.bf16.vlgmr.msrb.gmra.mxu2 %vm254_vm1, %v5338_v59 }
 0x238   : > { %4820 = vmatmul.msk.bf16.vlgmr.msra.gmra.mxu1 %vm254_vm1, %v5341_v28 }
 0x23d   : > { %3684 = vrot.lane.b32.xlu2 %v5926_v50, %s5574_s10 }
 0x23e   : > { %4813 = vmatmul.msk.bf16.vlgmr.msra.gmra.mxu0 %vm254_vm1, %v5340_v33 }
 0x245   : > { %3717 = vperm.xlu2 %5502, %v2135_v10  }
 0x246   : > { %4827 = vmatmul.msk.bf16.vlgmr.msra.gmra.mxu2 %vm254_vm1, %v5342_v49 }
 0x24d   : > { %4006 = vrot.lane.b32.xlu2 %v5944_v57, %s5574_s10 }
 0x293   : > { %v1148_v61 = vpop.f32.mrf.mxu3 }
 0x295   : > { %v1253_v45 = vpop.f32.mrf.mxu1 }
 0x299   : > { %v1126_v18 = vpop.f32.mrf.mxu2 }
 0x29a   : > { %v1149_v0 = vadd.f32 %v1148_v61, %v1126_v18 }
 0x29b   : > { %v1150_v2 = vpop.f32.mrf.mxu3  ;;  %v1231_v8 = vpop.f32.mrf.mxu0 }
 0x29c   : > { %v1152_v3 = vpack.c.bf16 %v1149_v0, %v1149_v0  ;;  %v1254_v4 = vadd.f32 %v1253_v45, %v1231_v8 }
 0x29d   : > { %v1255_v6 = vpop.f32.mrf.mxu1 }
 0x29e   : > { %v1154_v20 = vrot.slane %v1152_v3, 3  ;;  %v1257_v11 = vpack.c.bf16 %v1254_v4, %v1254_v4 }
 0x2a0   : > { %v1157_v50 = vsel %vm625_vm5, %v1152_v3, %v1154_v20  ;;  %v1159_v15 = vsel %vm630_vm6, %v1152_v3, %v1154_v20  ;;  %v1259_v57 = vrot.slane %v1257_v11, 3 }
 0x2a1   : > { %v1161_v30 = vrot.slane %v1159_v15, 1  ;;  %v1163_v17 = vunpack.i.h.s16 %v1157_v50  ;;  %v4751_v37 = vpack.i.b16 %v1157_v50, %v1157_v50  ;;  %v1128_v1 = vpop.f32.mrf.mxu2 }
 0x2a2   : > { %v1262_v10 = vsel %vm625_vm5, %v1257_v11, %v1259_v57  ;;  %v1264_v21 = vsel %vm630_vm6, %v1257_v11, %v1259_v57  ;;  %v5343_v11 = vld [vmem:[%s6852_s3] sm:$0xff] }
 0x2a3   : > { %v1165_v25 = vunpack.i.h.s16 %v1161_v30  ;;  %v1167_v34 = vpack.i.b16 %v1163_v17, %v1163_v17  ;;  %v4752_v38 = vpack.i.b16 %v1161_v30, %v1161_v30  ;;  %v1173_v22 = vperm.slane %v4751_v37, %v5959_v16  ;;  %v1233_v39 = vpop.f32.mrf.mxu0  ;;  %v1364_v33 = vpop.f32.mrf.mxu3  ;;  %1674 = vmatpush.bf16.msrb.mxu0 %v5343_v11 }
 0x2a4   : > { %v1266_v43 = vrot.slane %v1264_v21, 1  ;;  %v1268_v54 = vunpack.i.h.s16 %v1262_v10  ;;  %v4765_v31 = vpack.i.b16 %v1262_v10, %v1262_v10  ;;  %v1881_v11 = vsel %vm258_vm0, %v5782_v60, 0 }
 0x2a5   : > { %v1169_v44 = vpack.i.b16 %v1165_v25, %v1165_v25  ;;  %v1177_v51 = vperm.slane %v1167_v34, %v5959_v16  ;;  %v1181_v52 = vperm.slane %v4752_v38, %v5959_v16  ;;  %v1194_v32 = vsel %vm6115_vm2, %v1173_v22, %v1193_v14  ;;  %v1428_v37 = vpop.f32.mrf.mxu1  ;;  %v1852_v25 = vpop.permute.xlu1 %1851  ;;  %v5344_v22 = vld [vmem:[%s6852_s3 + $0x8] sm:$0xff] }
 0x2a6   : > { %1195 = vst [vmem:[%s5696_s6] sm:$0x2] %v1194_v32  ;;  %v1270_v47 = vunpack.i.h.s16 %v1266_v43  ;;  %v1272_v49 = vpack.i.b16 %v1268_v54, %v1268_v54  ;;  %v4766_v61 = vpack.i.b16 %v1266_v43, %v1266_v43  ;;  %v1278_v0 = vperm.slane %v4765_v31, %v5959_v16  ;;  %v1616_v34 = vpop.permute.xlu0 %1615  ;;  %1652 = vmatpush.bf16.msra.mxu3 %v5344_v22  ;;  %v1611_v54 = vpop.permute.xlu2 %1610 }
 0x2a7   : > { %v1185_v23 = vperm.slane %v1169_v44, %v5959_v16  ;;  %v1197_v55 = vsel %vm6115_vm2, %v1177_v51, %v1196_v40  ;;  %v1200_v58 = vsel %vm6115_vm2, %v1181_v52, %v1199_v41  ;;  %v1857_v38 = vsel %vm258_vm0, %v1852_v25, 0  ;;  %v5345_v41 = vld [vmem:[%s6852_s3] sm:$0xff]  ;;  %1890 = vmatpush.bf16.msra.mxu0 %v1881_v11 }
 0x2a8   : > { %1198 = vst [vmem:[%s5696_s6 + $0x8] sm:$0x2] %v1197_v55  ;;  %v1274_v18 = vpack.i.b16 %v1270_v47, %v1270_v47  ;;  %v1282_v3 = vperm.slane %v1272_v49, %v5959_v16  ;;  %v1286_v6 = vperm.slane %v4766_v61, %v5959_v16  ;;  %1779 = vmatpush.bf16.msrb.mxu2 %v5345_v41 }
 0x2a9   : > { %1201 = vst [vmem:[%s5696_s6 + $0x10] sm:$0x2] %v1200_v58  ;;  %v1203_v59 = vsel %vm6115_vm2, %v1185_v23, %v1202_v53  ;;  %v1340_v28 = vpop.f32.mrf.mxu2  ;;  %v5346_v58 = vld [vmem:[%s6852_s3 + $0x8] sm:$0xff] }
 0x2aa   : > { %1204 = vst [vmem:[%s5696_s6 + $0x18] sm:$0x2] %v1203_v59  ;;  %v1290_v50 = vperm.slane %v1274_v18, %v5959_v16  ;;  %v1365_v10 = vadd.f32 %v1364_v33, %v1340_v28  ;;  %1866 = vmatpush.bf16.msrb.mxu3 %v1857_v38  ;;  %1757 = vmatpush.bf16.msrb.mxu1 %v5346_v58 }
 0x2ab   : > { %v1398_v8 = vpop.f32.mrf.mxu0  ;;  %v1366_v21 = vpop.f32.mrf.mxu3 }
 0x2ac   : > { %v1403_v39 = vadd.f32 %v1398_v8, %v1365_v10 }
 0x2ad   : > { %v1297_v2 = vld [vmem:[%s5696_s6] sm:$0x2]  ;;  %v1430_v52 = vpop.f32.mrf.mxu1 }
 0x2ae   : > { %v1298_v4 = vsel %vm6142_vm7, %v1278_v0, %v1297_v2  ;;  %v1433_v44 = vadd.f32 %v1428_v37, %v1403_v39  ;;  %v1910_v53 = vpop.permute.xlu0 %1909  ;;  %v1974_v2 = vpop.permute.xlu2 %1973 }
 0x2af   : > { %1299 = vst [vmem:[%s5696_s6] sm:$0x2] %v1298_v4  ;;  %v1300_v20 = vld [vmem:[%s5696_s6 + $0x8] sm:$0x2]  ;;  %v1915_v55 = vsel %vm258_vm0, %v1910_v53, 0 }
 0x2b0   : > { %v1301_v15 = vsel %vm6142_vm7, %v1282_v3, %v1300_v20  ;;  %v1303_v57 = vld [vmem:[%s5696_s6 + $0x10] sm:$0x2]  ;;  %1924 = vmatpush.bf16.msra.mxu1 %v1915_v55  ;;  %v1945_v20 = vsel %vm258_vm0, %v5800_v5, 0 }
 0x2b1   : > { %1302 = vst [vmem:[%s5696_s6 + $0x8] sm:$0x2] %v1301_v15  ;;  %v1304_v30 = vsel %vm6142_vm7, %v1286_v6, %v1303_v57  ;;  %v1306_v17 = vld [vmem:[%s5696_s6 + $0x18] sm:$0x2]  ;;  %v1342_v1 = vpop.f32.mrf.mxu2  ;;  %1954 = vmatpush.bf16.msra.mxu2 %v1945_v20  ;;  %v5348_v55 = vld [vmem:[%s6850_s1 + $0x8] sm:$0xff] }
 0x2b2   : > { %1305 = vst [vmem:[%s5696_s6 + $0x10] sm:$0x2] %v1304_v30  ;;  %v1307_v14 = vsel %vm6142_vm7, %v1290_v50, %v1306_v17  ;;  %v1367_v51 = vadd.f32 %v1366_v21, %v1342_v1 }
 0x2b3   : > { %1308 = vst [vmem:[%s5696_s6 + $0x18] sm:$0x2] %v1307_v14  ;;  %v1400_v40 = vpop.f32.mrf.mxu0  ;;  %v1498_v32 = vpop.f32.mrf.mxu3 }
 0x2b4   : > { %v1404_v47 = vadd.f32 %v1400_v40, %v1367_v51  ;;  %v1979_v40 = vsel %vm258_vm0, %v1974_v2, 0 }
 0x2b5   : > { %v1563_v49 = vpop.f32.mrf.mxu1 }
 0x2b6   : > { %v1434_v33 = vadd.f32 %v1430_v52, %v1404_v47  ;;  %v2010_v37 = vpop.permute.xlu2 %2009  ;;  %v2111_v58 = vpop.permute.xlu0 %2110 }
 0x2b7   : > { %v2015_v10 = vsel %vm258_vm0, %v2010_v37, 0  ;;  %v2116_v47 = vsel %vm258_vm0, %v2111_v58, 0 }
 0x2b9   : > { %v1462_v43 = vpop.f32.mrf.mxu2 }
 0x2ba   : > { %v1467_v23 = vadd.f32 %v1462_v43, %v1433_v44  ;;  %v2075_v43 = vpop.permute.xlu1 %2074 }
 0x2bb   : > { %v1529_v31 = vpop.f32.mrf.mxu0  ;;  %v1500_v0 = vpop.f32.mrf.mxu3  ;;  %v2080_v51 = vsel %vm258_vm0, %v2075_v43, 0  ;;  %v1724_v43 = vld [vmem:[%s5696_s6 + $0x8] sm:$0x4] }
 0x2bc   : > { %v1503_v59 = vadd.f32 %v1498_v32, %v1467_v23  ;;  %v2046_v23 = vsel %vm258_vm0, %v5808_v9, 0  ;;  %v5349_v9 = vld [vmem:[%s6850_s1 + $0x10] sm:$0xff] }
 0x2bd   : > { %v1565_v30 = vpop.f32.mrf.mxu1 }
 0x2be   : > { %v1534_v61 = vadd.f32 %v1529_v31, %v1503_v59  ;;  %v5350_v31 = vld [vmem:[%s6850_s1 + $0x18] sm:$0xff]  ;;  %v5352_v59 = vld [vmem:[%s6850_s1 + $0x28] sm:$0xff] }
 0x2c0   : > { %v1568_v8 = vadd.f32 %v1563_v49, %v1534_v61  ;;  %v5353_v49 = vld [vmem:[%s6850_s1 + $0x30] sm:$0xff]  ;;  %v5355_v61 = vld [vmem:[%s6850_s1 + $0x40] sm:$0xff] }
 0x2c1   : > { %v1464_v28 = vpop.f32.mrf.mxu2 }
 0x2c2   : > { %v1468_v18 = vadd.f32 %v1464_v28, %v1434_v33  ;;  %v5351_v28 = vld [vmem:[%s6850_s1 + $0x20] sm:$0xff]  ;;  %v5354_v33 = vld [vmem:[%s6850_s1 + $0x38] sm:$0xff] }
 0x2c3   : > { %v1531_v4 = vpop.f32.mrf.mxu0 }
 0x2c4   : > { %v1504_v3 = vadd.f32 %v1500_v0, %v1468_v18 }
 0x2c6   : > { %v1535_v15 = vadd.f32 %v1531_v4, %v1504_v3 }
 0x2c8   : > { %v1569_v1 = vadd.f32 %v1565_v30, %v1535_v15 }
 0x2c9   : > { %v1599_v6 = vpop.f32.mrf.mxu2 }
 0x2ca   : > { %v1604_v50 = vadd.f32 %v1599_v6, %v1568_v8 }
 0x2cc   : > { %v1618_v57 = vadd.f32 %v1611_v54, %v1604_v50  ;;  %v5347_v54 = vld [vmem:[%s6850_s1] sm:$0xff] }
 0x2ce   : > { %vm1620_vm8 = vcmp.gt.f32.partialorder %v1618_v57, 0.0  ;;  %v1622_v17 = vmul.f32 %v1618_v57, %v5874_v42 }
 0x2d0   : > { %v1624_v14 = vsel %vm1620_vm8, %v1618_v57, %v1622_v17 }
 0x2d1   : > { %v1626_v21 = vpack.c.bf16 %v1624_v14, %v1624_v14  ;;  %v1601_v25 = vpop.f32.mrf.mxu2 }
 0x2d2   : > { %v1605_v5 = vadd.f32 %v1601_v25, %v1569_v1 }
 0x2d3   : > { %v1633_v38 = vunpack.c.l.b16 %v1626_v21  ;;  %4839 = vmatmul.msk.bf16.vlgmr.msrb.gmra.mxu0 %vm583_vm3, %v1626_v21  ;;  %v1721_v21 = vld [vmem:[%s5696_s6] sm:$0x4] }
 0x2d4   : > { %v1619_v60 = vadd.f32 %v1616_v34, %v1605_v5  ;;  %2024 = vmatpush.bf16.msrb.mxu0 %v2015_v10 }
 0x2d5   : > { %v1634_v22 = vpack.c.b16 %v1633_v38, %v1633_v38 }
 0x2d6   : > { %vm1621_vm10 = vcmp.gt.f32.partialorder %v1619_v60, 0.0  ;;  %v1623_v39 = vmul.f32 %v1619_v60, %v5874_v42 }
 0x2d7   : > { %v1635_v41 = vrot.slane %v1634_v22, 2 }
 0x2d8   : > { %v1625_v44 = vsel %vm1621_vm10, %v1619_v60, %v1623_v39 }
 0x2d9   : > { %v1627_v52 = vpack.c.bf16 %v1625_v44, %v1625_v44  ;;  %4834 = vmatmul.msk.bf16.vlgmr.msra.gmra.mxu3 %vm583_vm3, %v1635_v41  ;;  %v1727_v44 = vld [vmem:[%s5696_s6 + $0x10] sm:$0x4] }
 0x2da   : > { %1988 = vmatpush.bf16.msra.mxu3 %v1979_v40 }
 0x2db   : > { %v1738_v32 = vunpack.c.l.b16 %v1627_v52  ;;  %4853 = vmatmul.msk.bf16.vlgmr.msrb.gmra.mxu2 %vm583_vm3, %v1627_v52 }
 0x2dc   : > { %2089 = vmatpush.bf16.msrb.mxu2 %v2080_v51 }
 0x2dd   : > { %v1739_v34 = vpack.c.b16 %v1738_v32, %v1738_v32 }
 0x2df   : > { %v1740_v53 = vrot.slane %v1739_v34, 2 }
 0x2e1   : > { %4848 = vmatmul.msk.bf16.vlgmr.msrb.gmra.mxu1 %vm583_vm3, %v1740_v53 }
 0x2e2   : > { %2055 = vmatpush.bf16.msrb.mxu1 %v2046_v23 }
 0x2e3   : > { %4867 = vmatmul.msk.bf16.vlgmr.msra.gmra.mxu0 %vm254_vm1, %v5347_v54  ;;  %v1730_v54 = vld [vmem:[%s5696_s6 + $0x18] sm:$0x4] }
 0x2e9   : > { %4862 = vmatmul.msk.bf16.vlgmr.msrb.gmra.mxu3 %vm254_vm1, %v5348_v55 }
 0x2ea   : > { %2125 = vmatpush.bf16.msrb.mxu3 %v2116_v47 }
 0x2eb   : > { %4881 = vmatmul.msk.bf16.vlgmr.msra.gmra.mxu2 %vm254_vm1, %v5350_v31 }
 0x2f1   : > { %4874 = vmatmul.msk.bf16.vlgmr.msra.gmra.mxu1 %vm254_vm1, %v5349_v9 }
 0x2f3   : > { %4895 = vmatmul.msk.bf16.vlgmr.msrb.gmra.mxu0 %vm254_vm1, %v5352_v59 }
 0x2f9   : > { %4888 = vmatmul.msk.bf16.vlgmr.msra.gmra.mxu3 %vm254_vm1, %v5351_v28 }
 0x2fb   : > { %4909 = vmatmul.msk.bf16.vlgmr.msrb.gmra.mxu2 %vm254_vm1, %v5354_v33 }
 0x301   : > { %4902 = vmatmul.msk.bf16.vlgmr.msrb.gmra.mxu1 %vm254_vm1, %v5353_v49 }
 0x309   : > { %4916 = vmatmul.msk.bf16.vlgmr.msrb.gmra.mxu3 %vm254_vm1, %v5355_v61 }
 0x350   : > { %v1676_v18 = vpop.f32.mrf.mxu0 }
 0x358   : > { %v1678_v0 = vpop.f32.mrf.mxu0 }
 0x35c   : > { %v1654_v2 = vpop.f32.mrf.mxu3 }
 0x35d   : > { %v1677_v8 = vadd.f32 %v1676_v18, %v1654_v2 }
 0x35e   : > { %v1759_v3 = vpop.f32.mrf.mxu1  ;;  %v1781_v4 = vpop.f32.mrf.mxu2 }
 0x35f   : > { %v1680_v6 = vpack.c.bf16 %v1677_v8, %v1677_v8  ;;  %v1782_v20 = vadd.f32 %v1781_v4, %v1759_v3 }
 0x360   : > { %v1892_v33 = vpop.f32.mrf.mxu0 }
 0x361   : > { %v1682_v11 = vrot.slane %v1680_v6, 3  ;;  %v1785_v50 = vpack.c.bf16 %v1782_v20, %v1782_v20 }
 0x363   : > { %v1685_v15 = vsel %vm625_vm5, %v1680_v6, %v1682_v11  ;;  %v1687_v57 = vsel %vm630_vm6, %v1680_v6, %v1682_v11  ;;  %v1787_v30 = vrot.slane %v1785_v50, 3 }
 0x364   : > { %v1689_v17 = vrot.slane %v1687_v57, 1  ;;  %v1691_v37 = vunpack.i.h.s16 %v1685_v15  ;;  %v4840_v1 = vpack.i.b16 %v1685_v15, %v1685_v15  ;;  %v1656_v14 = vpop.f32.mrf.mxu3 }
 0x365   : > { %v1790_v25 = vsel %vm625_vm5, %v1785_v50, %v1787_v30  ;;  %v1792_v5 = vsel %vm630_vm6, %v1785_v50, %v1787_v30  ;;  %v5356_v50 = vld [vmem:[%s6852_s3] sm:$0xff] }
 0x366   : > { %v1693_v38 = vunpack.i.h.s16 %v1689_v17  ;;  %v1695_v60 = vpack.i.b16 %v1691_v37, %v1691_v37  ;;  %v4841_v22 = vpack.i.b16 %v1689_v17, %v1689_v17  ;;  %v1701_v39 = vperm.slane %v4840_v1, %v5959_v16  ;;  %v1761_v40 = vpop.f32.mrf.mxu1  ;;  %v1783_v41 = vpop.f32.mrf.mxu2  ;;  %2202 = vmatpush.bf16.msra.mxu1 %v5356_v50 }
 0x367   : > { %v1794_v51 = vrot.slane %v1792_v5, 1  ;;  %v1796_v23 = vunpack.i.h.s16 %v1790_v25  ;;  %v4854_v9 = vpack.i.b16 %v1790_v25, %v1790_v25 }
 0x368   : > { %v1697_v52 = vpack.i.b16 %v1693_v38, %v1693_v38  ;;  %v1705_v32 = vperm.slane %v1695_v60, %v5959_v16  ;;  %v1709_v34 = vperm.slane %v4841_v22, %v5959_v16  ;;  %v1722_v53 = vsel %vm6235_vm14, %v1701_v39, %v1721_v21  ;;  %v1894_v5 = vpop.f32.mrf.mxu0  ;;  %v2139_v38 = vpop.permute.xlu1 %2138  ;;  %v5357_v39 = vld [vmem:[%s6852_s3 + $0x8] sm:$0xff] }
 0x369   : > { %1723 = vst [vmem:[%s5696_s6] sm:$0x4] %v1722_v53  ;;  %v1798_v31 = vunpack.i.h.s16 %v1794_v51  ;;  %v1800_v49 = vpack.i.b16 %v1796_v23, %v1796_v23  ;;  %v4855_v61 = vpack.i.b16 %v1794_v51, %v1794_v51  ;;  %v1806_v2 = vperm.slane %v4854_v9, %v5959_v16  ;;  %v2380_v60 = vpop.permute.xlu0 %2379  ;;  %2180 = vmatpush.bf16.msra.mxu0 %v5357_v39 }
 0x36a   : > { %v1713_v55 = vperm.slane %v1697_v52, %v5959_v16  ;;  %v1725_v58 = vsel %vm6235_vm14, %v1705_v32, %v1724_v43  ;;  %v1728_v47 = vsel %vm6235_vm14, %v1709_v34, %v1727_v44  ;;  %v2385_v22 = vsel %vm258_vm0, %v2380_v60, 0  ;;  %v5358_v43 = vld [vmem:[%s6852_s3] sm:$0xff] }
 0x36b   : > { %1726 = vst [vmem:[%s5696_s6 + $0x8] sm:$0x4] %v1725_v58  ;;  %v1802_v0 = vpack.i.b16 %v1798_v31, %v1798_v31  ;;  %v1810_v4 = vperm.slane %v1800_v49, %v5959_v16  ;;  %v1814_v20 = vperm.slane %v4855_v61, %v5959_v16  ;;  %2307 = vmatpush.bf16.msra.mxu3 %v5358_v43 }
 0x36c   : > { %1729 = vst [vmem:[%s5696_s6 + $0x10] sm:$0x4] %v1728_v47  ;;  %v1731_v59 = vsel %vm6235_vm14, %v1713_v55, %v1730_v54  ;;  %v1868_v28 = vpop.f32.mrf.mxu3  ;;  %v5359_v55 = vld [vmem:[%s6852_s3 + $0x8] sm:$0xff] }
 0x36d   : > { %1732 = vst [vmem:[%s5696_s6 + $0x18] sm:$0x4] %v1731_v59  ;;  %v1818_v15 = vperm.slane %v1802_v0, %v5959_v16  ;;  %v1893_v25 = vadd.f32 %v1892_v33, %v1868_v28  ;;  %2394 = vmatpush.bf16.msrb.mxu0 %v2385_v22  ;;  %2285 = vmatpush.bf16.msra.mxu2 %v5359_v55  ;;  %v2409_v59 = vsel %vm258_vm0, %v5814_v13, 0 }
 0x36e   : > { %v1926_v3 = vpop.f32.mrf.mxu1  ;;  %v1956_v1 = vpop.f32.mrf.mxu2  ;;  %2418 = vmatpush.bf16.msrb.mxu1 %v2409_v59  ;;  %v5367_v59 = vld [vmem:[%s6850_s1 + $0x38] sm:$0xff] }
 0x36f   : > { %v1931_v40 = vadd.f32 %v1926_v3, %v1893_v25  ;;  %v2473_v3 = vsel %vm258_vm0, %v5820_v19, 0 }
 0x370   : > { %v1825_v8 = vld [vmem:[%s5696_s6] sm:$0x4]  ;;  %v2026_v34 = vpop.f32.mrf.mxu0  ;;  %v2438_v53 = vpop.permute.xlu1 %2437  ;;  %2482 = vmatpush.bf16.msrb.mxu3 %v2473_v3 }
 0x371   : > { %v1826_v6 = vsel %vm6262_vm4, %v1806_v2, %v1825_v8  ;;  %v1961_v51 = vadd.f32 %v1956_v1, %v1931_v40  ;;  %v2443_v23 = vsel %vm258_vm0, %v2438_v53, 0  ;;  %v5360_v53 = vld [vmem:[%s6850_s1] sm:$0xff] }
 0x372   : > { %1827 = vst [vmem:[%s5696_s6] sm:$0x4] %v1826_v6  ;;  %v1828_v11 = vld [vmem:[%s5696_s6 + $0x8] sm:$0x4]  ;;  %2452 = vmatpush.bf16.msrb.mxu2 %v2443_v23  ;;  %v5361_v23 = vld [vmem:[%s6850_s1 + $0x8] sm:$0xff] }
 0x373   : > { %v1829_v57 = vsel %vm6262_vm4, %v1810_v4, %v1828_v11  ;;  %v1831_v30 = vld [vmem:[%s5696_s6 + $0x10] sm:$0x4]  ;;  %v2144_v11 = vpop.permute.xlu2 %2143 }
 0x374   : > { %1830 = vst [vmem:[%s5696_s6 + $0x8] sm:$0x4] %v1829_v57  ;;  %v1832_v17 = vsel %vm6262_vm4, %v1814_v20, %v1831_v30  ;;  %v1834_v37 = vld [vmem:[%s5696_s6 + $0x18] sm:$0x4]  ;;  %v1870_v14 = vpop.f32.mrf.mxu3 }
 0x375   : > { %1833 = vst [vmem:[%s5696_s6 + $0x10] sm:$0x4] %v1832_v17  ;;  %v1835_v21 = vsel %vm6262_vm4, %v1818_v15, %v1834_v37  ;;  %v1895_v52 = vadd.f32 %v1894_v5, %v1870_v14 }
 0x376   : > { %1836 = vst [vmem:[%s5696_s6 + $0x18] sm:$0x4] %v1835_v21  ;;  %v1928_v41 = vpop.f32.mrf.mxu1  ;;  %v1958_v32 = vpop.f32.mrf.mxu2 }
 0x377   : > { %v1932_v58 = vadd.f32 %v1928_v41, %v1895_v52  ;;  %v2603_v41 = vpop.permute.xlu0 %2602 }
 0x378   : > { %v2028_v0 = vpop.f32.mrf.mxu0  ;;  %v2538_v30 = vpop.permute.xlu1 %2537 }
 0x379   : > { %v1962_v28 = vadd.f32 %v1958_v32, %v1932_v58  ;;  %v2543_v1 = vsel %vm258_vm0, %v2538_v30, 0  ;;  %v2249_v30 = vld [vmem:[%s5696_s6] sm:$0x8] }
 0x37b   : > { %v2502_v22 = vpop.permute.xlu2 %2501 }
 0x37c   : > { %v1990_v44 = vpop.f32.mrf.mxu3  ;;  %v2507_v39 = vsel %vm258_vm0, %v2502_v22, 0 }
 0x37d   : > { %v1995_v54 = vadd.f32 %v1990_v44, %v1961_v51  ;;  %v2608_v44 = vsel %vm258_vm0, %v2603_v41, 0 }
 0x37e   : > { %v2057_v47 = vpop.f32.mrf.mxu1  ;;  %v2091_v33 = vpop.f32.mrf.mxu2 }
 0x37f   : > { %v2031_v31 = vadd.f32 %v2026_v34, %v1995_v54  ;;  %v2574_v54 = vsel %vm258_vm0, %v5826_v24, 0  ;;  %v5362_v24 = vld [vmem:[%s6850_s1 + $0x10] sm:$0xff] }
 0x381   : > { %v2062_v49 = vadd.f32 %v2057_v47, %v2031_v31  ;;  %v5363_v47 = vld [vmem:[%s6850_s1 + $0x18] sm:$0xff]  ;;  %v5365_v31 = vld [vmem:[%s6850_s1 + $0x28] sm:$0xff] }
 0x383   : > { %v2096_v2 = vadd.f32 %v2091_v33, %v2062_v49  ;;  %v2639_v55 = vpop.permute.xlu2 %2638  ;;  %v5368_v33 = vld [vmem:[%s6850_s1 + $0x40] sm:$0xff] }
 0x384   : > { %v1992_v9 = vpop.f32.mrf.mxu3  ;;  %v2644_v58 = vsel %vm258_vm0, %v2639_v55, 0 }
 0x385   : > { %v1996_v61 = vadd.f32 %v1992_v9, %v1962_v28  ;;  %v5364_v9 = vld [vmem:[%s6850_s1 + $0x20] sm:$0xff]  ;;  %v5366_v28 = vld [vmem:[%s6850_s1 + $0x30] sm:$0xff] }
 0x386   : > { %v2059_v4 = vpop.f32.mrf.mxu1  ;;  %v2093_v57 = vpop.f32.mrf.mxu2 }
 0x387   : > { %v2032_v8 = vadd.f32 %v2028_v0, %v1996_v61 }
 0x389   : > { %v2063_v50 = vadd.f32 %v2059_v4, %v2032_v8 }
 0x38b   : > { %v2097_v17 = vadd.f32 %v2093_v57, %v2063_v50 }
 0x38c   : > { %v2127_v6 = vpop.f32.mrf.mxu3 }
 0x38d   : > { %v2132_v20 = vadd.f32 %v2127_v6, %v2096_v2 }
 0x38f   : > { %v2146_v15 = vadd.f32 %v2139_v38, %v2132_v20 }
 0x391   : > { %vm2148_vm8 = vcmp.gt.f32.partialorder %v2146_v15, 0.0  ;;  %v2150_v13 = vmul.f32 %v2146_v15, %v5874_v42 }
 0x393   : > { %v2152_v37 = vsel %vm2148_vm8, %v2146_v15, %v2150_v13  ;;  %vm2351_vm8 = vsmask.f32 7950 }
 0x394   : > { %v2154_v14 = vpack.c.bf16 %v2152_v37, %v2152_v37  ;;  %v2129_v21 = vpop.f32.mrf.mxu3 }
 0x395   : > { %v2133_v25 = vadd.f32 %v2129_v21, %v2097_v17  ;;  %v2252_v21 = vld [vmem:[%s5696_s6 + $0x8] sm:$0x8] }
 0x396   : > { %v2161_v19 = vunpack.c.l.b16 %v2154_v14  ;;  %4928 = vmatmul.msk.bf16.vlgmr.msra.gmra.mxu1 %vm583_vm3, %v2154_v14 }
 0x397   : > { %v2147_v5 = vadd.f32 %v2144_v11, %v2133_v25  ;;  %2552 = vmatpush.bf16.msra.mxu1 %v2543_v1  ;;  %v2255_v25 = vld [vmem:[%s5696_s6 + $0x10] sm:$0x8] }
 0x398   : > { %v2162_v60 = vpack.c.b16 %v2161_v19, %v2161_v19 }
 0x399   : > { %vm2149_vm10 = vcmp.gt.f32.partialorder %v2147_v5, 0.0  ;;  %v2151_v38 = vmul.f32 %v2147_v5, %v5874_v42 }
 0x39a   : > { %v2163_v40 = vrot.slane %v2162_v60, 2 }
 0x39b   : > { %v2153_v43 = vsel %vm2149_vm10, %v2147_v5, %v2151_v38  ;;  %v2258_v38 = vld [vmem:[%s5696_s6 + $0x18] sm:$0x8]  ;;  %vm6382_vm10 = vmand %vm2246_vm12, %vm2351_vm8 }
 0x39c   : > { %v2155_v51 = vpack.c.bf16 %v2153_v43, %v2153_v43  ;;  %4923 = vmatmul.msk.bf16.vlgmr.msra.gmra.mxu0 %vm583_vm3, %v2163_v40 }
 0x39d   : > { %2516 = vmatpush.bf16.msra.mxu0 %v2507_v39 }
 0x39e   : > { %v2266_v52 = vunpack.c.l.b16 %v2155_v51  ;;  %4942 = vmatmul.msk.bf16.vlgmr.msra.gmra.mxu3 %vm583_vm3, %v2155_v51 }
 0x39f   : > { %2617 = vmatpush.bf16.msra.mxu3 %v2608_v44 }
 0x3a0   : > { %v2267_v32 = vpack.c.b16 %v2266_v52, %v2266_v52 }
 0x3a2   : > { %v2268_v34 = vrot.slane %v2267_v32, 2 }
 0x3a4   : > { %4937 = vmatmul.msk.bf16.vlgmr.msra.gmra.mxu2 %vm583_vm3, %v2268_v34 }
 0x3a5   : > { %2583 = vmatpush.bf16.msra.mxu2 %v2574_v54 }
 0x3a6   : > { %4956 = vmatmul.msk.bf16.vlgmr.msrb.gmra.mxu1 %vm254_vm1, %v5360_v53 }
 0x3ac   : > { %4951 = vmatmul.msk.bf16.vlgmr.msrb.gmra.mxu0 %vm254_vm1, %v5361_v23 }
 0x3ad   : > { %2653 = vmatpush.bf16.msrb.mxu0 %v2644_v58 }
 0x3ae   : > { %4970 = vmatmul.msk.bf16.vlgmr.msrb.gmra.mxu3 %vm254_vm1, %v5363_v47 }
 0x3b4   : > { %4963 = vmatmul.msk.bf16.vlgmr.msrb.gmra.mxu2 %vm254_vm1, %v5362_v24 }
 0x3b6   : > { %4984 = vmatmul.msk.bf16.vlgmr.msra.gmra.mxu1 %vm254_vm1, %v5365_v31 }
 0x3bc   : > { %4977 = vmatmul.msk.bf16.vlgmr.msra.gmra.mxu0 %vm254_vm1, %v5364_v9 }
 0x3be   : > { %4998 = vmatmul.msk.bf16.vlgmr.msra.gmra.mxu3 %vm254_vm1, %v5367_v59 }
 0x3c4   : > { %4991 = vmatmul.msk.bf16.vlgmr.msra.gmra.mxu2 %vm254_vm1, %v5366_v28 }
 0x3cc   : > { %5005 = vmatmul.msk.bf16.vlgmr.msrb.gmra.mxu0 %vm254_vm1, %v5368_v33 }
 0x413   : > { %v2204_v49 = vpop.f32.mrf.mxu1 }
 0x419   : > { %v2182_v61 = vpop.f32.mrf.mxu0 }
 0x41a   : > { %v2205_v0 = vadd.f32 %v2204_v49, %v2182_v61 }
 0x41b   : > { %v2206_v2 = vpop.f32.mrf.mxu1 }
 0x41c   : > { %v2208_v8 = vpack.c.bf16 %v2205_v0, %v2205_v0  ;;  %v5369_v0 = vld [vmem:[%s6852_s3] sm:$0xff] }
 0x41d   : > { %2730 = vmatpush.bf16.msrb.mxu2 %v5369_v0 }
 0x41e   : > { %v2210_v3 = vrot.slane %v2208_v8, 3 }
 0x420   : > { %v2213_v4 = vsel %vm625_vm5, %v2208_v8, %v2210_v3  ;;  %v2215_v6 = vsel %vm630_vm6, %v2208_v8, %v2210_v3 }
 0x421   : > { %v2217_v20 = vrot.slane %v2215_v6, 1  ;;  %v2219_v11 = vunpack.i.h.s16 %v2213_v4  ;;  %v4929_v50 = vpack.i.b16 %v2213_v4, %v2213_v4  ;;  %v2184_v15 = vpop.f32.mrf.mxu0  ;;  %v2309_v57 = vpop.f32.mrf.mxu3 }
 0x423   : > { %v2221_v17 = vunpack.i.h.s16 %v2217_v20  ;;  %v2223_v37 = vpack.i.b16 %v2219_v11, %v2219_v11  ;;  %v4930_v1 = vpack.i.b16 %v2217_v20, %v2217_v20  ;;  %v2229_v14 = vperm.slane %v4929_v50, %v5959_v16  ;;  %v2420_v24 = vpop.f32.mrf.mxu1 }
 0x425   : > { %v2225_v19 = vpack.i.b16 %v2221_v17, %v2221_v17  ;;  %v2233_v5 = vperm.slane %v2223_v37, %v5959_v16  ;;  %v2237_v60 = vperm.slane %v4930_v1, %v5959_v16  ;;  %v2250_v22 = vsel %vm6355_vm15, %v2229_v14, %v2249_v30  ;;  %v2667_v17 = vpop.permute.xlu0 %2666  ;;  %v2903_v37 = vpop.permute.xlu2 %2902 }
 0x426   : > { %2251 = vst [vmem:[%s5696_s6] sm:$0x8] %v2250_v22  ;;  %v2908_v14 = vsel %vm258_vm0, %v2903_v37, 0 }
 0x427   : > { %v2241_v39 = vperm.slane %v2225_v19, %v5959_v16  ;;  %v2253_v40 = vsel %vm6355_vm15, %v2233_v5, %v2252_v21  ;;  %v2256_v41 = vsel %vm6355_vm15, %v2237_v60, %v2255_v25  ;;  %v2287_v43 = vpop.f32.mrf.mxu2  ;;  %v5370_v19 = vld [vmem:[%s6852_s3 + $0x8] sm:$0xff] }
 0x428   : > { %2254 = vst [vmem:[%s5696_s6 + $0x8] sm:$0x8] %v2253_v40  ;;  %v2310_v44 = vadd.f32 %v2309_v57, %v2287_v43  ;;  %2708 = vmatpush.bf16.msrb.mxu1 %v5370_v19 }
 0x429   : > { %2257 = vst [vmem:[%s5696_s6 + $0x10] sm:$0x8] %v2256_v41  ;;  %v2259_v51 = vsel %vm6355_vm15, %v2241_v39, %v2258_v38  ;;  %v2311_v52 = vpop.f32.mrf.mxu3  ;;  %v2396_v32 = vpop.f32.mrf.mxu0  ;;  %v5371_v38 = vld [vmem:[%s6852_s3] sm:$0xff] }
 0x42a   : > { %2260 = vst [vmem:[%s5696_s6 + $0x18] sm:$0x8] %v2259_v51  ;;  %v2313_v34 = vpack.c.bf16 %v2310_v44, %v2310_v44  ;;  %v2421_v5 = vadd.f32 %v2420_v24, %v2396_v32  ;;  %2832 = vmatpush.bf16.msra.mxu0 %v5371_v38  ;;  %v5372_v52 = vld [vmem:[%s6852_s3 + $0x8] sm:$0xff] }
 0x42b   : > { %v2422_v60 = vpop.f32.mrf.mxu1  ;;  %2810 = vmatpush.bf16.msrb.mxu3 %v5372_v52  ;;  %v3097_v52 = vsel %vm258_vm0, %v5850_v46, 0  ;;  %v5375_v46 = vld [vmem:[%s6850_s1 + $0x10] sm:$0xff] }
 0x42c   : > { %v2315_v53 = vrot.slane %v2313_v34, 3  ;;  %2917 = vmatpush.bf16.msra.mxu1 %v2908_v14 }
 0x42d   : > { %v2353_v2 = vld [vmem:[%s5696_s6] sm:$0x8]  ;;  %v2961_v41 = vpop.permute.xlu0 %2960 }
 0x42e   : > { %v2318_v54 = vsel %vm625_vm5, %v2313_v34, %v2315_v53  ;;  %v2320_v23 = vsel %vm630_vm6, %v2313_v34, %v2315_v53  ;;  %v2966_v44 = vsel %vm258_vm0, %v2961_v41, 0 }
 0x42f   : > { %v2322_v55 = vrot.slane %v2320_v23, 1  ;;  %v2324_v58 = vunpack.i.h.s16 %v2318_v54  ;;  %v4943_v47 = vpack.i.b16 %v2318_v54, %v2318_v54  ;;  %v2289_v31 = vpop.f32.mrf.mxu2  ;;  %v2356_v11 = vld [vmem:[%s5696_s6 + $0x8] sm:$0x8]  ;;  %2975 = vmatpush.bf16.msra.mxu3 %v2966_v44 }
 0x430   : > { %v2359_v50 = vld [vmem:[%s5696_s6 + $0x10] sm:$0x8] }
 0x431   : > { %v2326_v59 = vunpack.i.h.s16 %v2322_v55  ;;  %v2328_v28 = vpack.i.b16 %v2324_v58, %v2324_v58  ;;  %v4944_v33 = vpack.i.b16 %v2322_v55, %v2322_v55  ;;  %v2334_v49 = vperm.slane %v4943_v47, %v5959_v16  ;;  %v2398_v61 = vpop.f32.mrf.mxu0  ;;  %v2484_v20 = vpop.f32.mrf.mxu3  ;;  %v2362_v1 = vld [vmem:[%s5696_s6 + $0x18] sm:$0x8] }
 0x432   : > { %v2423_v32 = vadd.f32 %v2422_v60, %v2398_v61  ;;  %v2932_v55 = vsel %vm258_vm0, %v5832_v29, 0 }
 0x433   : > { %v2330_v8 = vpack.i.b16 %v2326_v59, %v2326_v59  ;;  %v2338_v3 = vperm.slane %v2328_v28, %v5959_v16  ;;  %v2342_v4 = vperm.slane %v4944_v33, %v5959_v16  ;;  %v2354_v6 = vsel %vm6382_vm10, %v2334_v49, %v2353_v2  ;;  %v2554_v34 = vpop.f32.mrf.mxu1  ;;  %2941 = vmatpush.bf16.msra.mxu2 %v2932_v55  ;;  %v5377_v55 = vld [vmem:[%s6850_s1 + $0x20] sm:$0xff] }
 0x434   : > { %2355 = vst [vmem:[%s5696_s6] sm:$0x8] %v2354_v6 }
 0x435   : > { %v2346_v15 = vperm.slane %v2330_v8, %v5959_v16  ;;  %v2357_v57 = vsel %vm6382_vm10, %v2338_v3, %v2356_v11  ;;  %v2360_v30 = vsel %vm6382_vm10, %v2342_v4, %v2359_v50  ;;  %v2672_v4 = vpop.permute.xlu1 %2671  ;;  %v3061_v50 = vpop.permute.xlu2 %3060 }
 0x436   : > { %2358 = vst [vmem:[%s5696_s6 + $0x8] sm:$0x8] %v2357_v57 }
 0x437   : > { %2361 = vst [vmem:[%s5696_s6 + $0x10] sm:$0x8] %v2360_v30  ;;  %v2363_v21 = vsel %vm6382_vm10, %v2346_v15, %v2362_v1  ;;  %v2454_v25 = vpop.f32.mrf.mxu2  ;;  %v3066_v30 = vsel %vm258_vm0, %v3061_v50, 0 }
 0x438   : > { %2364 = vst [vmem:[%s5696_s6 + $0x18] sm:$0x8] %v2363_v21  ;;  %v2459_v39 = vadd.f32 %v2454_v25, %v2421_v5 }
 0x439   : > { %v2518_v22 = vpop.f32.mrf.mxu0  ;;  %v2486_v40 = vpop.f32.mrf.mxu3 }
 0x43a   : > { %v2489_v43 = vadd.f32 %v2484_v20, %v2459_v39  ;;  %v2996_v20 = vsel %vm258_vm0, %v5840_v35, 0 }
 0x43b   : > { %v2556_v0 = vpop.f32.mrf.mxu1  ;;  %3005 = vmatpush.bf16.msrb.mxu0 %v2996_v20  ;;  %v2774_v20 = vld [vmem:[%s5696_s6 + $0x4] sm:$0x1] }
 0x43c   : > { %v2523_v54 = vadd.f32 %v2518_v22, %v2489_v43  ;;  %v3126_v22 = vpop.permute.xlu0 %3125 }
 0x43d   : > { %v3025_v19 = vpop.permute.xlu1 %3024  ;;  %v3131_v39 = vsel %vm258_vm0, %v3126_v22, 0 }
 0x43e   : > { %v2559_v58 = vadd.f32 %v2554_v34, %v2523_v54  ;;  %v3030_v5 = vsel %vm258_vm0, %v3025_v19, 0  ;;  %v5376_v54 = vld [vmem:[%s6850_s1 + $0x18] sm:$0xff] }
 0x43f   : > { %v2456_v51 = vpop.f32.mrf.mxu2  ;;  %v2783_v19 = vld [vmem:[%s5696_s6 + $0x1c] sm:$0x1] }
 0x440   : > { %v2460_v23 = vadd.f32 %v2456_v51, %v2423_v32  ;;  %v5373_v51 = vld [vmem:[%s6850_s1] sm:$0xff]  ;;  %v5374_v32 = vld [vmem:[%s6850_s1 + $0x8] sm:$0xff] }
 0x441   : > { %v2520_v53 = vpop.f32.mrf.mxu0  ;;  %v2619_v31 = vpop.f32.mrf.mxu3 }
 0x442   : > { %v2490_v47 = vadd.f32 %v2486_v40, %v2460_v23  ;;  %v5378_v23 = vld [vmem:[%s6850_s1 + $0x28] sm:$0xff] }
 0x444   : > { %v2524_v33 = vadd.f32 %v2520_v53, %v2490_v47  ;;  %v5379_v47 = vld [vmem:[%s6850_s1 + $0x30] sm:$0xff] }
 0x445   : > { %v3162_v34 = vpop.permute.xlu1 %3161 }
 0x446   : > { %v2560_v2 = vadd.f32 %v2556_v0, %v2524_v33  ;;  %v3167_v53 = vsel %vm258_vm0, %v3162_v34, 0 }
 0x447   : > { %v2585_v24 = vpop.f32.mrf.mxu2 }
 0x448   : > { %v2590_v59 = vadd.f32 %v2585_v24, %v2559_v58  ;;  %v5380_v58 = vld [vmem:[%s6850_s1 + $0x38] sm:$0xff]  ;;  %v5381_v24 = vld [vmem:[%s6850_s1 + $0x40] sm:$0xff] }
 0x449   : > { %v2655_v28 = vpop.f32.mrf.mxu0  ;;  %v2621_v11 = vpop.f32.mrf.mxu3 }
 0x44a   : > { %v2624_v49 = vadd.f32 %v2619_v31, %v2590_v59 }
 0x44c   : > { %v2660_v61 = vadd.f32 %v2655_v28, %v2624_v49 }
 0x44e   : > { %v2674_v8 = vadd.f32 %v2667_v17, %v2660_v61 }
 0x44f   : > { %v2587_v3 = vpop.f32.mrf.mxu2 }
 0x450   : > { %vm2676_vm12 = vcmp.gt.f32.partialorder %v2674_v8, 0.0  ;;  %v2678_v6 = vmul.f32 %v2674_v8, %v5874_v42  ;;  %v2591_v29 = vadd.f32 %v2587_v3, %v2560_v2 }
 0x451   : > { %v2657_v1 = vpop.f32.mrf.mxu0 }
 0x452   : > { %v2680_v15 = vsel %vm2676_vm12, %v2674_v8, %v2678_v6  ;;  %v2625_v57 = vadd.f32 %v2621_v11, %v2591_v29 }
 0x453   : > { %v2682_v37 = vpack.c.bf16 %v2680_v15, %v2680_v15 }
 0x454   : > { %v2661_v14 = vadd.f32 %v2657_v1, %v2625_v57  ;;  %v2780_v1 = vld [vmem:[%s5696_s6 + $0x14] sm:$0x1] }
 0x455   : > { %v2689_v17 = vunpack.c.l.b16 %v2682_v37  ;;  %5017 = vmatmul.msk.bf16.vlgmr.msrb.gmra.mxu2 %vm583_vm3, %v2682_v37  ;;  %v2777_v37 = vld [vmem:[%s5696_s6 + $0xc] sm:$0x1] }
 0x456   : > { %v2675_v21 = vadd.f32 %v2672_v4, %v2661_v14  ;;  %3075 = vmatpush.bf16.msrb.mxu2 %v3066_v30 }
 0x457   : > { %v2690_v25 = vpack.c.b16 %v2689_v17, %v2689_v17 }
 0x458   : > { %vm2677_vm13 = vcmp.gt.f32.partialorder %v2675_v21, 0.0  ;;  %v2679_v35 = vmul.f32 %v2675_v21, %v5874_v42 }
 0x459   : > { %v2691_v60 = vrot.slane %v2690_v25, 2 }
 0x45a   : > { %v2681_v38 = vsel %vm2677_vm13, %v2675_v21, %v2679_v35 }
 0x45b   : > { %v2683_v40 = vpack.c.bf16 %v2681_v38, %v2681_v38  ;;  %5012 = vmatmul.msk.bf16.vlgmr.msrb.gmra.mxu1 %vm583_vm3, %v2691_v60 }
 0x45c   : > { %3039 = vmatpush.bf16.msrb.mxu1 %v3030_v5 }
 0x45d   : > { %v2791_v41 = vunpack.c.l.b16 %v2683_v40  ;;  %5031 = vmatmul.msk.bf16.vlgmr.msra.gmra.mxu0 %vm583_vm3, %v2683_v40 }
 0x45e   : > { %3140 = vmatpush.bf16.msra.mxu0 %v3131_v39 }
 0x45f   : > { %v2792_v43 = vpack.c.b16 %v2791_v41, %v2791_v41 }
 0x461   : > { %v2793_v44 = vrot.slane %v2792_v43, 2 }
 0x463   : > { %5026 = vmatmul.msk.bf16.vlgmr.msrb.gmra.mxu3 %vm583_vm3, %v2793_v44 }
 0x464   : > { %3106 = vmatpush.bf16.msrb.mxu3 %v3097_v52 }
 0x465   : > { %5045 = vmatmul.msk.bf16.vlgmr.msra.gmra.mxu2 %vm254_vm1, %v5373_v51 }
 0x46b   : > { %5040 = vmatmul.msk.bf16.vlgmr.msra.gmra.mxu1 %vm254_vm1, %v5374_v32 }
 0x46c   : > { %3176 = vmatpush.bf16.msra.mxu1 %v3167_v53 }
 0x46d   : > { %5059 = vmatmul.msk.bf16.vlgmr.msrb.gmra.mxu0 %vm254_vm1, %v5376_v54 }
 0x473   : > { %5052 = vmatmul.msk.bf16.vlgmr.msra.gmra.mxu3 %vm254_vm1, %v5375_v46 }
 0x475   : > { %5073 = vmatmul.msk.bf16.vlgmr.msrb.gmra.mxu2 %vm254_vm1, %v5378_v23 }
 0x47b   : > { %5066 = vmatmul.msk.bf16.vlgmr.msrb.gmra.mxu1 %vm254_vm1, %v5377_v55 }
 0x47d   : > { %5087 = vmatmul.msk.bf16.vlgmr.msra.gmra.mxu0 %vm254_vm1, %v5380_v58 }
 0x483   : > { %5080 = vmatmul.msk.bf16.vlgmr.msrb.gmra.mxu3 %vm254_vm1, %v5379_v47  ;;  %v5382_v47 = vld [vmem:[%s6852_s3] sm:$0xff] }
 0x484   : > { %3253 = vmatpush.bf16.msra.mxu3 %v5382_v47 }
 0x48b   : > { %5094 = vmatmul.msk.bf16.vlgmr.msra.gmra.mxu1 %vm254_vm1, %v5381_v24 }
 0x4d8   : > { %v2710_v31 = vpop.f32.mrf.mxu1  ;;  %v2732_v59 = vpop.f32.mrf.mxu2 }
 0x4d9   : > { %v2733_v28 = vadd.f32 %v2732_v59, %v2710_v31 }
 0x4da   : > { %v2834_v33 = vpop.f32.mrf.mxu0 }
 0x4db   : > { %v2736_v49 = vpack.c.bf16 %v2733_v28, %v2733_v28 }
 0x4dd   : > { %v2738_v0 = vrot.slane %v2736_v49, 3 }
 0x4df   : > { %v2741_v61 = vsel %vm625_vm5, %v2736_v49, %v2738_v0  ;;  %v2743_v2 = vsel %vm630_vm6, %v2736_v49, %v2738_v0 }
 0x4e0   : > { %v2745_v8 = vrot.slane %v2743_v2, 1  ;;  %v2747_v3 = vunpack.i.h.s16 %v2741_v61  ;;  %v5018_v4 = vpack.i.b16 %v2741_v61, %v2741_v61  ;;  %v2712_v6 = vpop.f32.mrf.mxu1  ;;  %v2734_v29 = vpop.f32.mrf.mxu2 }
 0x4e1   : > { %v3426_v6 = vpop.permute.xlu1 %3425 }
 0x4e2   : > { %v2749_v11 = vunpack.i.h.s16 %v2745_v8  ;;  %v2751_v50 = vpack.i.b16 %v2747_v3, %v2747_v3  ;;  %v5019_v15 = vpack.i.b16 %v2745_v8, %v2745_v8  ;;  %v2757_v57 = vperm.slane %v5018_v4, %v5959_v16  ;;  %v2836_v30 = vpop.f32.mrf.mxu0  ;;  %v3195_v4 = vpop.permute.xlu0 %3194 }
 0x4e4   : > { %v2753_v14 = vpack.i.b16 %v2749_v11, %v2749_v11  ;;  %v2761_v17 = vperm.slane %v2751_v50, %v5959_v16  ;;  %v2765_v21 = vperm.slane %v5019_v15, %v5959_v16  ;;  %v2775_v25 = vsel %vm5964_vm9, %v2757_v57, %v2774_v20  ;;  %v5383_v15 = vld [vmem:[%s6852_s3 + $0x8] sm:$0xff] }
 0x4e5   : > { %2776 = vst [vmem:[%s5696_s6 + $0x4] sm:$0x1] %v2775_v25  ;;  %v3431_v20 = vsel %vm258_vm0, %v3426_v6, 0  ;;  %3231 = vmatpush.bf16.msra.mxu2 %v5383_v15 }
 0x4e6   : > { %v2769_v35 = vperm.slane %v2753_v14, %v5959_v16  ;;  %v2778_v5 = vsel %vm5964_vm9, %v2761_v17, %v2777_v37  ;;  %v2781_v60 = vsel %vm5964_vm9, %v2765_v21, %v2780_v1  ;;  %v2812_v22 = vpop.f32.mrf.mxu3  ;;  %v5384_v1 = vld [vmem:[%s6852_s3] sm:$0xff] }
 0x4e7   : > { %2779 = vst [vmem:[%s5696_s6 + $0xc] sm:$0x1] %v2778_v5  ;;  %v2835_v38 = vadd.f32 %v2834_v33, %v2812_v22  ;;  %3355 = vmatpush.bf16.msrb.mxu1 %v5384_v1 }
 0x4e8   : > { %2782 = vst [vmem:[%s5696_s6 + $0x14] sm:$0x1] %v2781_v60  ;;  %v2784_v39 = vsel %vm5964_vm9, %v2769_v35, %v2783_v19  ;;  %v2919_v40 = vpop.f32.mrf.mxu1  ;;  %v2943_v53 = vpop.f32.mrf.mxu2  ;;  %v5385_v35 = vld [vmem:[%s6852_s3 + $0x8] sm:$0xff] }
 0x4e9   : > { %2785 = vst [vmem:[%s5696_s6 + $0x1c] sm:$0x1] %v2784_v39  ;;  %v2838_v41 = vpack.c.bf16 %v2835_v38, %v2835_v38  ;;  %v2944_v57 = vadd.f32 %v2943_v53, %v2919_v40  ;;  %3440 = vmatpush.bf16.msrb.mxu2 %v3431_v20  ;;  %3333 = vmatpush.bf16.msrb.mxu0 %v5385_v35  ;;  %v3455_v40 = vsel %vm258_vm0, %v5868_v12, 0  ;;  %v5391_v35 = vld [vmem:[%s6850_s1 + $0x28] sm:$0xff] }
 0x4ea   : > { %v3007_v49 = vpop.f32.mrf.mxu0  ;;  %v3484_v7 = vpop.permute.xlu0 %3483  ;;  %3464 = vmatpush.bf16.msrb.mxu3 %v3455_v40 }
 0x4eb   : > { %v2840_v43 = vrot.slane %v2838_v41, 3  ;;  %v3489_v25 = vsel %vm258_vm0, %v3484_v7, 0  ;;  %v5387_v7 = vld [vmem:[%s6850_s1 + $0x8] sm:$0xff] }
 0x4ec   : > { %v2876_v24 = vld [vmem:[%s5696_s6 + $0x4] sm:$0x1] }
 0x4ed   : > { %v2843_v44 = vsel %vm625_vm5, %v2838_v41, %v2840_v43  ;;  %v2845_v51 = vsel %vm630_vm6, %v2838_v41, %v2840_v43  ;;  %3498 = vmatpush.bf16.msra.mxu0 %v3489_v25 }
 0x4ee   : > { %v2847_v52 = vrot.slane %v2845_v51, 1  ;;  %v2849_v32 = vunpack.i.h.s16 %v2843_v44  ;;  %v5032_v34 = vpack.i.b16 %v2843_v44, %v2843_v44  ;;  %v2814_v54 = vpop.f32.mrf.mxu3  ;;  %v2879_v0 = vld [vmem:[%s5696_s6 + $0xc] sm:$0x1] }
 0x4ef   : > { %v2882_v61 = vld [vmem:[%s5696_s6 + $0x14] sm:$0x1] }
 0x4f0   : > { %v2851_v46 = vunpack.i.h.s16 %v2847_v52  ;;  %v2853_v26 = vpack.i.b16 %v2849_v32, %v2849_v32  ;;  %v5033_v23 = vpack.i.b16 %v2847_v52, %v2847_v52  ;;  %v2859_v55 = vperm.slane %v5032_v34, %v5959_v16  ;;  %v2921_v58 = vpop.f32.mrf.mxu1  ;;  %v2885_v29 = vld [vmem:[%s5696_s6 + $0x1c] sm:$0x1]  ;;  %v2945_v30 = vpop.f32.mrf.mxu2 }
 0x4f1   : > { %v2946_v5 = vadd.f32 %v2945_v30, %v2921_v58 }
 0x4f2   : > { %v2855_v31 = vpack.i.b16 %v2851_v46, %v2851_v46  ;;  %v2863_v59 = vperm.slane %v2853_v26, %v5959_v16  ;;  %v2867_v28 = vperm.slane %v5033_v23, %v5959_v16  ;;  %v2877_v33 = vsel %vm5991_vm11, %v2859_v55, %v2876_v24  ;;  %v3009_v17 = vpop.f32.mrf.mxu0  ;;  %v3190_v23 = vpop.permute.xlu2 %3189 }
 0x4f3   : > { %2878 = vst [vmem:[%s5696_s6 + $0x4] sm:$0x1] %v2877_v33  ;;  %v3519_v46 = vsel %vm258_vm0, %v5881_v62, 0 }
 0x4f4   : > { %v2871_v2 = vperm.slane %v2855_v31, %v5959_v16  ;;  %v2880_v8 = vsel %vm5991_vm11, %v2863_v59, %v2879_v0  ;;  %v2883_v3 = vsel %vm5991_vm11, %v2867_v28, %v2882_v61  ;;  %3528 = vmatpush.bf16.msra.mxu1 %v3519_v46  ;;  %v3584_v59 = vpop.permute.xlu1 %3583 }
 0x4f5   : > { %2881 = vst [vmem:[%s5696_s6 + $0xc] sm:$0x1] %v2880_v8 }
 0x4f6   : > { %2884 = vst [vmem:[%s5696_s6 + $0x14] sm:$0x1] %v2883_v3  ;;  %v2886_v11 = vsel %vm5991_vm11, %v2871_v2, %v2885_v29  ;;  %v2977_v50 = vpop.f32.mrf.mxu3 }
 0x4f7   : > { %2887 = vst [vmem:[%s5696_s6 + $0x1c] sm:$0x1] %v2886_v11  ;;  %v2982_v14 = vadd.f32 %v2977_v50, %v2944_v57  ;;  %v3649_v50 = vpop.permute.xlu0 %3648 }
 0x4f8   : > { %v3041_v37 = vpop.f32.mrf.mxu1  ;;  %v3077_v60 = vpop.f32.mrf.mxu2  ;;  %v3654_v57 = vsel %vm258_vm0, %v3649_v50, 0 }
 0x4f9   : > { %v3012_v21 = vadd.f32 %v3007_v49, %v2982_v14  ;;  %v3589_v49 = vsel %vm258_vm0, %v3584_v59, 0  ;;  %v5386_v14 = vld [vmem:[%s6850_s1] sm:$0xff] }
 0x4fa   : > { %v3142_v51 = vpop.f32.mrf.mxu0  ;;  %v3548_v6 = vpop.permute.xlu2 %3547  ;;  %v3297_v59 = vld [vmem:[%s5696_s6 + $0x4] sm:$0x2] }
 0x4fb   : > { %v3046_v38 = vadd.f32 %v3041_v37, %v3012_v21  ;;  %v3553_v20 = vsel %vm258_vm0, %v3548_v6, 0 }
 0x4fd   : > { %v3082_v41 = vadd.f32 %v3077_v60, %v3046_v38  ;;  %v5393_v60 = vld [vmem:[%s6850_s1 + $0x38] sm:$0xff]  ;;  %v5394_v38 = vld [vmem:[%s6850_s1 + $0x40] sm:$0xff] }
 0x4fe   : > { %v2979_v19 = vpop.f32.mrf.mxu3 }
 0x4ff   : > { %v2983_v39 = vadd.f32 %v2979_v19, %v2946_v5  ;;  %v5389_v19 = vld [vmem:[%s6850_s1 + $0x18] sm:$0xff]  ;;  %v5390_v5 = vld [vmem:[%s6850_s1 + $0x20] sm:$0xff] }
 0x500   : > { %v3043_v22 = vpop.f32.mrf.mxu1  ;;  %v3079_v54 = vpop.f32.mrf.mxu2 }
 0x501   : > { %v3013_v43 = vadd.f32 %v3009_v17, %v2983_v39  ;;  %v3620_v17 = vsel %vm258_vm0, %v5900_v27, 0  ;;  %v5388_v27 = vld [vmem:[%s6850_s1 + $0x10] sm:$0xff]  ;;  %v4195_v39 = vld [vmem:[#allocation2 + $0x12] sm:$0x3] }
 0x502   : > { %v3144_v31 = vpop.f32.mrf.mxu0  ;;  %v3685_v21 = vpop.permute.xlu2 %3684  ;;  %4204 = vst [vmem:[#allocation1] ss:$4 sm:$0xff] %v4195_v39 }
 0x503   : > { %v3047_v34 = vadd.f32 %v3043_v22, %v3013_v43  ;;  %v3690_v25 = vsel %vm258_vm0, %v3685_v21, 0  ;;  %v5392_v22 = vld [vmem:[%s6850_s1 + $0x30] sm:$0xff] }
 0x505   : > { %v3083_v55 = vadd.f32 %v3079_v54, %v3047_v34 }
 0x506   : > { %v3108_v44 = vpop.f32.mrf.mxu3 }
 0x507   : > { %v3113_v52 = vadd.f32 %v3108_v44, %v3082_v41 }
 0x508   : > { %v3178_v32 = vpop.f32.mrf.mxu1 }
 0x509   : > { %v3147_v53 = vadd.f32 %v3142_v51, %v3113_v52  ;;  %v4205_v40 = vld.sshfl [vmem:[#allocation1] sm:$0xff pattern:$0x73625140] }
 0x50a   : > { %4207 = vrot.lane.b32.xlu2 %v4205_v40, %s5574_s10  ;;  %v5395_v40 = vld [vmem:[%s6852_s3] sm:$0xff] }
 0x50b   : > { %v3183_v26 = vadd.f32 %v3178_v32, %v3147_v53 }
 0x50d   : > { %v3197_v58 = vadd.f32 %v3190_v23, %v3183_v26 }
 0x50e   : > { %v3110_v47 = vpop.f32.mrf.mxu3 }
 0x50f   : > { %vm3199_vm9 = vcmp.gt.f32.partialorder %v3197_v58, 0.0  ;;  %v3201_v12 = vmul.f32 %v3197_v58, %v5874_v42  ;;  %v3114_v24 = vadd.f32 %v3110_v47, %v3083_v55 }
 0x510   : > { %v3180_v61 = vpop.f32.mrf.mxu1 }
 0x511   : > { %v3203_v28 = vsel %vm3199_vm9, %v3197_v58, %v3201_v12  ;;  %v3148_v33 = vadd.f32 %v3144_v31, %v3114_v24 }
 0x512   : > { %v3205_v0 = vpack.c.bf16 %v3203_v28, %v3203_v28 }
 0x513   : > { %v3184_v2 = vadd.f32 %v3180_v61, %v3148_v33 }
 0x514   : > { %v3212_v62 = vunpack.c.l.b16 %v3205_v0  ;;  %5106 = vmatmul.msk.bf16.vlgmr.msra.gmra.mxu3 %vm583_vm3, %v3205_v0 }
 0x515   : > { %v3198_v8 = vadd.f32 %v3195_v4, %v3184_v2  ;;  %3598 = vmatpush.bf16.msra.mxu3 %v3589_v49 }
 0x516   : > { %v3213_v3 = vpack.c.b16 %v3212_v62, %v3212_v62 }
 0x517   : > { %vm3200_vm11 = vcmp.gt.f32.partialorder %v3198_v8, 0.0  ;;  %v3202_v29 = vmul.f32 %v3198_v8, %v5874_v42 }
 0x518   : > { %v3214_v11 = vrot.slane %v3213_v3, 2  ;;  %v3303_v3 = vld [vmem:[%s5696_s6 + $0x14] sm:$0x2] }
 0x519   : > { %v3204_v15 = vsel %vm3200_vm11, %v3198_v8, %v3202_v29  ;;  %v3300_v8 = vld [vmem:[%s5696_s6 + $0xc] sm:$0x2] }
 0x51a   : > { %v3206_v30 = vpack.c.bf16 %v3204_v15, %v3204_v15  ;;  %5101 = vmatmul.msk.bf16.vlgmr.msra.gmra.mxu2 %vm583_vm3, %v3214_v11  ;;  %v3306_v15 = vld [vmem:[%s5696_s6 + $0x1c] sm:$0x2] }
 0x51b   : > { %3562 = vmatpush.bf16.msra.mxu2 %v3553_v20 }
 0x51c   : > { %v3314_v37 = vunpack.c.l.b16 %v3206_v30  ;;  %5120 = vmatmul.msk.bf16.vlgmr.msrb.gmra.mxu1 %vm583_vm3, %v3206_v30 }
 0x51d   : > { %3663 = vmatpush.bf16.msrb.mxu1 %v3654_v57 }
 0x51e   : > { %v3315_v4 = vpack.c.b16 %v3314_v37, %v3314_v37 }
 0x520   : > { %v3316_v1 = vrot.slane %v3315_v4, 2 }
 0x522   : > { %5115 = vmatmul.msk.bf16.vlgmr.msrb.gmra.mxu0 %vm583_vm3, %v3316_v1 }
 0x523   : > { %3629 = vmatpush.bf16.msrb.mxu0 %v3620_v17 }
 0x524   : > { %5134 = vmatmul.msk.bf16.vlgmr.msrb.gmra.mxu3 %vm254_vm1, %v5386_v14 }
 0x52a   : > { %5129 = vmatmul.msk.bf16.vlgmr.msrb.gmra.mxu2 %vm254_vm1, %v5387_v7 }
 0x52b   : > { %3699 = vmatpush.bf16.msrb.mxu2 %v3690_v25 }
 0x52c   : > { %5148 = vmatmul.msk.bf16.vlgmr.msra.gmra.mxu1 %vm254_vm1, %v5389_v19 }
 0x532   : > { %5141 = vmatmul.msk.bf16.vlgmr.msra.gmra.mxu0 %vm254_vm1, %v5388_v27 }
 0x533   : > { %3776 = vmatpush.bf16.msra.mxu0 %v5395_v40 }
 0x534   : > { %5162 = vmatmul.msk.bf16.vlgmr.msra.gmra.mxu3 %vm254_vm1, %v5391_v35 }
 0x53a   : > { %5155 = vmatmul.msk.bf16.vlgmr.msra.gmra.mxu2 %vm254_vm1, %v5390_v5 }
 0x53c   : > { %5176 = vmatmul.msk.bf16.vlgmr.msrb.gmra.mxu1 %vm254_vm1, %v5393_v60 }
 0x542   : > { %5169 = vmatmul.msk.bf16.vlgmr.msrb.gmra.mxu0 %vm254_vm1, %v5392_v22 }
 0x54a   : > { %5183 = vmatmul.msk.bf16.vlgmr.msrb.gmra.mxu2 %vm254_vm1, %v5394_v38 }
 0x597   : > { %v3255_v41 = vpop.f32.mrf.mxu3 }
 0x599   : > { %v3357_v43 = vpop.f32.mrf.mxu1 }
 0x59d   : > { %v3233_v44 = vpop.f32.mrf.mxu2 }
 0x59e   : > { %v3256_v51 = vadd.f32 %v3255_v41, %v3233_v44 }
 0x59f   : > { %v3257_v52 = vpop.f32.mrf.mxu3  ;;  %v3335_v32 = vpop.f32.mrf.mxu0 }
 0x5a0   : > { %v3259_v34 = vpack.c.bf16 %v3256_v51, %v3256_v51  ;;  %v3358_v53 = vadd.f32 %v3357_v43, %v3335_v32 }
 0x5a1   : > { %v3359_v54 = vpop.f32.mrf.mxu1 }
 0x5a2   : > { %v3261_v46 = vrot.slane %v3259_v34, 3  ;;  %v3361_v26 = vpack.c.bf16 %v3358_v53, %v3358_v53 }
 0x5a4   : > { %v3264_v23 = vsel %vm625_vm5, %v3259_v34, %v3261_v46  ;;  %v3266_v55 = vsel %vm630_vm6, %v3259_v34, %v3261_v46  ;;  %v3363_v58 = vrot.slane %v3361_v26, 3 }
 0x5a5   : > { %v3268_v47 = vrot.slane %v3266_v55, 1  ;;  %v3270_v12 = vunpack.i.h.s16 %v3264_v23  ;;  %v5107_v24 = vpack.i.b16 %v3264_v23, %v3264_v23  ;;  %v3235_v31 = vpop.f32.mrf.mxu2  ;;  %v5396_v55 = vld [vmem:[%s6852_s3 + $0x8] sm:$0xff] }
 0x5a6   : > { %v3366_v28 = vsel %vm625_vm5, %v3361_v26, %v3363_v58  ;;  %v3368_v33 = vsel %vm630_vm6, %v3361_v26, %v3363_v58  ;;  %v3949_v26 = vpop.permute.xlu0 %3948  ;;  %3754 = vmatpush.bf16.msrb.mxu3 %v5396_v55  ;;  %v4143_v55 = vsel %vm258_vm0, %v5952_v63, 0  ;;  %v5401_v63 = vld [vmem:[%s6850_s1 + $0x10] sm:$0xff] }
 0x5a7   : > { %v3272_v49 = vunpack.i.h.s16 %v3268_v47  ;;  %v3274_v0 = vpack.i.b16 %v3270_v12, %v3270_v12  ;;  %v5108_v61 = vpack.i.b16 %v3268_v47, %v3268_v47  ;;  %v3280_v2 = vperm.slane %v5107_v24, %v5959_v16  ;;  %v3337_v62 = vpop.f32.mrf.mxu0  ;;  %v3466_v21 = vpop.f32.mrf.mxu3  ;;  %v5397_v12 = vld [vmem:[%s6852_s3] sm:$0xff] }
 0x5a8   : > { %v3370_v6 = vrot.slane %v3368_v33, 1  ;;  %v3372_v57 = vunpack.i.h.s16 %v3366_v28  ;;  %v5121_v14 = vpack.i.b16 %v3366_v28, %v3366_v28  ;;  %v3954_v23 = vsel %vm258_vm0, %v3949_v26, 0  ;;  %3878 = vmatpush.bf16.msra.mxu2 %v5397_v12  ;;  %v5402_v12 = vld [vmem:[%s6850_s1 + $0x18] sm:$0xff] }
 0x5a9   : > { %v3276_v29 = vpack.i.b16 %v3272_v49, %v3272_v49  ;;  %v3284_v20 = vperm.slane %v3274_v0, %v5959_v16  ;;  %v3288_v11 = vperm.slane %v5108_v61, %v5959_v16  ;;  %v3298_v50 = vsel %vm6115_vm2, %v3280_v2, %v3297_v59  ;;  %v3530_v32 = vpop.f32.mrf.mxu1  ;;  %v5398_v49 = vld [vmem:[%s6852_s3 + $0x8] sm:$0xff]  ;;  %v3713_v0 = vpop.permute.xlu1 %3712 }
 0x5aa   : > { %3299 = vst [vmem:[%s5696_s6 + $0x4] sm:$0x2] %v3298_v50  ;;  %v3374_v1 = vunpack.i.h.s16 %v3370_v6  ;;  %v3376_v25 = vpack.i.b16 %v3372_v57, %v3372_v57  ;;  %v5122_v19 = vpack.i.b16 %v3370_v6, %v3370_v6  ;;  %v3382_v35 = vperm.slane %v5121_v14, %v5959_v16  ;;  %3963 = vmatpush.bf16.msra.mxu3 %v3954_v23  ;;  %v5399_v23 = vld [vmem:[%s6850_s1] sm:$0xff] }
 0x5ab   : > { %v3292_v30 = vperm.slane %v3276_v29, %v5959_v16  ;;  %v3301_v37 = vsel %vm6115_vm2, %v3284_v20, %v3300_v8  ;;  %v3304_v4 = vsel %vm6115_vm2, %v3288_v11, %v3303_v3  ;;  %3856 = vmatpush.bf16.msra.mxu1 %v5398_v49  ;;  %v3718_v8 = vpop.permute.xlu2 %3717 }
 0x5ac   : > { %3302 = vst [vmem:[%s5696_s6 + $0xc] sm:$0x2] %v3301_v37  ;;  %v3378_v27 = vpack.i.b16 %v3374_v1, %v3374_v1  ;;  %v3386_v22 = vperm.slane %v3376_v25, %v5959_v16  ;;  %v3390_v38 = vperm.slane %v5122_v19, %v5959_v16  ;;  %v4042_v1 = vsel %vm258_vm0, %v5942_v56, 0 }
 0x5ad   : > { %3305 = vst [vmem:[%s5696_s6 + $0x14] sm:$0x2] %v3304_v4  ;;  %v3307_v17 = vsel %vm6115_vm2, %v3292_v30, %v3306_v15  ;;  %v3442_v7 = vpop.f32.mrf.mxu2  ;;  %4051 = vmatpush.bf16.msrb.mxu2 %v4042_v1  ;;  %v3820_v1 = vld [vmem:[%s5696_s6 + $0x4] sm:$0x4] }
 0x5ae   : > { %3308 = vst [vmem:[%s5696_s6 + $0x1c] sm:$0x2] %v3307_v17  ;;  %v3394_v41 = vperm.slane %v3378_v27, %v5959_v16  ;;  %v3467_v54 = vadd.f32 %v3466_v21, %v3442_v7  ;;  %v3978_v17 = vsel %vm258_vm0, %v5923_v48, 0 }
 0x5af   : > { %v3500_v5 = vpop.f32.mrf.mxu0  ;;  %v3468_v46 = vpop.f32.mrf.mxu3  ;;  %3987 = vmatpush.bf16.msrb.mxu0 %v3978_v17 }
 0x5b0   : > { %v3505_v58 = vadd.f32 %v3500_v5, %v3467_v54 }
 0x5b1   : > { %v3399_v60 = vld [vmem:[%s5696_s6 + $0x4] sm:$0x2]  ;;  %v3532_v59 = vpop.f32.mrf.mxu1  ;;  %v4071_v15 = vpop.permute.xlu1 %4070 }
 0x5b2   : > { %v3400_v36 = vsel %vm6142_vm7, %v3382_v35, %v3399_v60  ;;  %v3535_v24 = vadd.f32 %v3530_v32, %v3505_v58  ;;  %v5400_v58 = vld [vmem:[%s6850_s1 + $0x8] sm:$0xff] }
 0x5b3   : > { %3401 = vst [vmem:[%s5696_s6 + $0x4] sm:$0x2] %v3400_v36  ;;  %v3402_v39 = vld [vmem:[%s5696_s6 + $0xc] sm:$0x2]  ;;  %v4007_v14 = vpop.permute.xlu2 %4006 }
 0x5b4   : > { %v3403_v43 = vsel %vm6142_vm7, %v3386_v22, %v3402_v39  ;;  %v3405_v44 = vld [vmem:[%s5696_s6 + $0x14] sm:$0x2]  ;;  %v4012_v21 = vsel %vm258_vm0, %v4007_v14, 0 }
 0x5b5   : > { %3404 = vst [vmem:[%s5696_s6 + $0xc] sm:$0x2] %v3403_v43  ;;  %v3406_v51 = vsel %vm6142_vm7, %v3390_v38, %v3405_v44  ;;  %v3408_v52 = vld [vmem:[%s5696_s6 + $0x1c] sm:$0x2]  ;;  %v3444_v34 = vpop.f32.mrf.mxu2  ;;  %4021 = vmatpush.bf16.msrb.mxu1 %v4012_v21  ;;  %v4076_v44 = vsel %vm258_vm0, %v4071_v15, 0 }
 0x5b6   : > { %3407 = vst [vmem:[%s5696_s6 + $0x14] sm:$0x2] %v3406_v51  ;;  %v3409_v53 = vsel %vm6142_vm7, %v3394_v41, %v3408_v52  ;;  %v3469_v31 = vadd.f32 %v3468_v46, %v3444_v34  ;;  %v4172_v52 = vpop.permute.xlu0 %4171 }
 0x5b7   : > { %3410 = vst [vmem:[%s5696_s6 + $0x1c] sm:$0x2] %v3409_v53  ;;  %v3502_v47 = vpop.f32.mrf.mxu0  ;;  %v3600_v28 = vpop.f32.mrf.mxu3  ;;  %v4177_v34 = vsel %vm258_vm0, %v4172_v52, 0 }
 0x5b8   : > { %v3506_v61 = vadd.f32 %v3502_v47, %v3469_v31  ;;  %v5403_v31 = vld [vmem:[%s6850_s1 + $0x20] sm:$0xff] }
 0x5b9   : > { %v3665_v29 = vpop.f32.mrf.mxu1  ;;  %v4107_v5 = vpop.permute.xlu1 %4106 }
 0x5ba   : > { %v3536_v6 = vadd.f32 %v3532_v59, %v3506_v61  ;;  %v4112_v56 = vsel %vm258_vm0, %v4107_v5, 0  ;;  %v5406_v59 = vld [vmem:[%s6850_s1 + $0x38] sm:$0xff]  ;;  %v3823_v5 = vld [vmem:[%s5696_s6 + $0xc] sm:$0x4] }
 0x5bb   : > { %v4208_v47 = vpop.permute.xlu2 %4207 }
 0x5bd   : > { %v3564_v45 = vpop.f32.mrf.mxu2 }
 0x5be   : > { %v3569_v33 = vadd.f32 %v3564_v45, %v3535_v24  ;;  %v4213_v45 = vsel %vm258_vm0, %v4208_v47, 0  ;;  %v5404_v24 = vld [vmem:[%s6850_s1 + $0x28] sm:$0xff] }
 0x5bf   : > { %v3631_v2 = vpop.f32.mrf.mxu0  ;;  %v3602_v50 = vpop.f32.mrf.mxu3 }
 0x5c0   : > { %v3605_v62 = vadd.f32 %v3600_v28, %v3569_v33  ;;  %v5405_v28 = vld [vmem:[%s6850_s1 + $0x30] sm:$0xff]  ;;  %v5407_v33 = vld [vmem:[%s6850_s1 + $0x40] sm:$0xff] }
 0x5c1   : > { %v3667_v27 = vpop.f32.mrf.mxu1 }
 0x5c2   : > { %v3636_v20 = vadd.f32 %v3631_v2, %v3605_v62 }
 0x5c4   : > { %v3670_v57 = vadd.f32 %v3665_v29, %v3636_v20 }
 0x5c5   : > { %v3566_v3 = vpop.f32.mrf.mxu2 }
 0x5c6   : > { %v3570_v11 = vadd.f32 %v3566_v3, %v3536_v6 }
 0x5c7   : > { %v3633_v37 = vpop.f32.mrf.mxu0 }
 0x5c8   : > { %v3606_v30 = vadd.f32 %v3602_v50, %v3570_v11 }
 0x5ca   : > { %v3637_v25 = vadd.f32 %v3633_v37, %v3606_v30 }
 0x5cc   : > { %v3671_v60 = vadd.f32 %v3667_v27, %v3637_v25 }
 0x5cd   : > { %v3701_v4 = vpop.f32.mrf.mxu2 }
 0x5ce   : > { %v3706_v7 = vadd.f32 %v3701_v4, %v3670_v57 }
 0x5d0   : > { %v3720_v19 = vadd.f32 %v3713_v0, %v3706_v7 }
 0x5d2   : > { %vm3722_vm2 = vcmp.gt.f32.partialorder %v3720_v19, 0.0  ;;  %v3724_v35 = vmul.f32 %v3720_v19, %v5874_v42 }
 0x5d4   : > { %v3726_v22 = vsel %vm3722_vm2, %v3720_v19, %v3724_v35 }
 0x5d5   : > { %v3728_v36 = vpack.c.bf16 %v3726_v22, %v3726_v22  ;;  %v3703_v38 = vpop.f32.mrf.mxu2 }
 0x5d6   : > { %v3707_v48 = vadd.f32 %v3703_v38, %v3671_v60  ;;  %v3826_v60 = vld [vmem:[%s5696_s6 + $0x14] sm:$0x4] }
 0x5d7   : > { %v3735_v39 = vunpack.c.l.b16 %v3728_v36  ;;  %5195 = vmatmul.msk.bf16.vlgmr.msra.gmra.mxu0 %vm583_vm3, %v3728_v36 }
 0x5d8   : > { %v3721_v40 = vadd.f32 %v3718_v8, %v3707_v48  ;;  %4121 = vmatpush.bf16.msra.mxu0 %v4112_v56 }
 0x5d9   : > { %v3736_v41 = vpack.c.b16 %v3735_v39, %v3735_v39  ;;  %v3829_v39 = vld [vmem:[%s5696_s6 + $0x1c] sm:$0x4] }
 0x5da   : > { %vm3723_vm7 = vcmp.gt.f32.partialorder %v3721_v40, 0.0  ;;  %v3725_v43 = vmul.f32 %v3721_v40, %v5874_v42 }
 0x5db   : > { %v3737_v51 = vrot.slane %v3736_v41, 2 }
 0x5dc   : > { %v3727_v32 = vsel %vm3723_vm7, %v3721_v40, %v3725_v43 }
 0x5dd   : > { %v3729_v53 = vpack.c.bf16 %v3727_v32, %v3727_v32  ;;  %5190 = vmatmul.msk.bf16.vlgmr.msrb.gmra.mxu3 %vm583_vm3, %v3737_v51 }
 0x5de   : > { %4085 = vmatpush.bf16.msrb.mxu3 %v4076_v44 }
 0x5df   : > { %v3837_v54 = vunpack.c.l.b16 %v3729_v53  ;;  %5209 = vmatmul.msk.bf16.vlgmr.msra.gmra.mxu2 %vm583_vm3, %v3729_v53 }
 0x5e0   : > { %4186 = vmatpush.bf16.msra.mxu2 %v4177_v34 }
 0x5e1   : > { %v3838_v46 = vpack.c.b16 %v3837_v54, %v3837_v54 }
 0x5e3   : > { %v3839_v26 = vrot.slane %v3838_v46, 2 }
 0x5e5   : > { %5204 = vmatmul.msk.bf16.vlgmr.msra.gmra.mxu1 %vm583_vm3, %v3839_v26 }
 0x5e6   : > { %4152 = vmatpush.bf16.msra.mxu1 %v4143_v55 }
 0x5e7   : > { %5223 = vmatmul.msk.bf16.vlgmr.msrb.gmra.mxu0 %vm254_vm1, %v5399_v23 }
 0x5ed   : > { %5218 = vmatmul.msk.bf16.vlgmr.msra.gmra.mxu3 %vm254_vm1, %v5400_v58 }
 0x5ee   : > { %4222 = vmatpush.bf16.msra.mxu3 %v4213_v45 }
 0x5ef   : > { %5237 = vmatmul.msk.bf16.vlgmr.msrb.gmra.mxu2 %vm254_vm1, %v5402_v12 }
 0x5f5   : > { %5230 = vmatmul.msk.bf16.vlgmr.msrb.gmra.mxu1 %vm254_vm1, %v5401_v63  ;;  %v5408_v63 = vld [vmem:[%s6852_s3] sm:$0xff] }
 0x5f6   : > { %4299 = vmatpush.bf16.msrb.mxu1 %v5408_v63 }
 0x5f7   : > { %5251 = vmatmul.msk.bf16.vlgmr.msra.gmra.mxu0 %vm254_vm1, %v5404_v24 }
 0x5fd   : > { %5244 = vmatmul.msk.bf16.vlgmr.msrb.gmra.mxu3 %vm254_vm1, %v5403_v31 }
 0x5ff   : > { %5265 = vmatmul.msk.bf16.vlgmr.msra.gmra.mxu2 %vm254_vm1, %v5406_v59 }
 0x605   : > { %5258 = vmatmul.msk.bf16.vlgmr.msra.gmra.mxu1 %vm254_vm1, %v5405_v28 }
 0x60d   : > { %5272 = vmatmul.msk.bf16.vlgmr.msra.gmra.mxu3 %vm254_vm1, %v5407_v33 }
 0x654   : > { %v3778_v49 = vpop.f32.mrf.mxu0 }
 0x65c   : > { %v3780_v0 = vpop.f32.mrf.mxu0 }
 0x660   : > { %v3756_v61 = vpop.f32.mrf.mxu3 }
 0x661   : > { %v3779_v2 = vadd.f32 %v3778_v49, %v3756_v61 }
 0x662   : > { %v3858_v62 = vpop.f32.mrf.mxu1  ;;  %v3880_v8 = vpop.f32.mrf.mxu2 }
 0x663   : > { %v3782_v3 = vpack.c.bf16 %v3779_v2, %v3779_v2  ;;  %v3881_v6 = vadd.f32 %v3880_v8, %v3858_v62  ;;  %v5409_v8 = vld [vmem:[%s6852_s3 + $0x8] sm:$0xff] }
 0x664   : > { %v3989_v53 = vpop.f32.mrf.mxu0  ;;  %4277 = vmatpush.bf16.msrb.mxu0 %v5409_v8 }
 0x665   : > { %v3784_v29 = vrot.slane %v3782_v3, 3  ;;  %v3884_v20 = vpack.c.bf16 %v3881_v6, %v3881_v6 }
 0x667   : > { %v3787_v11 = vsel %vm625_vm5, %v3782_v3, %v3784_v29  ;;  %v3789_v50 = vsel %vm630_vm6, %v3782_v3, %v3784_v29  ;;  %v3886_v15 = vrot.slane %v3884_v20, 3  ;;  %v5410_v29 = vld [vmem:[%s6852_s3] sm:$0xff] }
 0x668   : > { %v3791_v57 = vrot.slane %v3789_v50, 1  ;;  %v3793_v30 = vunpack.i.h.s16 %v3787_v11  ;;  %v5196_v37 = vpack.i.b16 %v3787_v11, %v3787_v11  ;;  %v3758_v4 = vpop.f32.mrf.mxu3  ;;  %4401 = vmatpush.bf16.msrb.mxu3 %v5410_v29  ;;  %v4346_v29 = vld [vmem:[%s5696_s6 + $0xc] sm:$0x8] }
 0x669   : > { %v3889_v14 = vsel %vm625_vm5, %v3884_v20, %v3886_v15  ;;  %v3891_v17 = vsel %vm630_vm6, %v3884_v20, %v3886_v15 }
 0x66a   : > { %v3795_v7 = vunpack.i.h.s16 %v3791_v57  ;;  %v3797_v21 = vpack.i.b16 %v3793_v30, %v3793_v30  ;;  %v5197_v25 = vpack.i.b16 %v3791_v57, %v3791_v57  ;;  %v3803_v19 = vperm.slane %v5196_v37, %v5959_v16  ;;  %v3860_v27 = vpop.f32.mrf.mxu1  ;;  %v3882_v35 = vpop.f32.mrf.mxu2  ;;  %v5411_v30 = vld [vmem:[%s6852_s3 + $0x8] sm:$0xff] }
 0x66b   : > { %v3893_v22 = vrot.slane %v3891_v17, 1  ;;  %v3895_v40 = vunpack.i.h.s16 %v3889_v14  ;;  %v5210_v52 = vpack.i.b16 %v3889_v14, %v3889_v14  ;;  %4379 = vmatpush.bf16.msrb.mxu2 %v5411_v30 }
 0x66c   : > { %v3799_v56 = vpack.i.b16 %v3795_v7, %v3795_v7  ;;  %v3807_v36 = vperm.slane %v3797_v21, %v5959_v16  ;;  %v3811_v38 = vperm.slane %v5197_v25, %v5959_v16  ;;  %v3821_v48 = vsel %vm6235_vm14, %v3803_v19, %v3820_v1  ;;  %v3991_v62 = vpop.f32.mrf.mxu0 }
 0x66d   : > { %3822 = vst [vmem:[%s5696_s6 + $0x4] sm:$0x4] %v3821_v48  ;;  %v3897_v51 = vunpack.i.h.s16 %v3893_v22  ;;  %v3899_v54 = vpack.i.b16 %v3895_v40, %v3895_v40  ;;  %v5211_v46 = vpack.i.b16 %v3893_v22, %v3893_v22  ;;  %v3905_v23 = vperm.slane %v5210_v52, %v5959_v16  ;;  %v4241_v52 = vpop.permute.xlu1 %4240 }
 0x66e   : > { %v3815_v41 = vperm.slane %v3799_v56, %v5959_v16  ;;  %v3824_v43 = vsel %vm6235_vm14, %v3807_v36, %v3823_v5  ;;  %v3827_v44 = vsel %vm6235_vm14, %v3811_v38, %v3826_v60  ;;  %v4236_v56 = vpop.permute.xlu0 %4235 }
 0x66f   : > { %3825 = vst [vmem:[%s5696_s6 + $0xc] sm:$0x4] %v3824_v43  ;;  %v3901_v26 = vpack.i.b16 %v3897_v51, %v3897_v51  ;;  %v3909_v47 = vperm.slane %v3899_v54, %v5959_v16  ;;  %v3913_v12 = vperm.slane %v5211_v46, %v5959_v16 }
 0x670   : > { %3828 = vst [vmem:[%s5696_s6 + $0x14] sm:$0x4] %v3827_v44  ;;  %v3830_v32 = vsel %vm6235_vm14, %v3815_v41, %v3829_v39  ;;  %v3965_v34 = vpop.f32.mrf.mxu3 }
 0x671   : > { %3831 = vst [vmem:[%s5696_s6 + $0x1c] sm:$0x4] %v3830_v32  ;;  %v3917_v24 = vperm.slane %v3901_v26, %v5959_v16  ;;  %v3990_v2 = vadd.f32 %v3989_v53, %v3965_v34 }
 0x672   : > { %v4023_v58 = vpop.f32.mrf.mxu1  ;;  %v4053_v49 = vpop.f32.mrf.mxu2 }
 0x673   : > { %v4028_v3 = vadd.f32 %v4023_v58, %v3990_v2  ;;  %v4343_v2 = vld [vmem:[%s5696_s6 + $0x4] sm:$0x8] }
 0x674   : > { %v3922_v55 = vld [vmem:[%s5696_s6 + $0x4] sm:$0x4]  ;;  %v4123_v15 = vpop.f32.mrf.mxu0 }
 0x675   : > { %v3923_v10 = vsel %vm6262_vm4, %v3905_v23, %v3922_v55  ;;  %v4058_v11 = vadd.f32 %v4053_v49, %v4028_v3 }
 0x676   : > { %3924 = vst [vmem:[%s5696_s6 + $0x4] sm:$0x4] %v3923_v10  ;;  %v3925_v45 = vld [vmem:[%s5696_s6 + $0xc] sm:$0x4] }
 0x677   : > { %v3926_v31 = vsel %vm6262_vm4, %v3909_v47, %v3925_v45  ;;  %v3928_v59 = vld [vmem:[%s5696_s6 + $0x14] sm:$0x4] }
 0x678   : > { %3927 = vst [vmem:[%s5696_s6 + $0xc] sm:$0x4] %v3926_v31  ;;  %v3929_v28 = vsel %vm6262_vm4, %v3913_v12, %v3928_v59  ;;  %v3931_v33 = vld [vmem:[%s5696_s6 + $0x1c] sm:$0x4]  ;;  %v3967_v0 = vpop.f32.mrf.mxu3 }
 0x679   : > { %3930 = vst [vmem:[%s5696_s6 + $0x14] sm:$0x4] %v3929_v28  ;;  %v3932_v61 = vsel %vm6262_vm4, %v3917_v24, %v3931_v33  ;;  %v3992_v50 = vadd.f32 %v3991_v62, %v3967_v0 }
 0x67a   : > { %3933 = vst [vmem:[%s5696_s6 + $0x1c] sm:$0x4] %v3932_v61  ;;  %v4025_v6 = vpop.f32.mrf.mxu1  ;;  %v4055_v18 = vpop.f32.mrf.mxu2 }
 0x67b   : > { %v4029_v37 = vadd.f32 %v4025_v6, %v3992_v50 }
 0x67c   : > { %v4125_v19 = vpop.f32.mrf.mxu0 }
 0x67d   : > { %v4059_v17 = vadd.f32 %v4055_v18, %v4029_v37 }
 0x680   : > { %v4087_v20 = vpop.f32.mrf.mxu3 }
 0x681   : > { %v4092_v57 = vadd.f32 %v4087_v20, %v4058_v11  ;;  %v4349_v20 = vld [vmem:[%s5696_s6 + $0x14] sm:$0x8] }
 0x682   : > { %v4154_v4 = vpop.f32.mrf.mxu1  ;;  %v4188_v7 = vpop.f32.mrf.mxu2 }
 0x683   : > { %v4128_v1 = vadd.f32 %v4123_v15, %v4092_v57  ;;  %v4352_v57 = vld [vmem:[%s5696_s6 + $0x1c] sm:$0x8] }
 0x685   : > { %v4159_v21 = vadd.f32 %v4154_v4, %v4128_v1 }
 0x687   : > { %v4193_v27 = vadd.f32 %v4188_v7, %v4159_v21 }
 0x688   : > { %v4089_v14 = vpop.f32.mrf.mxu3 }
 0x689   : > { %v4093_v25 = vadd.f32 %v4089_v14, %v4059_v17 }
 0x68a   : > { %v4156_v5 = vpop.f32.mrf.mxu1  ;;  %v4190_v48 = vpop.f32.mrf.mxu2 }
 0x68b   : > { %v4129_v35 = vadd.f32 %v4125_v19, %v4093_v25 }
 0x68d   : > { %v4160_v36 = vadd.f32 %v4156_v5, %v4129_v35 }
 0x68f   : > { %v4194_v40 = vadd.f32 %v4190_v48, %v4160_v36 }
 0x690   : > { %v4224_v60 = vpop.f32.mrf.mxu3 }
 0x691   : > { %v4229_v22 = vadd.f32 %v4224_v60, %v4193_v27 }
 0x693   : > { %v4243_v38 = vadd.f32 %v4236_v56, %v4229_v22 }
 0x695   : > { %vm4245_vm0 = vcmp.gt.f32.partialorder %v4243_v38, 0.0  ;;  %v4247_v39 = vmul.f32 %v4243_v38, %v5874_v42 }
 0x697   : > { %v4249_v41 = vsel %vm4245_vm0, %v4243_v38, %v4247_v39 }
 0x698   : > { %v4251_v43 = vpack.c.bf16 %v4249_v41, %v4249_v41  ;;  %v4226_v44 = vpop.f32.mrf.mxu3 }
 0x699   : > { %v4230_v51 = vadd.f32 %v4226_v44, %v4194_v40 }
 0x69a   : > { %v4258_v32 = vunpack.c.l.b16 %v4251_v43  ;;  %5284 = vmatmul.msk.bf16.vlgmr.msrb.gmra.mxu1 %vm583_vm3, %v4251_v43 }
 0x69b   : > { %v4244_v34 = vadd.f32 %v4241_v52, %v4230_v51 }
 0x69c   : > { %v4259_v53 = vpack.c.b16 %v4258_v32, %v4258_v32 }
 0x69d   : > { %vm4246_vm1 = vcmp.gt.f32.partialorder %v4244_v34, 0.0  ;;  %v4248_v54 = vmul.f32 %v4244_v34, %v5874_v42 }
 0x69e   : > { %v4260_v46 = vrot.slane %v4259_v53, 2 }
 0x69f   : > { %v4250_v26 = vsel %vm4246_vm1, %v4244_v34, %v4248_v54 }
 0x6a0   : > { %v4252_v23 = vpack.c.bf16 %v4250_v26, %v4250_v26  ;;  %5279 = vmatmul.msk.bf16.vlgmr.msrb.gmra.mxu0 %vm583_vm3, %v4260_v46 }
 0x6a2   : > { %v4360_v55 = vunpack.c.l.b16 %v4252_v23  ;;  %5298 = vmatmul.msk.bf16.vlgmr.msrb.gmra.mxu3 %vm583_vm3, %v4252_v23 }
 0x6a4   : > { %v4361_v58 = vpack.c.b16 %v4360_v55, %v4360_v55 }
 0x6a6   : > { %v4362_v47 = vrot.slane %v4361_v58, 2 }
 0x6a8   : > { %5293 = vmatmul.msk.bf16.vlgmr.msrb.gmra.mxu2 %vm583_vm3, %v4362_v47 }
 0x717   : > { %v4301_v10 = vpop.f32.mrf.mxu1 }
 0x71d   : > { %v4279_v12 = vpop.f32.mrf.mxu0 }
 0x71e   : > { %v4302_v45 = vadd.f32 %v4301_v10, %v4279_v12 }
 0x71f   : > { %v4303_v63 = vpop.f32.mrf.mxu1 }
 0x720   : > { %v4305_v42 = vpack.c.bf16 %v4302_v45, %v4302_v45 }
 0x722   : > { %v4307_v24 = vrot.slane %v4305_v42, 3 }
 0x724   : > { %v4310_v31 = vsel %vm625_vm5, %v4305_v42, %v4307_v24  ;;  %v4312_v59 = vsel %vm630_vm6, %v4305_v42, %v4307_v24 }
 0x725   : > { %v4314_v28 = vrot.slane %v4312_v59, 1  ;;  %v4316_v33 = vunpack.i.h.s16 %v4310_v31  ;;  %v5285_v49 = vpack.i.b16 %v4310_v31, %v4310_v31  ;;  %v4281_v0 = vpop.f32.mrf.mxu0  ;;  %v4403_v61 = vpop.f32.mrf.mxu3 }
 0x727   : > { %v4318_v62 = vunpack.i.h.s16 %v4314_v28  ;;  %v4320_v8 = vpack.i.b16 %v4316_v33, %v4316_v33  ;;  %v5286_v3 = vpack.i.b16 %v4314_v28, %v4314_v28  ;;  %v4326_v6 = vperm.slane %v5285_v49, %v5959_v16 }
 0x729   : > { %v4322_v11 = vpack.i.b16 %v4318_v62, %v4318_v62  ;;  %v4330_v50 = vperm.slane %v4320_v8, %v5959_v16  ;;  %v4334_v18 = vperm.slane %v5286_v3, %v5959_v16  ;;  %v4344_v15 = vsel %vm6355_vm15, %v4326_v6, %v4343_v2 }
 0x72a   : > { %4345 = vst [vmem:[%s5696_s6 + $0x4] sm:$0x8] %v4344_v15 }
 0x72b   : > { %v4338_v30 = vperm.slane %v4322_v11, %v5959_v16  ;;  %v4347_v37 = vsel %vm6355_vm15, %v4330_v50, %v4346_v29  ;;  %v4350_v4 = vsel %vm6355_vm15, %v4334_v18, %v4349_v20  ;;  %v4381_v1 = vpop.f32.mrf.mxu2 }
 0x72c   : > { %4348 = vst [vmem:[%s5696_s6 + $0xc] sm:$0x8] %v4347_v37  ;;  %v4404_v14 = vadd.f32 %v4403_v61, %v4381_v1 }
 0x72d   : > { %4351 = vst [vmem:[%s5696_s6 + $0x14] sm:$0x8] %v4350_v4  ;;  %v4353_v17 = vsel %vm6355_vm15, %v4338_v30, %v4352_v57  ;;  %v4405_v7 = vpop.f32.mrf.mxu3 }
 0x72e   : > { %4354 = vst [vmem:[%s5696_s6 + $0x1c] sm:$0x8] %v4353_v17  ;;  %v4407_v21 = vpack.c.bf16 %v4404_v14, %v4404_v14 }
 0x730   : > { %v4409_v25 = vrot.slane %v4407_v21, 3 }
 0x731   : > { %v4445_v48 = vld [vmem:[%s5696_s6 + $0x4] sm:$0x8] }
 0x732   : > { %v4412_v19 = vsel %vm625_vm5, %v4407_v21, %v4409_v25  ;;  %v4414_v27 = vsel %vm630_vm6, %v4407_v21, %v4409_v25 }
 0x733   : > { %v4416_v35 = vrot.slane %v4414_v27, 1  ;;  %v4418_v5 = vunpack.i.h.s16 %v4412_v19  ;;  %v5299_v60 = vpack.i.b16 %v4412_v19, %v4412_v19  ;;  %v4383_v22 = vpop.f32.mrf.mxu2  ;;  %v4448_v44 = vld [vmem:[%s5696_s6 + $0xc] sm:$0x8] }
 0x734   : > { %v4451_v51 = vld [vmem:[%s5696_s6 + $0x14] sm:$0x8] }
 0x735   : > { %v4420_v56 = vunpack.i.h.s16 %v4416_v35  ;;  %v4422_v13 = vpack.i.b16 %v4418_v5, %v4418_v5  ;;  %v5300_v36 = vpack.i.b16 %v4416_v35, %v4416_v35  ;;  %v4428_v38 = vperm.slane %v5299_v60, %v5959_v16  ;;  %v4454_v53 = vld [vmem:[%s5696_s6 + $0x1c] sm:$0x8] }
 0x737   : > { %v4424_v39 = vpack.i.b16 %v4420_v56, %v4420_v56  ;;  %v4432_v40 = vperm.slane %v4422_v13, %v5959_v16  ;;  %v4436_v41 = vperm.slane %v5300_v36, %v5959_v16  ;;  %v4446_v43 = vsel %vm6382_vm10, %v4428_v38, %v4445_v48 }
 0x738   : > { %4447 = vst [vmem:[%s5696_s6 + $0x4] sm:$0x8] %v4446_v43 }
 0x739   : > { %v4440_v52 = vperm.slane %v4424_v39, %v5959_v16  ;;  %v4449_v32 = vsel %vm6382_vm10, %v4432_v40, %v4448_v44  ;;  %v4452_v34 = vsel %vm6382_vm10, %v4436_v41, %v4451_v51 }
 0x73a   : > { %4450 = vst [vmem:[%s5696_s6 + $0xc] sm:$0x8] %v4449_v32 }
 0x73b   : > { %4453 = vst [vmem:[%s5696_s6 + $0x14] sm:$0x8] %v4452_v34  ;;  %v4455_v54 = vsel %vm6382_vm10, %v4440_v52, %v4454_v53 }
 0x73c   : > { %4456 = vst [vmem:[%s5696_s6 + $0x1c] sm:$0x8] %v4455_v54 }
 0x73d   : > { %s5302_s15 = sshll.u32 %s5555_s23, 1  ;;  %s5303_s16 = sshll.u32 %s5559_s24, 4 }
 0x73e   : > { %s4469_s17 = sadd.s32 %s5303_s16, %s5302_s15  ;;  %s4482_s18 = sshll.u32 %s5696_s6, 4  ;;  %s4483_s18 = int_to_ptr.vmem [resolvable:$true] %s4482_s18 }
 0x73f   : > { %s5304_s19 = sshll.u32 %s4469_s17, 2  ;;  %s5577_s11 = smov 128  }
 0x740   : > { %s4471_s28 = scalar_lea.hbm %s6854_s5, %s5304_s19  ;;  %5412 = sst [smem:[#allocation9]] (%p5668_p3), %s5577_s11 }
 0x741   : > { %s4484_s13 = sshll.u32 %s4471_s28, 4  ;;  %s5578_s10 = smov 256   ;;  %s4485_s13 = int_to_ptr.hbm [resolvable:$true] %s4484_s13 }
 0x742   : > { %5413 = sst [smem:[#allocation9 + $0x1]] (%p5668_p3), %s5578_s10  ;;  %s5579_s23 = smov 2  }
 0x743   : > { %5414 = sst [smem:[#allocation9 + $0x2]] (%p5668_p3), %s5579_s23  ;;  %s5580_s24 = smov 64  }
 0x744   : > { %5415 = sst [smem:[#allocation9 + $0x3]] (%p5668_p3), %s5580_s24  ;;  %s5581_s6 = smov 4  }
 0x745   : > { %5416 = sst [smem:[#allocation9 + $0x4]] (%p5668_p3), %s5580_s24  ;;  %s5582_s15 = smov [#allocation8]  }
 0x746   : > { %5417 = sst [smem:[#allocation9 + $0x5]] (%p5668_p3), %s5581_s6  ;;  %s5583_s16 = smov 0  }
 0x747   : > { %5418 = dma.general (%p5668_p3), %s4483_s18, 512, %s4485_s13, %s4458_s14, %s5582_s15, [#allocation9], %s5583_s16, 0  }
 0x748 PF: > { %p5424_p12 = scmp.ge.s32.totalorder %s5571_s27, 2  ;;  %s4512_s17 = sand.u32 1, %s5543_s20  }
 0x749   : > { %s4513_s19 = scalar_lea.sflag [#allocation6], %s4512_s17 }
 0x74a   : > { %p5421_p13 = pnand %p5424_p12, %p5677_p8 }
 0x74c   : > { %p5422_p0 = pneg %p5421_p13 }
 0x74e   : > { %5538 = dma.done.wait (%p5422_p0), %s4513_s19, 512  }
 0x74f   : > { %5540 = vsyncadd (%p5422_p0), %s4513_s19, 4294966784  ;;  %s19_s27 = sadd.s32 1, %s5571_s27   ;;  %s6873_s20 = smov %s5547_s21 }
 0x750   : > { %p16_p1 = scmp.ge.s32.totalorder %s19_s27, 6   ;;  %s6874_s21 = smov %s5551_s22 }
 0x751   : > { %s6875_s22 = smov %s5686_s12  ;;  %s6876_s23 = smov %s5563_s25 }
 0x752   : > { %s6877_s24 = smov %s5567_s26  ;;  %s6878_s25 = smov %s6881_s29 }
 0x753   : > { %s6879_s26 = smov %s6885_s30  ;;  %18 = sbr.rel (!%p16_p1) target bundleno = 7 (0x7), region = 124 }
 0x758   :  { %4519 = vsyncpa [#allocation6], 1 }
 0x759   :  { %4521 = vsyncpa [#allocation6 + $0x1], 1 }
 0x75a   :  { %4522 = vsyncmov [#allocation3] }
 0x75d   :  { %s4523_s7 = vpop.sfrf %4522 }
 0x75e   :  { %p5307_p2 = scmp.ne.s32.totalorder %s4523_s7, 0 }
 0x760   :  { %4527 = shalt.err (%p5307_p2)  }

</bundles_post_ra>
